<compile_context>
chip_gen: v6e
topology: v6e:2x2x1
jax: 0.10.0
libtpu: 0.0.40
codegen_flags: <defaults>
</compile_context>

<pallas_src>
import functools
import math

import jax
import jax.numpy as jnp
from jax.experimental import pallas as pl
from jax.experimental.pallas import tpu as pltpu

# ----------------------------- configuration --------------------------------
BS = 2
NUM_PATCH = 8            # sequence length L
NUM_C = 3
H = W = 16
EMBED_DIM = 32
NUM_HEADS = 4
HEAD_DIM = EMBED_DIM // NUM_HEADS
OUTPUT_DIM = 10
OUT_PAD = 128            # fc output padded to a full lane group (sliced back to 10)
CNN_HIDDEN = 16
LN_EPS = 1e-5
K = 3                    # conv kernel size
KKC = K * K * NUM_C      # 27
KKC_PAD = 32             # padded contraction dim of the conv GEMM


# ----------------------------- in-kernel helpers -----------------------------
def _layernorm(x, g, b):
    mu = jnp.mean(x, axis=-1, keepdims=True)
    var = jnp.mean(jnp.square(x - mu), axis=-1, keepdims=True)
    return (x - mu) * jax.lax.rsqrt(var + LN_EPS) * g + b


def _attention_block(tok, wqkv, bqkv, wo, bo, g, b, *, bs, seq, num_heads, head_dim):
    """MHA + LayerNorm on batched (bs*L, E) f32 tokens (no residual, eval mode)."""
    e = num_heads * head_dim
    scale = 1.0 / math.sqrt(head_dim)

    # Fused QKV projection: one matmul for all of Q, K, V and all heads.
    qkv = jnp.dot(tok.astype(jnp.bfloat16), wqkv,
                  preferred_element_type=jnp.float32) + bqkv          # (bs*L, 3E)

    def heads(base):                                                  # (bs*H, L, dh)
        return jnp.stack(
            [qkv[bb * seq:(bb + 1) * seq,
                 base + h * head_dim: base + (h + 1) * head_dim]
             for bb in range(bs) for h in range(num_heads)], axis=0)

    q3, k3, v3 = heads(0), heads(e), heads(2 * e)

    # Batched scores / softmax / context over the (bs*H) leading batch dim.
    s = jnp.einsum('bld,bmd->blm', q3, k3,
                   preferred_element_type=jnp.float32) * scale        # (bs*H, L, L)
    s = s - jnp.max(s, axis=-1, keepdims=True)
    p = jnp.exp(s)
    p = p * pl.reciprocal(jnp.sum(p, axis=-1, keepdims=True), approx=True)
    ctx3 = jnp.einsum('blm,bmd->bld', p, v3,
                      preferred_element_type=jnp.float32)             # (bs*H, L, dh)

    # Re-pack heads on lanes and apply the output projection with ONE matmul.
    ctx = jnp.concatenate(
        [jnp.concatenate([ctx3[bb * num_heads + h] for h in range(num_heads)],
                         axis=-1)
         for bb in range(bs)], axis=0)                                # (bs*L, E)
    y = jnp.dot(ctx.astype(jnp.bfloat16), wo,
                preferred_element_type=jnp.float32) + bo
    return _layernorm(y, g, b)


# ----------------------------- fused kernel ----------------------------------
def fused_kernel(colT_ref, pool_ref, wc_ref, bc_ref, wp_ref, bp_ref,
                 gcnn_ref, bcnn_ref,
                 a1_wqkv_ref, a1_bqkv_ref, a1_wo_ref, a1_bo_ref, a1_g_ref, a1_b_ref,
                 a2_wqkv_ref, a2_bqkv_ref, a2_wo_ref, a2_bo_ref, a2_g_ref, a2_b_ref,
                 fcw_ref, fcb_ref, out_ref, *, bs, seq, num_heads, head_dim):
    # ---- conv stem, transposed GEMM: channels on sublanes, (token*spatial) lanes
    hactT = jnp.dot(wc_ref[...], colT_ref[...],
                    preferred_element_type=jnp.float32) + bc_ref[...]  # (CH, bs*L*HW)
    hactT = jnp.maximum(hactT, 0.0)                                    # ReLU

    # spatial mean pool = one MXU matmul against the block-diagonal averaging
    # matrix, contracting the lane dims (A @ B^T pattern) -> (bs*L, CH) directly.
    pooled = jax.lax.dot_general(pool_ref[...], hactT.astype(jnp.bfloat16),
                                 (((1,), (1,)), ((), ())),
                                 preferred_element_type=jnp.float32)   # (bs*L, CH)
    feat = jnp.dot(pooled.astype(jnp.bfloat16), wp_ref[...],
                   preferred_element_type=jnp.float32) + bp_ref[...]   # (bs*L, E)
    tok = _layernorm(feat, gcnn_ref[...], bcnn_ref[...])               # norm_cnn

    # ---- two MHA + LayerNorm blocks (dropout == identity) --------------------
    tok = _attention_block(tok, a1_wqkv_ref[...], a1_bqkv_ref[...], a1_wo_ref[...],
                           a1_bo_ref[...], a1_g_ref[...], a1_b_ref[...],
                           bs=bs, seq=seq, num_heads=num_heads, head_dim=head_dim)
    tok = _attention_block(tok, a2_wqkv_ref[...], a2_bqkv_ref[...], a2_wo_ref[...],
                           a2_bo_ref[...], a2_g_ref[...], a2_b_ref[...],
                           bs=bs, seq=seq, num_heads=num_heads, head_dim=head_dim)

    # ---- final fc: flatten each batch element's tokens onto lanes, one matmul --
    z = jnp.concatenate(
        [jnp.concatenate([tok[bb * seq + l: bb * seq + l + 1, :]
                          for l in range(seq)], axis=1)
         for bb in range(bs)], axis=0)                                 # (bs, L*E)
    out_ref[...] = jnp.dot(z.astype(jnp.bfloat16), fcw_ref[...],
                           preferred_element_type=jnp.float32) + fcb_ref[...]


# ----------------------------- wrapper / glue ---------------------------------
def _full_spec(arr):
    nd = arr.ndim
    return pl.BlockSpec(arr.shape, lambda i, _nd=nd: (0,) * _nd)


def fused_forward(colT, poolT, p):
    weights = (
        p["wc"], p["bc"], p["wp"], p["bp"], p["g_cnn"], p["b_cnn"],
        p["att1_wqkv"], p["att1_bqkv"], p["att1_wo"], p["att1_bo"],
        p["att1_g"], p["att1_b"],
        p["att2_wqkv"], p["att2_bqkv"], p["att2_wo"], p["att2_bo"],
        p["att2_g"], p["att2_b"],
        p["fc_w"], p["fc_b"],
    )
    inputs = (colT, poolT) + weights
    kernel = functools.partial(fused_kernel, bs=BS, seq=NUM_PATCH,
                               num_heads=NUM_HEADS, head_dim=HEAD_DIM)
    return pl.pallas_call(
        kernel,
        out_shape=jax.ShapeDtypeStruct((BS, OUT_PAD), jnp.float32),
        grid=(1,),
        in_specs=[_full_spec(a) for a in inputs],
        out_specs=pl.BlockSpec((BS, OUT_PAD), lambda i: (0, 0)),
        compiler_params=pltpu.CompilerParams(
            dimension_semantics=("arbitrary",)),
    )(*inputs)


def im2col_3x3(x_nchw):
    """(N, C, H, W) -> (N, H*W, 9*C), padding=1 stride=1, tap-major/channel-minor."""
    n, c, h, w = x_nchw.shape
    x_nhwc = jnp.transpose(x_nchw, (0, 2, 3, 1))
    xp = jnp.pad(x_nhwc, ((0, 0), (1, 1), (1, 1), (0, 0)))
    shifts = [xp[:, dy:dy + h, dx:dx + w, :] for dy in range(K) for dx in range(K)]
    col = jnp.stack(shifts, axis=3)                                    # (N, H, W, 9, C)
    return col.reshape(n, h * w, K * K * c)


def init_params(key):
    ks = iter(jax.random.split(key, 8))
    p = {}
    # CNN stem (matmul weights bf16; biases / LN params f32)
    wc = jax.random.normal(next(ks), (CNN_HIDDEN, KKC), jnp.float32) * 0.1
    p["wc"] = jnp.pad(wc, ((0, 0), (0, KKC_PAD - KKC))).astype(jnp.bfloat16)
    p["bc"] = jnp.zeros((CNN_HIDDEN, 1), jnp.float32)
    p["wp"] = (jax.random.normal(next(ks), (CNN_HIDDEN, EMBED_DIM), jnp.float32)
               * 0.1).astype(jnp.bfloat16)
    p["bp"] = jnp.zeros((1, EMBED_DIM), jnp.float32)
    p["g_cnn"] = jnp.ones((1, EMBED_DIM), jnp.float32)
    p["b_cnn"] = jnp.zeros((1, EMBED_DIM), jnp.float32)
    # two attention blocks: Wq|Wk|Wv packed into one (E, 3E) matrix
    s = 1.0 / math.sqrt(EMBED_DIM)
    for base in ("att1", "att2"):
        p[f"{base}_wqkv"] = (jax.random.normal(
            next(ks), (EMBED_DIM, 3 * EMBED_DIM), jnp.float32) * s).astype(jnp.bfloat16)
        p[f"{base}_bqkv"] = jnp.zeros((1, 3 * EMBED_DIM), jnp.float32)
        p[f"{base}_wo"] = (jax.random.normal(
            next(ks), (EMBED_DIM, EMBED_DIM), jnp.float32) * s).astype(jnp.bfloat16)
        p[f"{base}_bo"] = jnp.zeros((1, EMBED_DIM), jnp.float32)
        p[f"{base}_g"] = jnp.ones((1, EMBED_DIM), jnp.float32)
        p[f"{base}_b"] = jnp.zeros((1, EMBED_DIM), jnp.float32)
    # final fc, output lanes zero-padded 10 -> 128 for a lane-dense store
    fcw = (jax.random.normal(next(ks), (NUM_PATCH * EMBED_DIM, OUTPUT_DIM), jnp.float32)
           * (1.0 / math.sqrt(NUM_PATCH * EMBED_DIM)))
    p["fc_w"] = jnp.pad(fcw, ((0, 0), (0, OUT_PAD - OUTPUT_DIM))).astype(jnp.bfloat16)
    p["fc_b"] = jnp.zeros((1, OUT_PAD), jnp.float32)
    return p


@jax.jit
def cnn_self_att_forward(x, p):
    bs, num_patch, c, h, w = x.shape
    imgs = x.reshape(bs * num_patch, c, h, w)
    col = im2col_3x3(imgs)                                            # (bs*P, H*W, 9C)
    # transposed, zero-padded conv-GEMM operand: (C*9 padded, bs*P*H*W) bf16
    colT = jnp.transpose(col.reshape(bs * num_patch * h * w, K * K * c))
    colT = jnp.pad(colT, ((0, KKC_PAD - K * K * c), (0, 0))).astype(jnp.bfloat16)
    # block-diagonal spatial-averaging matrix (bs*P, bs*P*H*W) -- constant under jit
    poolT = jnp.kron(jnp.eye(bs * num_patch, dtype=jnp.float32),
                     jnp.full((1, h * w), 1.0 / (h * w), jnp.float32)
                     ).astype(jnp.bfloat16)
    out = fused_forward(colT, poolT, p)                               # (bs, OUT_PAD)
    return out[:, :OUTPUT_DIM]                                        # (bs, output_dim)


if __name__ == "__main__":
    x = jax.random.normal(jax.random.PRNGKey(0),
                          (BS, NUM_PATCH, NUM_C, H, W), jnp.float32)
    params = init_params(jax.random.PRNGKey(42))

    out = jax.block_until_ready(cnn_self_att_forward(x, params))
    assert out.shape == (BS, OUTPUT_DIM), out.shape
    assert bool(jnp.all(jnp.isfinite(out)))
    print("KERNEL_OK")
</pallas_src>

<mosaic_0001>
module attributes {stable_mosaic.version = 11 : i64} {
  func.func @fused_kernel(%arg0: i32, %arg1: memref<32x4096xbf16, #tpu.memory_space<vmem>>, %arg2: memref<16x4096xbf16, #tpu.memory_space<vmem>>, %arg3: memref<16x32xbf16, #tpu.memory_space<vmem>>, %arg4: memref<16x1xf32, #tpu.memory_space<vmem>>, %arg5: memref<16x32xbf16, #tpu.memory_space<vmem>>, %arg6: memref<1x32xf32, #tpu.memory_space<vmem>>, %arg7: memref<1x32xf32, #tpu.memory_space<vmem>>, %arg8: memref<1x32xf32, #tpu.memory_space<vmem>>, %arg9: memref<32x96xbf16, #tpu.memory_space<vmem>>, %arg10: memref<1x96xf32, #tpu.memory_space<vmem>>, %arg11: memref<32x32xbf16, #tpu.memory_space<vmem>>, %arg12: memref<1x32xf32, #tpu.memory_space<vmem>>, %arg13: memref<1x32xf32, #tpu.memory_space<vmem>>, %arg14: memref<1x32xf32, #tpu.memory_space<vmem>>, %arg15: memref<32x96xbf16, #tpu.memory_space<vmem>>, %arg16: memref<1x96xf32, #tpu.memory_space<vmem>>, %arg17: memref<32x32xbf16, #tpu.memory_space<vmem>>, %arg18: memref<1x32xf32, #tpu.memory_space<vmem>>, %arg19: memref<1x32xf32, #tpu.memory_space<vmem>>, %arg20: memref<1x32xf32, #tpu.memory_space<vmem>>, %arg21: memref<256x128xbf16, #tpu.memory_space<vmem>>, %arg22: memref<1x128xf32, #tpu.memory_space<vmem>>, %arg23: memref<2x128xf32, #tpu.memory_space<vmem>>) attributes {dimension_semantics = [#tpu.dimension_semantics<arbitrary>], iteration_bounds = array<i64: 1>, scalar_prefetch = 0 : i64, scratch_operands = 0 : i64, tpu.core_type = #tpu.core_type<tc>, window_params = [{pipeline_mode = #tpu.pipeline_mode<synchronous>, transform_indices = @transform_0, window_bounds = array<i64: 32, 4096>}, {pipeline_mode = #tpu.pipeline_mode<synchronous>, transform_indices = @transform_1, window_bounds = array<i64: 16, 4096>}, {pipeline_mode = #tpu.pipeline_mode<synchronous>, transform_indices = @transform_2, window_bounds = array<i64: 16, 32>}, {pipeline_mode = #tpu.pipeline_mode<synchronous>, transform_indices = @transform_3, window_bounds = array<i64: 16, 1>}, {pipeline_mode = #tpu.pipeline_mode<synchronous>, transform_indices = @transform_4, window_bounds = array<i64: 16, 32>}, {pipeline_mode = #tpu.pipeline_mode<synchronous>, transform_indices = @transform_5, window_bounds = array<i64: 1, 32>}, {pipeline_mode = #tpu.pipeline_mode<synchronous>, transform_indices = @transform_6, window_bounds = array<i64: 1, 32>}, {pipeline_mode = #tpu.pipeline_mode<synchronous>, transform_indices = @transform_7, window_bounds = array<i64: 1, 32>}, {pipeline_mode = #tpu.pipeline_mode<synchronous>, transform_indices = @transform_8, window_bounds = array<i64: 32, 96>}, {pipeline_mode = #tpu.pipeline_mode<synchronous>, transform_indices = @transform_9, window_bounds = array<i64: 1, 96>}, {pipeline_mode = #tpu.pipeline_mode<synchronous>, transform_indices = @transform_10, window_bounds = array<i64: 32, 32>}, {pipeline_mode = #tpu.pipeline_mode<synchronous>, transform_indices = @transform_11, window_bounds = array<i64: 1, 32>}, {pipeline_mode = #tpu.pipeline_mode<synchronous>, transform_indices = @transform_12, window_bounds = array<i64: 1, 32>}, {pipeline_mode = #tpu.pipeline_mode<synchronous>, transform_indices = @transform_13, window_bounds = array<i64: 1, 32>}, {pipeline_mode = #tpu.pipeline_mode<synchronous>, transform_indices = @transform_14, window_bounds = array<i64: 32, 96>}, {pipeline_mode = #tpu.pipeline_mode<synchronous>, transform_indices = @transform_15, window_bounds = array<i64: 1, 96>}, {pipeline_mode = #tpu.pipeline_mode<synchronous>, transform_indices = @transform_16, window_bounds = array<i64: 32, 32>}, {pipeline_mode = #tpu.pipeline_mode<synchronous>, transform_indices = @transform_17, window_bounds = array<i64: 1, 32>}, {pipeline_mode = #tpu.pipeline_mode<synchronous>, transform_indices = @transform_18, window_bounds = array<i64: 1, 32>}, {pipeline_mode = #tpu.pipeline_mode<synchronous>, transform_indices = @transform_19, window_bounds = array<i64: 1, 32>}, {pipeline_mode = #tpu.pipeline_mode<synchronous>, transform_indices = @transform_20, window_bounds = array<i64: 256, 128>}, {pipeline_mode = #tpu.pipeline_mode<synchronous>, transform_indices = @transform_21, window_bounds = array<i64: 1, 128>}, {pipeline_mode = #tpu.pipeline_mode<synchronous>, transform_indices = @transform_22, window_bounds = array<i64: 2, 128>}]} {
    %c0 = arith.constant 0 : index
    %c0_0 = arith.constant 0 : index
    %0 = vector.load %arg3[%c0, %c0_0] : memref<16x32xbf16, #tpu.memory_space<vmem>>, vector<16x32xbf16>
    %c0_1 = arith.constant 0 : index
    %c0_2 = arith.constant 0 : index
    %1 = vector.load %arg1[%c0_1, %c0_2] : memref<32x4096xbf16, #tpu.memory_space<vmem>>, vector<32x4096xbf16>
    %cst = arith.constant dense<0.000000e+00> : vector<16x4096xf32>
    %2 = tpu.matmul %0, %1, %cst {dimension_numbers = #tpu.dot_dimension_numbers<[1], [0], [0], [1], [0, 0, 1, 1], [], []>} : vector<16x32xbf16>, vector<32x4096xbf16>, vector<16x4096xf32> -> vector<16x4096xf32>
    %c0_3 = arith.constant 0 : index
    %c0_4 = arith.constant 0 : index
    %3 = vector.load %arg4[%c0_3, %c0_4] : memref<16x1xf32, #tpu.memory_space<vmem>>, vector<16x1xf32>
    %4 = vector.broadcast %3 : vector<16x1xf32> to vector<16x4096xf32>
    %5 = arith.addf %2, %4 : vector<16x4096xf32>
    %cst_5 = arith.constant 0.000000e+00 : f32
    %6 = vector.broadcast %cst_5 : f32 to vector<16x4096xf32>
    %7 = arith.maximumf %5, %6 : vector<16x4096xf32>
    %c0_6 = arith.constant 0 : index
    %c0_7 = arith.constant 0 : index
    %8 = vector.load %arg2[%c0_6, %c0_7] : memref<16x4096xbf16, #tpu.memory_space<vmem>>, vector<16x4096xbf16>
    %9 = arith.truncf %7 : vector<16x4096xf32> to vector<16x4096xbf16>
    %cst_8 = arith.constant dense<0.000000e+00> : vector<16x16xf32>
    %10 = tpu.matmul %8, %9, %cst_8 {dimension_numbers = #tpu.dot_dimension_numbers<[1], [1], [0], [0], [0, 0, 1, 0], [], []>} : vector<16x4096xbf16>, vector<16x4096xbf16>, vector<16x16xf32> -> vector<16x16xf32>
    %11 = arith.truncf %10 : vector<16x16xf32> to vector<16x16xbf16>
    %c0_9 = arith.constant 0 : index
    %c0_10 = arith.constant 0 : index
    %12 = vector.load %arg5[%c0_9, %c0_10] : memref<16x32xbf16, #tpu.memory_space<vmem>>, vector<16x32xbf16>
    %cst_11 = arith.constant dense<0.000000e+00> : vector<16x32xf32>
    %13 = tpu.matmul %11, %12, %cst_11 {dimension_numbers = #tpu.dot_dimension_numbers<[1], [0], [0], [1], [0, 0, 1, 1], [], []>} : vector<16x16xbf16>, vector<16x32xbf16>, vector<16x32xf32> -> vector<16x32xf32>
    %c0_12 = arith.constant 0 : index
    %c0_13 = arith.constant 0 : index
    %14 = vector.load %arg6[%c0_12, %c0_13] : memref<1x32xf32, #tpu.memory_space<vmem>>, vector<1x32xf32>
    %15 = vector.broadcast %14 : vector<1x32xf32> to vector<16x32xf32>
    %16 = arith.addf %13, %15 : vector<16x32xf32>
    %c0_14 = arith.constant 0 : index
    %c0_15 = arith.constant 0 : index
    %17 = vector.load %arg7[%c0_14, %c0_15] : memref<1x32xf32, #tpu.memory_space<vmem>>, vector<1x32xf32>
    %c0_16 = arith.constant 0 : index
    %c0_17 = arith.constant 0 : index
    %18 = vector.load %arg8[%c0_16, %c0_17] : memref<1x32xf32, #tpu.memory_space<vmem>>, vector<1x32xf32>
    %cst_18 = arith.constant dense<0.000000e+00> : vector<16xf32>
    %19 = vector.multi_reduction <add>, %16, %cst_18 [1] : vector<16x32xf32> to vector<16xf32>
    %20 = vector.shape_cast %19 : vector<16xf32> to vector<16x1xf32>
    %cst_19 = arith.constant 3.200000e+01 : f32
    %21 = vector.broadcast %cst_19 : f32 to vector<16x1xf32>
    %22 = arith.divf %20, %21 : vector<16x1xf32>
    %23 = vector.broadcast %22 : vector<16x1xf32> to vector<16x32xf32>
    %24 = arith.subf %16, %23 : vector<16x32xf32>
    %25 = arith.mulf %24, %24 : vector<16x32xf32>
    %cst_20 = arith.constant dense<0.000000e+00> : vector<16xf32>
    %26 = vector.multi_reduction <add>, %25, %cst_20 [1] : vector<16x32xf32> to vector<16xf32>
    %27 = vector.shape_cast %26 : vector<16xf32> to vector<16x1xf32>
    %cst_21 = arith.constant 3.200000e+01 : f32
    %28 = vector.broadcast %cst_21 : f32 to vector<16x1xf32>
    %29 = arith.divf %27, %28 : vector<16x1xf32>
    %30 = vector.broadcast %22 : vector<16x1xf32> to vector<16x32xf32>
    %31 = arith.subf %16, %30 : vector<16x32xf32>
    %cst_22 = arith.constant 9.99999974E-6 : f32
    %32 = vector.broadcast %cst_22 : f32 to vector<16x1xf32>
    %33 = arith.addf %29, %32 : vector<16x1xf32>
    %34 = math.rsqrt %33 : vector<16x1xf32>
    %35 = vector.broadcast %34 : vector<16x1xf32> to vector<16x32xf32>
    %36 = arith.mulf %31, %35 : vector<16x32xf32>
    %37 = vector.broadcast %17 : vector<1x32xf32> to vector<16x32xf32>
    %38 = arith.mulf %36, %37 : vector<16x32xf32>
    %39 = vector.broadcast %18 : vector<1x32xf32> to vector<16x32xf32>
    %40 = arith.addf %38, %39 : vector<16x32xf32>
    %c0_23 = arith.constant 0 : index
    %c0_24 = arith.constant 0 : index
    %41 = vector.load %arg9[%c0_23, %c0_24] : memref<32x96xbf16, #tpu.memory_space<vmem>>, vector<32x96xbf16>
    %c0_25 = arith.constant 0 : index
    %c0_26 = arith.constant 0 : index
    %42 = vector.load %arg10[%c0_25, %c0_26] : memref<1x96xf32, #tpu.memory_space<vmem>>, vector<1x96xf32>
    %c0_27 = arith.constant 0 : index
    %c0_28 = arith.constant 0 : index
    %43 = vector.load %arg11[%c0_27, %c0_28] : memref<32x32xbf16, #tpu.memory_space<vmem>>, vector<32x32xbf16>
    %c0_29 = arith.constant 0 : index
    %c0_30 = arith.constant 0 : index
    %44 = vector.load %arg12[%c0_29, %c0_30] : memref<1x32xf32, #tpu.memory_space<vmem>>, vector<1x32xf32>
    %c0_31 = arith.constant 0 : index
    %c0_32 = arith.constant 0 : index
    %45 = vector.load %arg13[%c0_31, %c0_32] : memref<1x32xf32, #tpu.memory_space<vmem>>, vector<1x32xf32>
    %c0_33 = arith.constant 0 : index
    %c0_34 = arith.constant 0 : index
    %46 = vector.load %arg14[%c0_33, %c0_34] : memref<1x32xf32, #tpu.memory_space<vmem>>, vector<1x32xf32>
    %47 = arith.truncf %40 : vector<16x32xf32> to vector<16x32xbf16>
    %cst_35 = arith.constant dense<0.000000e+00> : vector<16x96xf32>
    %48 = tpu.matmul %47, %41, %cst_35 {dimension_numbers = #tpu.dot_dimension_numbers<[1], [0], [0], [1], [0, 0, 1, 1], [], []>} : vector<16x32xbf16>, vector<32x96xbf16>, vector<16x96xf32> -> vector<16x96xf32>
    %49 = vector.broadcast %42 : vector<1x96xf32> to vector<16x96xf32>
    %50 = arith.addf %48, %49 : vector<16x96xf32>
    %51 = vector.extract_strided_slice %50 {offsets = [0, 0], sizes = [8, 8], strides = [1, 1]} : vector<16x96xf32> to vector<8x8xf32>
    %52 = vector.extract_strided_slice %50 {offsets = [0, 8], sizes = [8, 8], strides = [1, 1]} : vector<16x96xf32> to vector<8x8xf32>
    %53 = vector.extract_strided_slice %50 {offsets = [0, 16], sizes = [8, 8], strides = [1, 1]} : vector<16x96xf32> to vector<8x8xf32>
    %54 = vector.extract_strided_slice %50 {offsets = [0, 24], sizes = [8, 8], strides = [1, 1]} : vector<16x96xf32> to vector<8x8xf32>
    %55 = vector.extract_strided_slice %50 {offsets = [8, 0], sizes = [8, 8], strides = [1, 1]} : vector<16x96xf32> to vector<8x8xf32>
    %56 = vector.extract_strided_slice %50 {offsets = [8, 8], sizes = [8, 8], strides = [1, 1]} : vector<16x96xf32> to vector<8x8xf32>
    %57 = vector.extract_strided_slice %50 {offsets = [8, 16], sizes = [8, 8], strides = [1, 1]} : vector<16x96xf32> to vector<8x8xf32>
    %58 = vector.extract_strided_slice %50 {offsets = [8, 24], sizes = [8, 8], strides = [1, 1]} : vector<16x96xf32> to vector<8x8xf32>
    %59 = vector.shape_cast %51 : vector<8x8xf32> to vector<1x8x8xf32>
    %60 = vector.shape_cast %52 : vector<8x8xf32> to vector<1x8x8xf32>
    %61 = vector.shape_cast %53 : vector<8x8xf32> to vector<1x8x8xf32>
    %62 = vector.shape_cast %54 : vector<8x8xf32> to vector<1x8x8xf32>
    %63 = vector.shape_cast %55 : vector<8x8xf32> to vector<1x8x8xf32>
    %64 = vector.shape_cast %56 : vector<8x8xf32> to vector<1x8x8xf32>
    %65 = vector.shape_cast %57 : vector<8x8xf32> to vector<1x8x8xf32>
    %66 = vector.shape_cast %58 : vector<8x8xf32> to vector<1x8x8xf32>
    %67 = tpu.concatenate %59, %60, %61, %62, %63, %64, %65, %66 in 0 : vector<1x8x8xf32>, vector<1x8x8xf32>, vector<1x8x8xf32>, vector<1x8x8xf32>, vector<1x8x8xf32>, vector<1x8x8xf32>, vector<1x8x8xf32>, vector<1x8x8xf32> -> vector<8x8x8xf32>
    %68 = vector.extract_strided_slice %50 {offsets = [0, 32], sizes = [8, 8], strides = [1, 1]} : vector<16x96xf32> to vector<8x8xf32>
    %69 = vector.extract_strided_slice %50 {offsets = [0, 40], sizes = [8, 8], strides = [1, 1]} : vector<16x96xf32> to vector<8x8xf32>
    %70 = vector.extract_strided_slice %50 {offsets = [0, 48], sizes = [8, 8], strides = [1, 1]} : vector<16x96xf32> to vector<8x8xf32>
    %71 = vector.extract_strided_slice %50 {offsets = [0, 56], sizes = [8, 8], strides = [1, 1]} : vector<16x96xf32> to vector<8x8xf32>
    %72 = vector.extract_strided_slice %50 {offsets = [8, 32], sizes = [8, 8], strides = [1, 1]} : vector<16x96xf32> to vector<8x8xf32>
    %73 = vector.extract_strided_slice %50 {offsets = [8, 40], sizes = [8, 8], strides = [1, 1]} : vector<16x96xf32> to vector<8x8xf32>
    %74 = vector.extract_strided_slice %50 {offsets = [8, 48], sizes = [8, 8], strides = [1, 1]} : vector<16x96xf32> to vector<8x8xf32>
    %75 = vector.extract_strided_slice %50 {offsets = [8, 56], sizes = [8, 8], strides = [1, 1]} : vector<16x96xf32> to vector<8x8xf32>
    %76 = vector.shape_cast %68 : vector<8x8xf32> to vector<1x8x8xf32>
    %77 = vector.shape_cast %69 : vector<8x8xf32> to vector<1x8x8xf32>
    %78 = vector.shape_cast %70 : vector<8x8xf32> to vector<1x8x8xf32>
    %79 = vector.shape_cast %71 : vector<8x8xf32> to vector<1x8x8xf32>
    %80 = vector.shape_cast %72 : vector<8x8xf32> to vector<1x8x8xf32>
    %81 = vector.shape_cast %73 : vector<8x8xf32> to vector<1x8x8xf32>
    %82 = vector.shape_cast %74 : vector<8x8xf32> to vector<1x8x8xf32>
    %83 = vector.shape_cast %75 : vector<8x8xf32> to vector<1x8x8xf32>
    %84 = tpu.concatenate %76, %77, %78, %79, %80, %81, %82, %83 in 0 : vector<1x8x8xf32>, vector<1x8x8xf32>, vector<1x8x8xf32>, vector<1x8x8xf32>, vector<1x8x8xf32>, vector<1x8x8xf32>, vector<1x8x8xf32>, vector<1x8x8xf32> -> vector<8x8x8xf32>
    %85 = vector.extract_strided_slice %50 {offsets = [0, 64], sizes = [8, 8], strides = [1, 1]} : vector<16x96xf32> to vector<8x8xf32>
    %86 = vector.extract_strided_slice %50 {offsets = [0, 72], sizes = [8, 8], strides = [1, 1]} : vector<16x96xf32> to vector<8x8xf32>
    %87 = vector.extract_strided_slice %50 {offsets = [0, 80], sizes = [8, 8], strides = [1, 1]} : vector<16x96xf32> to vector<8x8xf32>
    %88 = vector.extract_strided_slice %50 {offsets = [0, 88], sizes = [8, 8], strides = [1, 1]} : vector<16x96xf32> to vector<8x8xf32>
    %89 = vector.extract_strided_slice %50 {offsets = [8, 64], sizes = [8, 8], strides = [1, 1]} : vector<16x96xf32> to vector<8x8xf32>
    %90 = vector.extract_strided_slice %50 {offsets = [8, 72], sizes = [8, 8], strides = [1, 1]} : vector<16x96xf32> to vector<8x8xf32>
    %91 = vector.extract_strided_slice %50 {offsets = [8, 80], sizes = [8, 8], strides = [1, 1]} : vector<16x96xf32> to vector<8x8xf32>
    %92 = vector.extract_strided_slice %50 {offsets = [8, 88], sizes = [8, 8], strides = [1, 1]} : vector<16x96xf32> to vector<8x8xf32>
    %93 = vector.shape_cast %85 : vector<8x8xf32> to vector<1x8x8xf32>
    %94 = vector.shape_cast %86 : vector<8x8xf32> to vector<1x8x8xf32>
    %95 = vector.shape_cast %87 : vector<8x8xf32> to vector<1x8x8xf32>
    %96 = vector.shape_cast %88 : vector<8x8xf32> to vector<1x8x8xf32>
    %97 = vector.shape_cast %89 : vector<8x8xf32> to vector<1x8x8xf32>
    %98 = vector.shape_cast %90 : vector<8x8xf32> to vector<1x8x8xf32>
    %99 = vector.shape_cast %91 : vector<8x8xf32> to vector<1x8x8xf32>
    %100 = vector.shape_cast %92 : vector<8x8xf32> to vector<1x8x8xf32>
    %101 = tpu.concatenate %93, %94, %95, %96, %97, %98, %99, %100 in 0 : vector<1x8x8xf32>, vector<1x8x8xf32>, vector<1x8x8xf32>, vector<1x8x8xf32>, vector<1x8x8xf32>, vector<1x8x8xf32>, vector<1x8x8xf32>, vector<1x8x8xf32> -> vector<8x8x8xf32>
    "tpu.trace_start"() <{level = 10 : i32, message = "bld,bmd->blm"}> : () -> ()
    %cst_36 = arith.constant dense<0.000000e+00> : vector<8x8x8xf32>
    %102 = tpu.matmul %67, %84, %cst_36 {dimension_numbers = #tpu.dot_dimension_numbers<[2], [2], [1], [1], [0, 0, 0, 1, 1, 1], [0], [0]>} : vector<8x8x8xf32>, vector<8x8x8xf32>, vector<8x8x8xf32> -> vector<8x8x8xf32>
    "tpu.trace_stop"() : () -> ()
    %cst_37 = arith.constant 0.353553385 : f32
    %103 = vector.broadcast %cst_37 : f32 to vector<8x8x8xf32>
    %104 = arith.mulf %102, %103 : vector<8x8x8xf32>
    %cst_38 = arith.constant dense<0xFF800000> : vector<8x8xf32>
    %105 = vector.multi_reduction <maximumf>, %104, %cst_38 [2] : vector<8x8x8xf32> to vector<8x8xf32>
    %106 = vector.shape_cast %105 : vector<8x8xf32> to vector<8x8x1xf32>
    %107 = vector.broadcast %106 : vector<8x8x1xf32> to vector<8x8x8xf32>
    %108 = arith.subf %104, %107 : vector<8x8x8xf32>
    %109 = math.exp %108 : vector<8x8x8xf32>
    %cst_39 = arith.constant dense<0.000000e+00> : vector<8x8xf32>
    %110 = vector.multi_reduction <add>, %109, %cst_39 [2] : vector<8x8x8xf32> to vector<8x8xf32>
    %111 = vector.shape_cast %110 : vector<8x8xf32> to vector<8x8x1xf32>
    %112 = tpu.reciprocal %111 {approx = true} : vector<8x8x1xf32> -> vector<8x8x1xf32>
    %113 = vector.broadcast %112 : vector<8x8x1xf32> to vector<8x8x8xf32>
    %114 = arith.mulf %109, %113 : vector<8x8x8xf32>
    "tpu.trace_start"() <{level = 10 : i32, message = "blm,bmd->bld"}> : () -> ()
    %cst_40 = arith.constant dense<0.000000e+00> : vector<8x8x8xf32>
    %115 = tpu.matmul %114, %101, %cst_40 {dimension_numbers = #tpu.dot_dimension_numbers<[2], [1], [1], [2], [0, 0, 0, 1, 1, 2], [0], [0]>} : vector<8x8x8xf32>, vector<8x8x8xf32>, vector<8x8x8xf32> -> vector<8x8x8xf32>
    "tpu.trace_stop"() : () -> ()
    %116 = vector.extract_strided_slice %115 {offsets = [0, 0, 0], sizes = [1, 8, 8], strides = [1, 1, 1]} : vector<8x8x8xf32> to vector<1x8x8xf32>
    %117 = vector.shape_cast %116 : vector<1x8x8xf32> to vector<8x8xf32>
    %118 = vector.extract_strided_slice %115 {offsets = [1, 0, 0], sizes = [1, 8, 8], strides = [1, 1, 1]} : vector<8x8x8xf32> to vector<1x8x8xf32>
    %119 = vector.shape_cast %118 : vector<1x8x8xf32> to vector<8x8xf32>
    %120 = vector.extract_strided_slice %115 {offsets = [2, 0, 0], sizes = [1, 8, 8], strides = [1, 1, 1]} : vector<8x8x8xf32> to vector<1x8x8xf32>
    %121 = vector.shape_cast %120 : vector<1x8x8xf32> to vector<8x8xf32>
    %122 = vector.extract_strided_slice %115 {offsets = [3, 0, 0], sizes = [1, 8, 8], strides = [1, 1, 1]} : vector<8x8x8xf32> to vector<1x8x8xf32>
    %123 = vector.shape_cast %122 : vector<1x8x8xf32> to vector<8x8xf32>
    %124 = tpu.concatenate %117, %119, %121, %123 in 1 : vector<8x8xf32>, vector<8x8xf32>, vector<8x8xf32>, vector<8x8xf32> -> vector<8x32xf32>
    %125 = vector.extract_strided_slice %115 {offsets = [4, 0, 0], sizes = [1, 8, 8], strides = [1, 1, 1]} : vector<8x8x8xf32> to vector<1x8x8xf32>
    %126 = vector.shape_cast %125 : vector<1x8x8xf32> to vector<8x8xf32>
    %127 = vector.extract_strided_slice %115 {offsets = [5, 0, 0], sizes = [1, 8, 8], strides = [1, 1, 1]} : vector<8x8x8xf32> to vector<1x8x8xf32>
    %128 = vector.shape_cast %127 : vector<1x8x8xf32> to vector<8x8xf32>
    %129 = vector.extract_strided_slice %115 {offsets = [6, 0, 0], sizes = [1, 8, 8], strides = [1, 1, 1]} : vector<8x8x8xf32> to vector<1x8x8xf32>
    %130 = vector.shape_cast %129 : vector<1x8x8xf32> to vector<8x8xf32>
    %131 = vector.extract_strided_slice %115 {offsets = [7, 0, 0], sizes = [1, 8, 8], strides = [1, 1, 1]} : vector<8x8x8xf32> to vector<1x8x8xf32>
    %132 = vector.shape_cast %131 : vector<1x8x8xf32> to vector<8x8xf32>
    %133 = tpu.concatenate %126, %128, %130, %132 in 1 : vector<8x8xf32>, vector<8x8xf32>, vector<8x8xf32>, vector<8x8xf32> -> vector<8x32xf32>
    %134 = tpu.concatenate %124, %133 in 0 : vector<8x32xf32>, vector<8x32xf32> -> vector<16x32xf32>
    %135 = arith.truncf %134 : vector<16x32xf32> to vector<16x32xbf16>
    %cst_41 = arith.constant dense<0.000000e+00> : vector<16x32xf32>
    %136 = tpu.matmul %135, %43, %cst_41 {dimension_numbers = #tpu.dot_dimension_numbers<[1], [0], [0], [1], [0, 0, 1, 1], [], []>} : vector<16x32xbf16>, vector<32x32xbf16>, vector<16x32xf32> -> vector<16x32xf32>
    %137 = vector.broadcast %44 : vector<1x32xf32> to vector<16x32xf32>
    %138 = arith.addf %136, %137 : vector<16x32xf32>
    %cst_42 = arith.constant dense<0.000000e+00> : vector<16xf32>
    %139 = vector.multi_reduction <add>, %138, %cst_42 [1] : vector<16x32xf32> to vector<16xf32>
    %140 = vector.shape_cast %139 : vector<16xf32> to vector<16x1xf32>
    %cst_43 = arith.constant 3.200000e+01 : f32
    %141 = vector.broadcast %cst_43 : f32 to vector<16x1xf32>
    %142 = arith.divf %140, %141 : vector<16x1xf32>
    %143 = vector.broadcast %142 : vector<16x1xf32> to vector<16x32xf32>
    %144 = arith.subf %138, %143 : vector<16x32xf32>
    %145 = arith.mulf %144, %144 : vector<16x32xf32>
    %cst_44 = arith.constant dense<0.000000e+00> : vector<16xf32>
    %146 = vector.multi_reduction <add>, %145, %cst_44 [1] : vector<16x32xf32> to vector<16xf32>
    %147 = vector.shape_cast %146 : vector<16xf32> to vector<16x1xf32>
    %cst_45 = arith.constant 3.200000e+01 : f32
    %148 = vector.broadcast %cst_45 : f32 to vector<16x1xf32>
    %149 = arith.divf %147, %148 : vector<16x1xf32>
    %150 = vector.broadcast %142 : vector<16x1xf32> to vector<16x32xf32>
    %151 = arith.subf %138, %150 : vector<16x32xf32>
    %cst_46 = arith.constant 9.99999974E-6 : f32
    %152 = vector.broadcast %cst_46 : f32 to vector<16x1xf32>
    %153 = arith.addf %149, %152 : vector<16x1xf32>
    %154 = math.rsqrt %153 : vector<16x1xf32>
    %155 = vector.broadcast %154 : vector<16x1xf32> to vector<16x32xf32>
    %156 = arith.mulf %151, %155 : vector<16x32xf32>
    %157 = vector.broadcast %45 : vector<1x32xf32> to vector<16x32xf32>
    %158 = arith.mulf %156, %157 : vector<16x32xf32>
    %159 = vector.broadcast %46 : vector<1x32xf32> to vector<16x32xf32>
    %160 = arith.addf %158, %159 : vector<16x32xf32>
    %c0_47 = arith.constant 0 : index
    %c0_48 = arith.constant 0 : index
    %161 = vector.load %arg15[%c0_47, %c0_48] : memref<32x96xbf16, #tpu.memory_space<vmem>>, vector<32x96xbf16>
    %c0_49 = arith.constant 0 : index
    %c0_50 = arith.constant 0 : index
    %162 = vector.load %arg16[%c0_49, %c0_50] : memref<1x96xf32, #tpu.memory_space<vmem>>, vector<1x96xf32>
    %c0_51 = arith.constant 0 : index
    %c0_52 = arith.constant 0 : index
    %163 = vector.load %arg17[%c0_51, %c0_52] : memref<32x32xbf16, #tpu.memory_space<vmem>>, vector<32x32xbf16>
    %c0_53 = arith.constant 0 : index
    %c0_54 = arith.constant 0 : index
    %164 = vector.load %arg18[%c0_53, %c0_54] : memref<1x32xf32, #tpu.memory_space<vmem>>, vector<1x32xf32>
    %c0_55 = arith.constant 0 : index
    %c0_56 = arith.constant 0 : index
    %165 = vector.load %arg19[%c0_55, %c0_56] : memref<1x32xf32, #tpu.memory_space<vmem>>, vector<1x32xf32>
    %c0_57 = arith.constant 0 : index
    %c0_58 = arith.constant 0 : index
    %166 = vector.load %arg20[%c0_57, %c0_58] : memref<1x32xf32, #tpu.memory_space<vmem>>, vector<1x32xf32>
    %167 = arith.truncf %160 : vector<16x32xf32> to vector<16x32xbf16>
    %cst_59 = arith.constant dense<0.000000e+00> : vector<16x96xf32>
    %168 = tpu.matmul %167, %161, %cst_59 {dimension_numbers = #tpu.dot_dimension_numbers<[1], [0], [0], [1], [0, 0, 1, 1], [], []>} : vector<16x32xbf16>, vector<32x96xbf16>, vector<16x96xf32> -> vector<16x96xf32>
    %169 = vector.broadcast %162 : vector<1x96xf32> to vector<16x96xf32>
    %170 = arith.addf %168, %169 : vector<16x96xf32>
    %171 = vector.extract_strided_slice %170 {offsets = [0, 0], sizes = [8, 8], strides = [1, 1]} : vector<16x96xf32> to vector<8x8xf32>
    %172 = vector.extract_strided_slice %170 {offsets = [0, 8], sizes = [8, 8], strides = [1, 1]} : vector<16x96xf32> to vector<8x8xf32>
    %173 = vector.extract_strided_slice %170 {offsets = [0, 16], sizes = [8, 8], strides = [1, 1]} : vector<16x96xf32> to vector<8x8xf32>
    %174 = vector.extract_strided_slice %170 {offsets = [0, 24], sizes = [8, 8], strides = [1, 1]} : vector<16x96xf32> to vector<8x8xf32>
    %175 = vector.extract_strided_slice %170 {offsets = [8, 0], sizes = [8, 8], strides = [1, 1]} : vector<16x96xf32> to vector<8x8xf32>
    %176 = vector.extract_strided_slice %170 {offsets = [8, 8], sizes = [8, 8], strides = [1, 1]} : vector<16x96xf32> to vector<8x8xf32>
    %177 = vector.extract_strided_slice %170 {offsets = [8, 16], sizes = [8, 8], strides = [1, 1]} : vector<16x96xf32> to vector<8x8xf32>
    %178 = vector.extract_strided_slice %170 {offsets = [8, 24], sizes = [8, 8], strides = [1, 1]} : vector<16x96xf32> to vector<8x8xf32>
    %179 = vector.shape_cast %171 : vector<8x8xf32> to vector<1x8x8xf32>
    %180 = vector.shape_cast %172 : vector<8x8xf32> to vector<1x8x8xf32>
    %181 = vector.shape_cast %173 : vector<8x8xf32> to vector<1x8x8xf32>
    %182 = vector.shape_cast %174 : vector<8x8xf32> to vector<1x8x8xf32>
    %183 = vector.shape_cast %175 : vector<8x8xf32> to vector<1x8x8xf32>
    %184 = vector.shape_cast %176 : vector<8x8xf32> to vector<1x8x8xf32>
    %185 = vector.shape_cast %177 : vector<8x8xf32> to vector<1x8x8xf32>
    %186 = vector.shape_cast %178 : vector<8x8xf32> to vector<1x8x8xf32>
    %187 = tpu.concatenate %179, %180, %181, %182, %183, %184, %185, %186 in 0 : vector<1x8x8xf32>, vector<1x8x8xf32>, vector<1x8x8xf32>, vector<1x8x8xf32>, vector<1x8x8xf32>, vector<1x8x8xf32>, vector<1x8x8xf32>, vector<1x8x8xf32> -> vector<8x8x8xf32>
    %188 = vector.extract_strided_slice %170 {offsets = [0, 32], sizes = [8, 8], strides = [1, 1]} : vector<16x96xf32> to vector<8x8xf32>
    %189 = vector.extract_strided_slice %170 {offsets = [0, 40], sizes = [8, 8], strides = [1, 1]} : vector<16x96xf32> to vector<8x8xf32>
    %190 = vector.extract_strided_slice %170 {offsets = [0, 48], sizes = [8, 8], strides = [1, 1]} : vector<16x96xf32> to vector<8x8xf32>
    %191 = vector.extract_strided_slice %170 {offsets = [0, 56], sizes = [8, 8], strides = [1, 1]} : vector<16x96xf32> to vector<8x8xf32>
    %192 = vector.extract_strided_slice %170 {offsets = [8, 32], sizes = [8, 8], strides = [1, 1]} : vector<16x96xf32> to vector<8x8xf32>
    %193 = vector.extract_strided_slice %170 {offsets = [8, 40], sizes = [8, 8], strides = [1, 1]} : vector<16x96xf32> to vector<8x8xf32>
    %194 = vector.extract_strided_slice %170 {offsets = [8, 48], sizes = [8, 8], strides = [1, 1]} : vector<16x96xf32> to vector<8x8xf32>
    %195 = vector.extract_strided_slice %170 {offsets = [8, 56], sizes = [8, 8], strides = [1, 1]} : vector<16x96xf32> to vector<8x8xf32>
    %196 = vector.shape_cast %188 : vector<8x8xf32> to vector<1x8x8xf32>
    %197 = vector.shape_cast %189 : vector<8x8xf32> to vector<1x8x8xf32>
    %198 = vector.shape_cast %190 : vector<8x8xf32> to vector<1x8x8xf32>
    %199 = vector.shape_cast %191 : vector<8x8xf32> to vector<1x8x8xf32>
    %200 = vector.shape_cast %192 : vector<8x8xf32> to vector<1x8x8xf32>
    %201 = vector.shape_cast %193 : vector<8x8xf32> to vector<1x8x8xf32>
    %202 = vector.shape_cast %194 : vector<8x8xf32> to vector<1x8x8xf32>
    %203 = vector.shape_cast %195 : vector<8x8xf32> to vector<1x8x8xf32>
    %204 = tpu.concatenate %196, %197, %198, %199, %200, %201, %202, %203 in 0 : vector<1x8x8xf32>, vector<1x8x8xf32>, vector<1x8x8xf32>, vector<1x8x8xf32>, vector<1x8x8xf32>, vector<1x8x8xf32>, vector<1x8x8xf32>, vector<1x8x8xf32> -> vector<8x8x8xf32>
    %205 = vector.extract_strided_slice %170 {offsets = [0, 64], sizes = [8, 8], strides = [1, 1]} : vector<16x96xf32> to vector<8x8xf32>
    %206 = vector.extract_strided_slice %170 {offsets = [0, 72], sizes = [8, 8], strides = [1, 1]} : vector<16x96xf32> to vector<8x8xf32>
    %207 = vector.extract_strided_slice %170 {offsets = [0, 80], sizes = [8, 8], strides = [1, 1]} : vector<16x96xf32> to vector<8x8xf32>
    %208 = vector.extract_strided_slice %170 {offsets = [0, 88], sizes = [8, 8], strides = [1, 1]} : vector<16x96xf32> to vector<8x8xf32>
    %209 = vector.extract_strided_slice %170 {offsets = [8, 64], sizes = [8, 8], strides = [1, 1]} : vector<16x96xf32> to vector<8x8xf32>
    %210 = vector.extract_strided_slice %170 {offsets = [8, 72], sizes = [8, 8], strides = [1, 1]} : vector<16x96xf32> to vector<8x8xf32>
    %211 = vector.extract_strided_slice %170 {offsets = [8, 80], sizes = [8, 8], strides = [1, 1]} : vector<16x96xf32> to vector<8x8xf32>
    %212 = vector.extract_strided_slice %170 {offsets = [8, 88], sizes = [8, 8], strides = [1, 1]} : vector<16x96xf32> to vector<8x8xf32>
    %213 = vector.shape_cast %205 : vector<8x8xf32> to vector<1x8x8xf32>
    %214 = vector.shape_cast %206 : vector<8x8xf32> to vector<1x8x8xf32>
    %215 = vector.shape_cast %207 : vector<8x8xf32> to vector<1x8x8xf32>
    %216 = vector.shape_cast %208 : vector<8x8xf32> to vector<1x8x8xf32>
    %217 = vector.shape_cast %209 : vector<8x8xf32> to vector<1x8x8xf32>
    %218 = vector.shape_cast %210 : vector<8x8xf32> to vector<1x8x8xf32>
    %219 = vector.shape_cast %211 : vector<8x8xf32> to vector<1x8x8xf32>
    %220 = vector.shape_cast %212 : vector<8x8xf32> to vector<1x8x8xf32>
    %221 = tpu.concatenate %213, %214, %215, %216, %217, %218, %219, %220 in 0 : vector<1x8x8xf32>, vector<1x8x8xf32>, vector<1x8x8xf32>, vector<1x8x8xf32>, vector<1x8x8xf32>, vector<1x8x8xf32>, vector<1x8x8xf32>, vector<1x8x8xf32> -> vector<8x8x8xf32>
    "tpu.trace_start"() <{level = 10 : i32, message = "bld,bmd->blm"}> : () -> ()
    %cst_60 = arith.constant dense<0.000000e+00> : vector<8x8x8xf32>
    %222 = tpu.matmul %187, %204, %cst_60 {dimension_numbers = #tpu.dot_dimension_numbers<[2], [2], [1], [1], [0, 0, 0, 1, 1, 1], [0], [0]>} : vector<8x8x8xf32>, vector<8x8x8xf32>, vector<8x8x8xf32> -> vector<8x8x8xf32>
    "tpu.trace_stop"() : () -> ()
    %cst_61 = arith.constant 0.353553385 : f32
    %223 = vector.broadcast %cst_61 : f32 to vector<8x8x8xf32>
    %224 = arith.mulf %222, %223 : vector<8x8x8xf32>
    %cst_62 = arith.constant dense<0xFF800000> : vector<8x8xf32>
    %225 = vector.multi_reduction <maximumf>, %224, %cst_62 [2] : vector<8x8x8xf32> to vector<8x8xf32>
    %226 = vector.shape_cast %225 : vector<8x8xf32> to vector<8x8x1xf32>
    %227 = vector.broadcast %226 : vector<8x8x1xf32> to vector<8x8x8xf32>
    %228 = arith.subf %224, %227 : vector<8x8x8xf32>
    %229 = math.exp %228 : vector<8x8x8xf32>
    %cst_63 = arith.constant dense<0.000000e+00> : vector<8x8xf32>
    %230 = vector.multi_reduction <add>, %229, %cst_63 [2] : vector<8x8x8xf32> to vector<8x8xf32>
    %231 = vector.shape_cast %230 : vector<8x8xf32> to vector<8x8x1xf32>
    %232 = tpu.reciprocal %231 {approx = true} : vector<8x8x1xf32> -> vector<8x8x1xf32>
    %233 = vector.broadcast %232 : vector<8x8x1xf32> to vector<8x8x8xf32>
    %234 = arith.mulf %229, %233 : vector<8x8x8xf32>
    "tpu.trace_start"() <{level = 10 : i32, message = "blm,bmd->bld"}> : () -> ()
    %cst_64 = arith.constant dense<0.000000e+00> : vector<8x8x8xf32>
    %235 = tpu.matmul %234, %221, %cst_64 {dimension_numbers = #tpu.dot_dimension_numbers<[2], [1], [1], [2], [0, 0, 0, 1, 1, 2], [0], [0]>} : vector<8x8x8xf32>, vector<8x8x8xf32>, vector<8x8x8xf32> -> vector<8x8x8xf32>
    "tpu.trace_stop"() : () -> ()
    %236 = vector.extract_strided_slice %235 {offsets = [0, 0, 0], sizes = [1, 8, 8], strides = [1, 1, 1]} : vector<8x8x8xf32> to vector<1x8x8xf32>
    %237 = vector.shape_cast %236 : vector<1x8x8xf32> to vector<8x8xf32>
    %238 = vector.extract_strided_slice %235 {offsets = [1, 0, 0], sizes = [1, 8, 8], strides = [1, 1, 1]} : vector<8x8x8xf32> to vector<1x8x8xf32>
    %239 = vector.shape_cast %238 : vector<1x8x8xf32> to vector<8x8xf32>
    %240 = vector.extract_strided_slice %235 {offsets = [2, 0, 0], sizes = [1, 8, 8], strides = [1, 1, 1]} : vector<8x8x8xf32> to vector<1x8x8xf32>
    %241 = vector.shape_cast %240 : vector<1x8x8xf32> to vector<8x8xf32>
    %242 = vector.extract_strided_slice %235 {offsets = [3, 0, 0], sizes = [1, 8, 8], strides = [1, 1, 1]} : vector<8x8x8xf32> to vector<1x8x8xf32>
    %243 = vector.shape_cast %242 : vector<1x8x8xf32> to vector<8x8xf32>
    %244 = tpu.concatenate %237, %239, %241, %243 in 1 : vector<8x8xf32>, vector<8x8xf32>, vector<8x8xf32>, vector<8x8xf32> -> vector<8x32xf32>
    %245 = vector.extract_strided_slice %235 {offsets = [4, 0, 0], sizes = [1, 8, 8], strides = [1, 1, 1]} : vector<8x8x8xf32> to vector<1x8x8xf32>
    %246 = vector.shape_cast %245 : vector<1x8x8xf32> to vector<8x8xf32>
    %247 = vector.extract_strided_slice %235 {offsets = [5, 0, 0], sizes = [1, 8, 8], strides = [1, 1, 1]} : vector<8x8x8xf32> to vector<1x8x8xf32>
    %248 = vector.shape_cast %247 : vector<1x8x8xf32> to vector<8x8xf32>
    %249 = vector.extract_strided_slice %235 {offsets = [6, 0, 0], sizes = [1, 8, 8], strides = [1, 1, 1]} : vector<8x8x8xf32> to vector<1x8x8xf32>
    %250 = vector.shape_cast %249 : vector<1x8x8xf32> to vector<8x8xf32>
    %251 = vector.extract_strided_slice %235 {offsets = [7, 0, 0], sizes = [1, 8, 8], strides = [1, 1, 1]} : vector<8x8x8xf32> to vector<1x8x8xf32>
    %252 = vector.shape_cast %251 : vector<1x8x8xf32> to vector<8x8xf32>
    %253 = tpu.concatenate %246, %248, %250, %252 in 1 : vector<8x8xf32>, vector<8x8xf32>, vector<8x8xf32>, vector<8x8xf32> -> vector<8x32xf32>
    %254 = tpu.concatenate %244, %253 in 0 : vector<8x32xf32>, vector<8x32xf32> -> vector<16x32xf32>
    %255 = arith.truncf %254 : vector<16x32xf32> to vector<16x32xbf16>
    %cst_65 = arith.constant dense<0.000000e+00> : vector<16x32xf32>
    %256 = tpu.matmul %255, %163, %cst_65 {dimension_numbers = #tpu.dot_dimension_numbers<[1], [0], [0], [1], [0, 0, 1, 1], [], []>} : vector<16x32xbf16>, vector<32x32xbf16>, vector<16x32xf32> -> vector<16x32xf32>
    %257 = vector.broadcast %164 : vector<1x32xf32> to vector<16x32xf32>
    %258 = arith.addf %256, %257 : vector<16x32xf32>
    %cst_66 = arith.constant dense<0.000000e+00> : vector<16xf32>
    %259 = vector.multi_reduction <add>, %258, %cst_66 [1] : vector<16x32xf32> to vector<16xf32>
    %260 = vector.shape_cast %259 : vector<16xf32> to vector<16x1xf32>
    %cst_67 = arith.constant 3.200000e+01 : f32
    %261 = vector.broadcast %cst_67 : f32 to vector<16x1xf32>
    %262 = arith.divf %260, %261 : vector<16x1xf32>
    %263 = vector.broadcast %262 : vector<16x1xf32> to vector<16x32xf32>
    %264 = arith.subf %258, %263 : vector<16x32xf32>
    %265 = arith.mulf %264, %264 : vector<16x32xf32>
    %cst_68 = arith.constant dense<0.000000e+00> : vector<16xf32>
    %266 = vector.multi_reduction <add>, %265, %cst_68 [1] : vector<16x32xf32> to vector<16xf32>
    %267 = vector.shape_cast %266 : vector<16xf32> to vector<16x1xf32>
    %cst_69 = arith.constant 3.200000e+01 : f32
    %268 = vector.broadcast %cst_69 : f32 to vector<16x1xf32>
    %269 = arith.divf %267, %268 : vector<16x1xf32>
    %270 = vector.broadcast %262 : vector<16x1xf32> to vector<16x32xf32>
    %271 = arith.subf %258, %270 : vector<16x32xf32>
    %cst_70 = arith.constant 9.99999974E-6 : f32
    %272 = vector.broadcast %cst_70 : f32 to vector<16x1xf32>
    %273 = arith.addf %269, %272 : vector<16x1xf32>
    %274 = math.rsqrt %273 : vector<16x1xf32>
    %275 = vector.broadcast %274 : vector<16x1xf32> to vector<16x32xf32>
    %276 = arith.mulf %271, %275 : vector<16x32xf32>
    %277 = vector.broadcast %165 : vector<1x32xf32> to vector<16x32xf32>
    %278 = arith.mulf %276, %277 : vector<16x32xf32>
    %279 = vector.broadcast %166 : vector<1x32xf32> to vector<16x32xf32>
    %280 = arith.addf %278, %279 : vector<16x32xf32>
    %281 = vector.extract_strided_slice %280 {offsets = [0, 0], sizes = [1, 32], strides = [1, 1]} : vector<16x32xf32> to vector<1x32xf32>
    %282 = vector.extract_strided_slice %280 {offsets = [1, 0], sizes = [1, 32], strides = [1, 1]} : vector<16x32xf32> to vector<1x32xf32>
    %283 = vector.extract_strided_slice %280 {offsets = [2, 0], sizes = [1, 32], strides = [1, 1]} : vector<16x32xf32> to vector<1x32xf32>
    %284 = vector.extract_strided_slice %280 {offsets = [3, 0], sizes = [1, 32], strides = [1, 1]} : vector<16x32xf32> to vector<1x32xf32>
    %285 = vector.extract_strided_slice %280 {offsets = [4, 0], sizes = [1, 32], strides = [1, 1]} : vector<16x32xf32> to vector<1x32xf32>
    %286 = vector.extract_strided_slice %280 {offsets = [5, 0], sizes = [1, 32], strides = [1, 1]} : vector<16x32xf32> to vector<1x32xf32>
    %287 = vector.extract_strided_slice %280 {offsets = [6, 0], sizes = [1, 32], strides = [1, 1]} : vector<16x32xf32> to vector<1x32xf32>
    %288 = vector.extract_strided_slice %280 {offsets = [7, 0], sizes = [1, 32], strides = [1, 1]} : vector<16x32xf32> to vector<1x32xf32>
    %289 = tpu.concatenate %281, %282, %283, %284, %285, %286, %287, %288 in 1 : vector<1x32xf32>, vector<1x32xf32>, vector<1x32xf32>, vector<1x32xf32>, vector<1x32xf32>, vector<1x32xf32>, vector<1x32xf32>, vector<1x32xf32> -> vector<1x256xf32>
    %290 = vector.extract_strided_slice %280 {offsets = [8, 0], sizes = [1, 32], strides = [1, 1]} : vector<16x32xf32> to vector<1x32xf32>
    %291 = vector.extract_strided_slice %280 {offsets = [9, 0], sizes = [1, 32], strides = [1, 1]} : vector<16x32xf32> to vector<1x32xf32>
    %292 = vector.extract_strided_slice %280 {offsets = [10, 0], sizes = [1, 32], strides = [1, 1]} : vector<16x32xf32> to vector<1x32xf32>
    %293 = vector.extract_strided_slice %280 {offsets = [11, 0], sizes = [1, 32], strides = [1, 1]} : vector<16x32xf32> to vector<1x32xf32>
    %294 = vector.extract_strided_slice %280 {offsets = [12, 0], sizes = [1, 32], strides = [1, 1]} : vector<16x32xf32> to vector<1x32xf32>
    %295 = vector.extract_strided_slice %280 {offsets = [13, 0], sizes = [1, 32], strides = [1, 1]} : vector<16x32xf32> to vector<1x32xf32>
    %296 = vector.extract_strided_slice %280 {offsets = [14, 0], sizes = [1, 32], strides = [1, 1]} : vector<16x32xf32> to vector<1x32xf32>
    %297 = vector.extract_strided_slice %280 {offsets = [15, 0], sizes = [1, 32], strides = [1, 1]} : vector<16x32xf32> to vector<1x32xf32>
    %298 = tpu.concatenate %290, %291, %292, %293, %294, %295, %296, %297 in 1 : vector<1x32xf32>, vector<1x32xf32>, vector<1x32xf32>, vector<1x32xf32>, vector<1x32xf32>, vector<1x32xf32>, vector<1x32xf32>, vector<1x32xf32> -> vector<1x256xf32>
    %299 = tpu.concatenate %289, %298 in 0 : vector<1x256xf32>, vector<1x256xf32> -> vector<2x256xf32>
    %300 = arith.truncf %299 : vector<2x256xf32> to vector<2x256xbf16>
    %c0_71 = arith.constant 0 : index
    %c0_72 = arith.constant 0 : index
    %301 = vector.load %arg21[%c0_71, %c0_72] : memref<256x128xbf16, #tpu.memory_space<vmem>>, vector<256x128xbf16>
    %cst_73 = arith.constant dense<0.000000e+00> : vector<2x128xf32>
    %302 = tpu.matmul %300, %301, %cst_73 {dimension_numbers = #tpu.dot_dimension_numbers<[1], [0], [0], [1], [0, 0, 1, 1], [], []>} : vector<2x256xbf16>, vector<256x128xbf16>, vector<2x128xf32> -> vector<2x128xf32>
    %c0_74 = arith.constant 0 : index
    %c0_75 = arith.constant 0 : index
    %303 = vector.load %arg22[%c0_74, %c0_75] : memref<1x128xf32, #tpu.memory_space<vmem>>, vector<1x128xf32>
    %304 = vector.broadcast %303 : vector<1x128xf32> to vector<2x128xf32>
    %305 = arith.addf %302, %304 : vector<2x128xf32>
    %c0_76 = arith.constant 0 : index
    %c0_77 = arith.constant 0 : index
    %306 = vector.load %arg23[%c0_76, %c0_77] : memref<2x128xf32, #tpu.memory_space<vmem>>, vector<2x128xf32>
    tpu.vector_store %arg23[%c0_76, %c0_77], %305 {strides = array<i32>} : memref<2x128xf32, #tpu.memory_space<vmem>>, vector<2x128xf32>,
    return
  }
  func.func @transform_0(%arg0: i32) -> (i32, i32) {
    %c0_i32 = arith.constant 0 : i32
    %c0_i32_0 = arith.constant 0 : i32
    %c0_i32_1 = arith.constant 0 : i32
    return %c0_i32, %c0_i32_0 : i32, i32
  }
  func.func @transform_1(%arg0: i32) -> (i32, i32) {
    %c0_i32 = arith.constant 0 : i32
    %c0_i32_0 = arith.constant 0 : i32
    %c0_i32_1 = arith.constant 0 : i32
    return %c0_i32, %c0_i32_0 : i32, i32
  }
  func.func @transform_2(%arg0: i32) -> (i32, i32) {
    %c0_i32 = arith.constant 0 : i32
    %c0_i32_0 = arith.constant 0 : i32
    %c0_i32_1 = arith.constant 0 : i32
    return %c0_i32, %c0_i32_0 : i32, i32
  }
  func.func @transform_3(%arg0: i32) -> (i32, i32) {
    %c0_i32 = arith.constant 0 : i32
    %c0_i32_0 = arith.constant 0 : i32
    %c0_i32_1 = arith.constant 0 : i32
    return %c0_i32, %c0_i32_0 : i32, i32
  }
  func.func @transform_4(%arg0: i32) -> (i32, i32) {
    %c0_i32 = arith.constant 0 : i32
    %c0_i32_0 = arith.constant 0 : i32
    %c0_i32_1 = arith.constant 0 : i32
    return %c0_i32, %c0_i32_0 : i32, i32
  }
  func.func @transform_5(%arg0: i32) -> (i32, i32) {
    %c0_i32 = arith.constant 0 : i32
    %c0_i32_0 = arith.constant 0 : i32
    %c0_i32_1 = arith.constant 0 : i32
    return %c0_i32, %c0_i32_0 : i32, i32
  }
  func.func @transform_6(%arg0: i32) -> (i32, i32) {
    %c0_i32 = arith.constant 0 : i32
    %c0_i32_0 = arith.constant 0 : i32
    %c0_i32_1 = arith.constant 0 : i32
    return %c0_i32, %c0_i32_0 : i32, i32
  }
  func.func @transform_7(%arg0: i32) -> (i32, i32) {
    %c0_i32 = arith.constant 0 : i32
    %c0_i32_0 = arith.constant 0 : i32
    %c0_i32_1 = arith.constant 0 : i32
    return %c0_i32, %c0_i32_0 : i32, i32
  }
  func.func @transform_8(%arg0: i32) -> (i32, i32) {
    %c0_i32 = arith.constant 0 : i32
    %c0_i32_0 = arith.constant 0 : i32
    %c0_i32_1 = arith.constant 0 : i32
    return %c0_i32, %c0_i32_0 : i32, i32
  }
  func.func @transform_9(%arg0: i32) -> (i32, i32) {
    %c0_i32 = arith.constant 0 : i32
    %c0_i32_0 = arith.constant 0 : i32
    %c0_i32_1 = arith.constant 0 : i32
    return %c0_i32, %c0_i32_0 : i32, i32
  }
  func.func @transform_10(%arg0: i32) -> (i32, i32) {
    %c0_i32 = arith.constant 0 : i32
    %c0_i32_0 = arith.constant 0 : i32
    %c0_i32_1 = arith.constant 0 : i32
    return %c0_i32, %c0_i32_0 : i32, i32
  }
  func.func @transform_11(%arg0: i32) -> (i32, i32) {
    %c0_i32 = arith.constant 0 : i32
    %c0_i32_0 = arith.constant 0 : i32
    %c0_i32_1 = arith.constant 0 : i32
    return %c0_i32, %c0_i32_0 : i32, i32
  }
  func.func @transform_12(%arg0: i32) -> (i32, i32) {
    %c0_i32 = arith.constant 0 : i32
    %c0_i32_0 = arith.constant 0 : i32
    %c0_i32_1 = arith.constant 0 : i32
    return %c0_i32, %c0_i32_0 : i32, i32
  }
  func.func @transform_13(%arg0: i32) -> (i32, i32) {
    %c0_i32 = arith.constant 0 : i32
    %c0_i32_0 = arith.constant 0 : i32
    %c0_i32_1 = arith.constant 0 : i32
    return %c0_i32, %c0_i32_0 : i32, i32
  }
  func.func @transform_14(%arg0: i32) -> (i32, i32) {
    %c0_i32 = arith.constant 0 : i32
    %c0_i32_0 = arith.constant 0 : i32
    %c0_i32_1 = arith.constant 0 : i32
    return %c0_i32, %c0_i32_0 : i32, i32
  }
  func.func @transform_15(%arg0: i32) -> (i32, i32) {
    %c0_i32 = arith.constant 0 : i32
    %c0_i32_0 = arith.constant 0 : i32
    %c0_i32_1 = arith.constant 0 : i32
    return %c0_i32, %c0_i32_0 : i32, i32
  }
  func.func @transform_16(%arg0: i32) -> (i32, i32) {
    %c0_i32 = arith.constant 0 : i32
    %c0_i32_0 = arith.constant 0 : i32
    %c0_i32_1 = arith.constant 0 : i32
    return %c0_i32, %c0_i32_0 : i32, i32
  }
  func.func @transform_17(%arg0: i32) -> (i32, i32) {
    %c0_i32 = arith.constant 0 : i32
    %c0_i32_0 = arith.constant 0 : i32
    %c0_i32_1 = arith.constant 0 : i32
    return %c0_i32, %c0_i32_0 : i32, i32
  }
  func.func @transform_18(%arg0: i32) -> (i32, i32) {
    %c0_i32 = arith.constant 0 : i32
    %c0_i32_0 = arith.constant 0 : i32
    %c0_i32_1 = arith.constant 0 : i32
    return %c0_i32, %c0_i32_0 : i32, i32
  }
  func.func @transform_19(%arg0: i32) -> (i32, i32) {
    %c0_i32 = arith.constant 0 : i32
    %c0_i32_0 = arith.constant 0 : i32
    %c0_i32_1 = arith.constant 0 : i32
    return %c0_i32, %c0_i32_0 : i32, i32
  }
  func.func @transform_20(%arg0: i32) -> (i32, i32) {
    %c0_i32 = arith.constant 0 : i32
    %c0_i32_0 = arith.constant 0 : i32
    %c0_i32_1 = arith.constant 0 : i32
    return %c0_i32, %c0_i32_0 : i32, i32
  }
  func.func @transform_21(%arg0: i32) -> (i32, i32) {
    %c0_i32 = arith.constant 0 : i32
    %c0_i32_0 = arith.constant 0 : i32
    %c0_i32_1 = arith.constant 0 : i32
    return %c0_i32, %c0_i32_0 : i32, i32
  }
  func.func @transform_22(%arg0: i32) -> (i32, i32) {
    %c0_i32 = arith.constant 0 : i32
    %c0_i32_0 = arith.constant 0 : i32
    %c0_i32_1 = arith.constant 0 : i32
    return %c0_i32, %c0_i32_0 : i32, i32
  }
}

</mosaic_0001>

<bundles_post_ra>
// kernel: cnn_self_att_forward.1
= control target key start
LH: loop header
LB: loop body
LE: loop exit
PB: predicated region body
PF: predicated region fallthrough
CT: control target
= control target key end

     0   :  { %s7426_s0 = inlined_call_operand.vmem [shape: bf16[32,4096], index: 0, kind: input, shape index: {}]   ;;  %s7427_s1 = inlined_call_operand.vmem [shape: bf16[16,4096], index: 1, kind: input, shape index: {}]   ;;  %s7428_s2 = inlined_call_operand.vmem [shape: bf16[16,32], index: 2, kind: input, shape index: {}]   ;;  %s7429_s3 = inlined_call_operand.vmem [shape: f32[16,1], index: 3, kind: input, shape index: {}]   ;;  %s7430_s4 = inlined_call_operand.vmem [shape: bf16[16,32], index: 4, kind: input, shape index: {}]   ;;  %s7431_s5 = inlined_call_operand.vmem [shape: f32[1,32], index: 5, kind: input, shape index: {}]   ;;  %s7432_s6 = inlined_call_operand.vmem [shape: f32[1,32], index: 6, kind: input, shape index: {}]   ;;  %s7433_s7 = inlined_call_operand.vmem [shape: f32[1,32], index: 7, kind: input, shape index: {}]   ;;  %s7434_s8 = inlined_call_operand.vmem [shape: bf16[32,96], index: 8, kind: input, shape index: {}]   ;;  %s7435_s9 = inlined_call_operand.vmem [shape: f32[1,96], index: 9, kind: input, shape index: {}]   ;;  %s7436_s10 = inlined_call_operand.vmem [shape: bf16[32,32], index: 10, kind: input, shape index: {}]   ;;  %s7437_s11 = inlined_call_operand.vmem [shape: f32[1,32], index: 11, kind: input, shape index: {}]   ;;  %s7438_s12 = inlined_call_operand.vmem [shape: f32[1,32], index: 12, kind: input, shape index: {}]   ;;  %s7439_s13 = inlined_call_operand.vmem [shape: f32[1,32], index: 13, kind: input, shape index: {}]   ;;  %s7440_s14 = inlined_call_operand.vmem [shape: bf16[32,96], index: 14, kind: input, shape index: {}]   ;;  %s7441_s15 = inlined_call_operand.vmem [shape: f32[1,96], index: 15, kind: input, shape index: {}]   ;;  %s7442_s16 = inlined_call_operand.vmem [shape: bf16[32,32], index: 16, kind: input, shape index: {}]   ;;  %s7443_s17 = inlined_call_operand.vmem [shape: f32[1,32], index: 17, kind: input, shape index: {}]   ;;  %s7444_s18 = inlined_call_operand.vmem [shape: f32[1,32], index: 18, kind: input, shape index: {}]   ;;  %s7445_s19 = inlined_call_operand.vmem [shape: f32[1,32], index: 19, kind: input, shape index: {}]   ;;  %s7446_s20 = inlined_call_operand.vmem [shape: bf16[256,128], index: 20, kind: input, shape index: {}]   ;;  %s7447_s21 = inlined_call_operand.vmem [shape: f32[1,128], index: 21, kind: input, shape index: {}]   ;;  %s7448_s22 = inlined_call_operand.hbm [shape: f32[2,128], index: 22, kind: output, shape index: {}]  }
   0x1   :  { %7452 = sst [smem:[#allocation5_spill]] %s7426_s0 }
   0x2   :  { %7453 = sst [smem:[#allocation6_spill]] %s7427_s1 }
   0x3   :  { %7454 = sst [smem:[#allocation7_spill]] %s7428_s2 }
   0x4   :  { %7455 = sst [smem:[#allocation8_spill]] %s7429_s3 }
   0x5   :  { %7456 = sst [smem:[#allocation9_spill]] %s7430_s4 }
   0x6   :  { %7457 = sst [smem:[#allocation10_spill]] %s7431_s5 }
   0x7   :  { %7458 = sst [smem:[#allocation11_spill]] %s7432_s6 }
   0x8   :  { %s7459_s29 = sld [smem:[#allocation5_spill]]  ;;  %v6260_v8 = vmov 0   ;;  %vm476_vm0 = vcmask 261120  }
   0x9   :  { %512 = vmatprep.mubr.bf16.mxu0 %v6260_v8  ;;  %555 = vmatprep.mubr.bf16.mxu1 %v6260_v8  ;;  %s7460_s30 = sld [smem:[#allocation7_spill]] }
   0xa   :  { %6075 = vset.pattern.permute.xlu0 %v6260_v8  ;;  %s7461_s27 = sld [smem:[#allocation8_spill]] }
   0xe   :  { %v107_v0 = vld [vmem:[%s7459_s29 + $0x100] sm:$0xff]  ;;  %v108_v2 = vld [vmem:[%s7459_s29 + $0x108] sm:$0xff]  ;;  %v109_v15 = vld [vmem:[%s7459_s29 + $0x110] sm:$0xff] }
   0xf   :  { %v123_v1 = vld [vmem:[%s7459_s29 + $0x180] sm:$0xff]  ;;  %v124_v4 = vld [vmem:[%s7459_s29 + $0x188] sm:$0xff]  ;;  %v125_v17 = vld [vmem:[%s7459_s29 + $0x190] sm:$0xff] }
  0x10   :  { %v5595_v3 = vcombine.high %v107_v0, %v123_v1  ;;  %v5594_v5 = vcombine.low %v107_v0, %v123_v1  ;;  %v75_v6 = vld [vmem:[%s7459_s29] sm:$0xff]  ;;  %v5597_v9 = vcombine.high %v108_v2, %v124_v4  ;;  %v5596_v10 = vcombine.low %v108_v2, %v124_v4  ;;  %v76_v12 = vld [vmem:[%s7459_s29 + $0x8] sm:$0xff]  ;;  %v110_v18 = vld [vmem:[%s7459_s29 + $0x118] sm:$0xff] }
  0x11   :  { %v91_v7 = vld [vmem:[%s7459_s29 + $0x80] sm:$0xff]  ;;  %v92_v13 = vld [vmem:[%s7459_s29 + $0x88] sm:$0xff]  ;;  %v126_v19 = vld [vmem:[%s7459_s29 + $0x198] sm:$0xff]  ;;  %v5599_v21 = vcombine.high %v109_v15, %v125_v17  ;;  %v5598_v28 = vcombine.low %v109_v15, %v125_v17 }
  0x12   :  { %v5563_v11 = vcombine.high %v75_v6, %v91_v7  ;;  %492 = vmatprep.subr.bf16.mxu0 %v5595_v3  ;;  %v5565_v14 = vcombine.high %v76_v12, %v92_v13  ;;  %535 = vmatprep.subr.bf16.mxu1 %v5597_v9  ;;  %v5562_v16 = vcombine.low %v75_v6, %v91_v7  ;;  %v77_v23 = vld [vmem:[%s7459_s29 + $0x10] sm:$0xff]  ;;  %v6436_v25 = vld [vmem:[%s7460_s30] sm:$0xff]   ;;  %v78_v26 = vld [vmem:[%s7459_s29 + $0x18] sm:$0xff] }
  0x13   :  { %493 = vmatpush1.bf16.msra.mxu0 %v5594_v5  ;;  %536 = vmatpush1.bf16.msra.mxu1 %v5596_v10  ;;  %v5564_v20 = vcombine.low %v76_v12, %v92_v13  ;;  %v5601_v22 = vcombine.high %v110_v18, %v126_v19  ;;  %v93_v24 = vld [vmem:[%s7459_s29 + $0x90] sm:$0xff]  ;;  %v94_v27 = vld [vmem:[%s7459_s29 + $0x98] sm:$0xff]  ;;  %v5600_v29 = vcombine.low %v110_v18, %v126_v19  ;;  %v111_v32 = vld [vmem:[%s7459_s29 + $0x120] sm:$0xff] }
  0x14   :  { %494 = vmatprep.subr.bf16.mxu0 %v5563_v11  ;;  %537 = vmatprep.subr.bf16.mxu1 %v5565_v14  ;;  %v5567_v30 = vcombine.high %v77_v23, %v93_v24  ;;  %v5569_v31 = vcombine.high %v78_v26, %v94_v27  ;;  %v127_v33 = vld [vmem:[%s7459_s29 + $0x1a0] sm:$0xff]  ;;  %v112_v34 = vld [vmem:[%s7459_s29 + $0x128] sm:$0xff]  ;;  %v5566_v36 = vcombine.low %v77_v23, %v93_v24  ;;  %v113_v48 = vld [vmem:[%s7459_s29 + $0x130] sm:$0xff] }
  0x15   :  { %v128_v35 = vld [vmem:[%s7459_s29 + $0x1a8] sm:$0xff]  ;;  %v5568_v37 = vcombine.low %v78_v26, %v94_v27  ;;  %v5603_v38 = vcombine.high %v111_v32, %v127_v33  ;;  %v79_v40 = vld [vmem:[%s7459_s29 + $0x20] sm:$0xff]  ;;  %v5602_v44 = vcombine.low %v111_v32, %v127_v33  ;;  %v129_v49 = vld [vmem:[%s7459_s29 + $0x1b0] sm:$0xff] }
  0x16   :  { %v5605_v39 = vcombine.high %v112_v34, %v128_v35  ;;  %v95_v41 = vld [vmem:[%s7459_s29 + $0xa0] sm:$0xff]  ;;  %v80_v42 = vld [vmem:[%s7459_s29 + $0x28] sm:$0xff]  ;;  %v5604_v45 = vcombine.low %v112_v34, %v128_v35  ;;  %v114_v50 = vld [vmem:[%s7459_s29 + $0x138] sm:$0xff]  ;;  %v5607_v54 = vcombine.high %v113_v48, %v129_v49  ;;  %v5606_v62 = vcombine.low %v113_v48, %v129_v49 }
  0x17   :  { %495 = vmatpush1.bf16.msra.mxu0 %v5562_v16  ;;  %538 = vmatpush1.bf16.msra.mxu1 %v5564_v20  ;;  %v96_v43 = vld [vmem:[%s7459_s29 + $0xa8] sm:$0xff]  ;;  %v5571_v46 = vcombine.high %v79_v40, %v95_v41  ;;  %v130_v51 = vld [vmem:[%s7459_s29 + $0x1b8] sm:$0xff]  ;;  %v5570_v52 = vcombine.low %v79_v40, %v95_v41  ;;  %v81_v55 = vld [vmem:[%s7459_s29 + $0x30] sm:$0xff] }
  0x18   :  { %578 = vmatprep.subr.bf16.mxu0 %v5599_v21  ;;  %621 = vmatprep.subr.bf16.mxu1 %v5601_v22  ;;  %v5573_v47 = vcombine.high %v80_v42, %v96_v43  ;;  %v5572_v53 = vcombine.low %v80_v42, %v96_v43  ;;  %v97_v56 = vld [vmem:[%s7459_s29 + $0xb0] sm:$0xff]  ;;  %v82_v57 = vld [vmem:[%s7459_s29 + $0x38] sm:$0xff]  ;;  %v5609_v58 = vcombine.high %v114_v50, %v130_v51  ;;  %v139_v60 = vld [vmem:[%s7461_s27] sm:$0xff] }
  0x19   :  { %v98_v59 = vld [vmem:[%s7459_s29 + $0xb8] sm:$0xff]  ;;  %v140_v61 = vld [vmem:[%s7461_s27 + $0x8] sm:$0xff]  ;;  %143 = vperm.xlu0 %6075, %v139_v60   ;;  %v115_v63 = vld [vmem:[%s7459_s29 + $0x140] sm:$0xff]  ;;  %v5608_v1 = vcombine.low %v114_v50, %v130_v51  ;;  %v5575_v2 = vcombine.high %v81_v55, %v97_v56  ;;  %v5574_v6 = vcombine.low %v81_v55, %v97_v56 }
  0x1a   :  { %5626 = vmatmul.mubr.msk.bf16.vlgmr.msra.gmra.mxu0 %vm476_vm0, %v6436_v25  ;;  %5627 = vmatmul.mubr.msk.bf16.vlgmr.msra.gmra.mxu1 %vm476_vm0, %v6436_v25  ;;  %v131_v0 = vld [vmem:[%s7459_s29 + $0x1c0] sm:$0xff]  ;;  %v116_v3 = vld [vmem:[%s7459_s29 + $0x148] sm:$0xff]  ;;  %v5577_v5 = vcombine.high %v82_v57, %v98_v59  ;;  %v5576_v10 = vcombine.low %v82_v57, %v98_v59  ;;  %v117_v16 = vld [vmem:[%s7459_s29 + $0x150] sm:$0xff] }
  0x1b   :  { %579 = vmatpush1.bf16.msra.mxu0 %v5598_v28  ;;  %622 = vmatpush1.bf16.msra.mxu1 %v5600_v29  ;;  %v132_v4 = vld [vmem:[%s7459_s29 + $0x1c8] sm:$0xff]  ;;  %v83_v7 = vld [vmem:[%s7459_s29 + $0x40] sm:$0xff]  ;;  %v5611_v11 = vcombine.high %v115_v63, %v131_v0  ;;  %v5610_v15 = vcombine.low %v115_v63, %v131_v0  ;;  %v133_v17 = vld [vmem:[%s7459_s29 + $0x1d0] sm:$0xff] }
  0x1c   :  { %580 = vmatprep.subr.bf16.mxu0 %v5567_v30  ;;  %623 = vmatprep.subr.bf16.mxu1 %v5569_v31  ;;  %v99_v9 = vld [vmem:[%s7459_s29 + $0xc0] sm:$0xff]  ;;  %v84_v12 = vld [vmem:[%s7459_s29 + $0x48] sm:$0xff]  ;;  %v5613_v14 = vcombine.high %v116_v3, %v132_v4  ;;  %v5612_v18 = vcombine.low %v116_v3, %v132_v4  ;;  %v118_v20 = vld [vmem:[%s7459_s29 + $0x158] sm:$0xff]  ;;  %v5615_v28 = vcombine.high %v117_v16, %v133_v17 }
  0x1d   :  { %598 = vmatprep.mubr.bf16.mxu0 %v6260_v8  ;;  %641 = vmatprep.mubr.bf16.mxu1 %v6260_v8  ;;  %v100_v13 = vld [vmem:[%s7459_s29 + $0xc8] sm:$0xff]  ;;  %v5579_v19 = vcombine.high %v83_v7, %v99_v9  ;;  %v134_v21 = vld [vmem:[%s7459_s29 + $0x1d8] sm:$0xff]  ;;  %v5578_v23 = vcombine.low %v83_v7, %v99_v9  ;;  %v85_v24 = vld [vmem:[%s7459_s29 + $0x50] sm:$0xff] }
  0x1e   :  { %148 = vperm.xlu0 %6075, %v140_v61   ;;  %v5581_v22 = vcombine.high %v84_v12, %v100_v13  ;;  %v101_v26 = vld [vmem:[%s7459_s29 + $0xd0] sm:$0xff]  ;;  %v5580_v27 = vcombine.low %v84_v12, %v100_v13  ;;  %v86_v29 = vld [vmem:[%s7459_s29 + $0x58] sm:$0xff]  ;;  %v5617_v31 = vcombine.high %v118_v20, %v134_v21 }
  0x1f   :  { %581 = vmatpush1.bf16.msra.mxu0 %v5566_v36  ;;  %624 = vmatpush1.bf16.msra.mxu1 %v5568_v37  ;;  %v102_v30 = vld [vmem:[%s7459_s29 + $0xd8] sm:$0xff] }
  0x20   :  { %664 = vmatprep.subr.bf16.mxu0 %v5603_v38  ;;  %707 = vmatprep.subr.bf16.mxu1 %v5605_v39 }
  0x22   :  { %5628 = vmatmul.mubr.msk.bf16.vlgmr.msra.gmra.mxu0 %vm476_vm0, %v6436_v25  ;;  %5629 = vmatmul.mubr.msk.bf16.vlgmr.msra.gmra.mxu1 %vm476_vm0, %v6436_v25 }
  0x23   :  { %665 = vmatpush1.bf16.msra.mxu0 %v5602_v44  ;;  %708 = vmatpush1.bf16.msra.mxu1 %v5604_v45 }
  0x24   :  { %666 = vmatprep.subr.bf16.mxu0 %v5571_v46  ;;  %709 = vmatprep.subr.bf16.mxu1 %v5573_v47 }
  0x25   :  { %684 = vmatprep.mubr.bf16.mxu0 %v6260_v8  ;;  %727 = vmatprep.mubr.bf16.mxu1 %v6260_v8 }
  0x27   :  { %667 = vmatpush1.bf16.msra.mxu0 %v5570_v52  ;;  %710 = vmatpush1.bf16.msra.mxu1 %v5572_v53 }
  0x28   :  { %750 = vmatprep.subr.bf16.mxu0 %v5607_v54  ;;  %793 = vmatprep.subr.bf16.mxu1 %v5609_v58 }
  0x2a   :  { %5630 = vmatmul.mubr.msk.bf16.vlgmr.msra.gmra.mxu0 %vm476_vm0, %v6436_v25  ;;  %5631 = vmatmul.mubr.msk.bf16.vlgmr.msra.gmra.mxu1 %vm476_vm0, %v6436_v25 }
  0x2b   :  { %751 = vmatpush1.bf16.msra.mxu0 %v5606_v62  ;;  %794 = vmatpush1.bf16.msra.mxu1 %v5608_v1 }
  0x2c   :  { %752 = vmatprep.subr.bf16.mxu0 %v5575_v2  ;;  %795 = vmatprep.subr.bf16.mxu1 %v5577_v5 }
  0x2d   :  { %770 = vmatprep.mubr.bf16.mxu0 %v6260_v8  ;;  %813 = vmatprep.mubr.bf16.mxu1 %v6260_v8 }
  0x2f   :  { %753 = vmatpush1.bf16.msra.mxu0 %v5574_v6  ;;  %796 = vmatpush1.bf16.msra.mxu1 %v5576_v10 }
  0x30   :  { %836 = vmatprep.subr.bf16.mxu0 %v5611_v11  ;;  %879 = vmatprep.subr.bf16.mxu1 %v5613_v14 }
  0x32   :  { %5632 = vmatmul.mubr.msk.bf16.vlgmr.msra.gmra.mxu0 %vm476_vm0, %v6436_v25  ;;  %5633 = vmatmul.mubr.msk.bf16.vlgmr.msra.gmra.mxu1 %vm476_vm0, %v6436_v25 }
  0x33   :  { %837 = vmatpush1.bf16.msra.mxu0 %v5610_v15  ;;  %880 = vmatpush1.bf16.msra.mxu1 %v5612_v18 }
  0x34   :  { %838 = vmatprep.subr.bf16.mxu0 %v5579_v19  ;;  %881 = vmatprep.subr.bf16.mxu1 %v5581_v22 }
  0x35   :  { %856 = vmatprep.mubr.bf16.mxu0 %v6260_v8  ;;  %899 = vmatprep.mubr.bf16.mxu1 %v6260_v8 }
  0x36   :  { %27 = vsyncpa [#allocation3], 0  ;;  %v5614_v32 = vcombine.low %v117_v16, %v133_v17  ;;  %v5616_v33 = vcombine.low %v118_v20, %v134_v21  ;;  %v5583_v34 = vcombine.high %v85_v24, %v101_v26  ;;  %v5585_v35 = vcombine.high %v86_v29, %v102_v30  ;;  %v119_v36 = vld [vmem:[%s7459_s29 + $0x160] sm:$0xff]  ;;  %v120_v38 = vld [vmem:[%s7459_s29 + $0x168] sm:$0xff]  ;;  %s7462_s26 = sld [smem:[#allocation6_spill]]  ;;  %s6263_s0 = smov 120  }
  0x37   :  { %839 = vmatpush1.bf16.msra.mxu0 %v5578_v23  ;;  %882 = vmatpush1.bf16.msra.mxu1 %v5580_v27  ;;  %v135_v37 = vld [vmem:[%s7459_s29 + $0x1e0] sm:$0xff]  ;;  %v136_v39 = vld [vmem:[%s7459_s29 + $0x1e8] sm:$0xff]  ;;  %v5582_v40 = vcombine.low %v85_v24, %v101_v26  ;;  %v5584_v41 = vcombine.low %v86_v29, %v102_v30  ;;  %v121_v52 = vld [vmem:[%s7459_s29 + $0x170] sm:$0xff]  ;;  %s7463_s23 = sld [smem:[#allocation9_spill]]  ;;  %vm6262_vm1 = vmmov 0   ;;  %vm2128_vm2 = vcmask 130048  }
  0x38   :  { %922 = vmatprep.subr.bf16.mxu0 %v5615_v28  ;;  %965 = vmatprep.subr.bf16.mxu1 %v5617_v31  ;;  %v5619_v42 = vcombine.high %v119_v36, %v135_v37  ;;  %v5621_v43 = vcombine.high %v120_v38, %v136_v39  ;;  %v87_v44 = vld [vmem:[%s7459_s29 + $0x60] sm:$0xff]  ;;  %v88_v46 = vld [vmem:[%s7459_s29 + $0x68] sm:$0xff]  ;;  %v5618_v48 = vcombine.low %v119_v36, %v135_v37  ;;  %v137_v53 = vld [vmem:[%s7459_s29 + $0x1f0] sm:$0xff]  ;;  %s7464_s24 = sld [smem:[#allocation10_spill]]  ;;  %vm2309_vm3 = vcmask 64512   ;;  %s6267_s1 = smov 64  }
  0x39   :  { %v103_v45 = vld [vmem:[%s7459_s29 + $0xe0] sm:$0xff]  ;;  %v104_v47 = vld [vmem:[%s7459_s29 + $0xe8] sm:$0xff]  ;;  %v5620_v49 = vcombine.low %v120_v38, %v136_v39  ;;  %v122_v54 = vld [vmem:[%s7459_s29 + $0x178] sm:$0xff]  ;;  %v5623_v58 = vcombine.high %v121_v52, %v137_v53  ;;  %v5622_v0 = vcombine.low %v121_v52, %v137_v53  ;;  %s7465_s28 = sld [smem:[#allocation11_spill]]  ;;  %s6268_s25 = smov 8   ;;  %vm3634_vm4 = vcmask 195584  }
  0x3a   :  { %5634 = vmatmul.mubr.msk.bf16.vlgmr.msra.gmra.mxu0 %vm476_vm0, %v6436_v25  ;;  %5635 = vmatmul.mubr.msk.bf16.vlgmr.msra.gmra.mxu1 %vm476_vm0, %v6436_v25  ;;  %v5587_v50 = vcombine.high %v87_v44, %v103_v45  ;;  %v5589_v51 = vcombine.high %v88_v46, %v104_v47  ;;  %v138_v55 = vld [vmem:[%s7459_s29 + $0x1f8] sm:$0xff]  ;;  %v5586_v56 = vcombine.low %v87_v44, %v103_v45  ;;  %v89_v60 = vld [vmem:[%s7459_s29 + $0x70] sm:$0xff]  ;;  %s6269_s2 = smov 16   ;;  %s6271_s27 = smov 32   ;;  %vm5322_vm5 = vcmask 785408  }
  0x3b   :  { %923 = vmatpush1.bf16.msra.mxu0 %v5614_v32  ;;  %966 = vmatpush1.bf16.msra.mxu1 %v5616_v33  ;;  %v5588_v57 = vcombine.low %v88_v46, %v104_v47  ;;  %v5625_v59 = vcombine.high %v122_v54, %v138_v55  ;;  %v105_v61 = vld [vmem:[%s7459_s29 + $0xf0] sm:$0xff]  ;;  %v90_v62 = vld [vmem:[%s7459_s29 + $0x78] sm:$0xff]  ;;  %v5624_v1 = vcombine.low %v122_v54, %v138_v55  ;;  %vm5320_vm6 = vcmask 523264  }
  0x3c   :  { %924 = vmatprep.subr.bf16.mxu0 %v5583_v34  ;;  %967 = vmatprep.subr.bf16.mxu1 %v5585_v35  ;;  %v106_v63 = vld [vmem:[%s7459_s29 + $0xf8] sm:$0xff]  ;;  %v5591_v2 = vcombine.high %v89_v60, %v105_v61  ;;  %v5590_v4 = vcombine.low %v89_v60, %v105_v61  ;;  %v6643_v6 = vld [vmem:[%s7462_s26] sm:$0xff]  ;;  %vm5366_vm7 = vcmask 1040384  }
  0x3d   :  { %942 = vmatprep.mubr.bf16.mxu0 %v6260_v8  ;;  %985 = vmatprep.mubr.bf16.mxu1 %v6260_v8  ;;  %v5593_v3 = vcombine.high %v90_v62, %v106_v63  ;;  %v5592_v5 = vcombine.low %v90_v62, %v106_v63  ;;  %v6648_v7 = vld [vmem:[%s7462_s26 + $0x80] sm:$0xff]  ;;  %v6691_v62 = vld [vmem:[%s7462_s26 + $0x10] sm:$0xff] }
  0x3e   :  { %v5643_v9 = vcombine.high %v6643_v6, %v6648_v7  ;;  %v5642_v10 = vcombine.low %v6643_v6, %v6648_v7 }
  0x3f   :  { %925 = vmatpush1.bf16.msra.mxu0 %v5582_v40  ;;  %968 = vmatpush1.bf16.msra.mxu1 %v5584_v41 }
  0x40   :  { %1008 = vmatprep.subr.bf16.mxu0 %v5619_v42  ;;  %1051 = vmatprep.subr.bf16.mxu1 %v5621_v43 }
  0x42   :  { %5636 = vmatmul.mubr.msk.bf16.vlgmr.msra.gmra.mxu0 %vm476_vm0, %v6436_v25  ;;  %5637 = vmatmul.mubr.msk.bf16.vlgmr.msra.gmra.mxu1 %vm476_vm0, %v6436_v25 }
  0x43   :  { %1009 = vmatpush1.bf16.msra.mxu0 %v5618_v48  ;;  %1052 = vmatpush1.bf16.msra.mxu1 %v5620_v49 }
  0x44   :  { %1010 = vmatprep.subr.bf16.mxu0 %v5587_v50  ;;  %1053 = vmatprep.subr.bf16.mxu1 %v5589_v51 }
  0x45   :  { %1028 = vmatprep.mubr.bf16.mxu0 %v6260_v8  ;;  %1071 = vmatprep.mubr.bf16.mxu1 %v6260_v8 }
  0x47   :  { %1011 = vmatpush1.bf16.msra.mxu0 %v5586_v56  ;;  %1054 = vmatpush1.bf16.msra.mxu1 %v5588_v57 }
  0x48   :  { %1094 = vmatprep.subr.bf16.mxu0 %v5623_v58  ;;  %1137 = vmatprep.subr.bf16.mxu1 %v5625_v59 }
  0x4a   :  { %5638 = vmatmul.mubr.msk.bf16.vlgmr.msra.gmra.mxu0 %vm476_vm0, %v6436_v25  ;;  %5639 = vmatmul.mubr.msk.bf16.vlgmr.msra.gmra.mxu1 %vm476_vm0, %v6436_v25 }
  0x4b   :  { %1095 = vmatpush1.bf16.msra.mxu0 %v5622_v0  ;;  %1138 = vmatpush1.bf16.msra.mxu1 %v5624_v1 }
  0x4c   :  { %1096 = vmatprep.subr.bf16.mxu0 %v5591_v2  ;;  %1139 = vmatprep.subr.bf16.mxu1 %v5593_v3  ;;  %v6696_v3 = vld [vmem:[%s7462_s26 + $0x90] sm:$0xff] }
  0x4d   :  { %1114 = vmatprep.mubr.bf16.mxu0 %v6260_v8  ;;  %1157 = vmatprep.mubr.bf16.mxu1 %v6260_v8  ;;  %v6653_v8 = vld [vmem:[%s7462_s26 + $0x8] sm:$0xff] }
  0x4f   :  { %1097 = vmatpush1.bf16.msra.mxu0 %v5590_v4  ;;  %1140 = vmatpush1.bf16.msra.mxu1 %v5592_v5  ;;  %v6701_v4 = vld [vmem:[%s7462_s26 + $0x18] sm:$0xff] }
  0x50   :  { %v6706_v5 = vld [vmem:[%s7462_s26 + $0x98] sm:$0xff] }
  0x52   :  { %5640 = vmatmul.mubr.msk.bf16.vlgmr.msra.gmra.mxu0 %vm476_vm0, %v6436_v25  ;;  %5641 = vmatmul.mubr.msk.bf16.vlgmr.msra.gmra.mxu1 %vm476_vm0, %v6436_v25  ;;  %v6660_v25 = vld [vmem:[%s7462_s26 + $0x88] sm:$0xff] }
  0x53   :  { %v5644_v11 = vcombine.low %v6653_v8, %v6660_v25  ;;  %v5645_v12 = vcombine.high %v6653_v8, %v6660_v25  ;;  %1488 = vmatprep.mubr.bf16.mxu0 %v5643_v9 }
  0x55   :  { %1529 = vmatprep.mubr.bf16.mxu1 %v5645_v12 }
  0x94   :  { %v6668_v13 = vpop.permute.xlu0 %143 }
  0x99   :  { %v6670_v18 = vpop.permute.xlu0 %148 }
  0xda   :  { %v514_v14 = vpop.f32.mrf.mxu0  ;;  %v557_v15 = vpop.f32.mrf.mxu1 }
  0xdb   :  { %v515_v23 = vadd.f32 %v514_v14, %v6668_v13  ;;  %v558_v28 = vadd.f32 %v557_v15, %v6668_v13 }
  0xdc   :  { %v516_v16 = vpop.f32.mrf.mxu0  ;;  %v559_v17 = vpop.f32.mrf.mxu1 }
  0xdd   :  { %v517_v20 = vadd.f32 %v516_v16, %v6668_v13  ;;  %v560_v24 = vadd.f32 %v559_v17, %v6668_v13  ;;  %v1168_v38 = vmax.f32 %v515_v23, 0.0  ;;  %v1170_v42 = vmax.f32 %v558_v28, 0.0 }
  0xde   :  { %v518_v19 = vpop.f32.mrf.mxu0  ;;  %v561_v22 = vpop.f32.mrf.mxu1  ;;  %v5647_v23 = vcombine.high %v6691_v62, %v6696_v3 }
  0xdf   :  { %v519_v21 = vadd.f32 %v518_v19, %v6670_v18  ;;  %v562_v26 = vadd.f32 %v561_v22, %v6670_v18  ;;  %v1169_v34 = vmax.f32 %v517_v20, 0.0  ;;  %v1171_v39 = vmax.f32 %v560_v24, 0.0 }
  0xe0   :  { %v520_v27 = vpop.f32.mrf.mxu0  ;;  %v563_v30 = vpop.f32.mrf.mxu1  ;;  %v5649_v24 = vcombine.high %v6701_v4, %v6706_v5 }
  0xe1   :  { %v521_v29 = vadd.f32 %v520_v27, %v6670_v18  ;;  %v1200_v31 = vmax.f32 %v519_v21, 0.0  ;;  %v564_v32 = vadd.f32 %v563_v30, %v6670_v18  ;;  %v1202_v35 = vmax.f32 %v562_v26, 0.0 }
  0xe2   :  { %v600_v33 = vpop.f32.mrf.mxu0  ;;  %v643_v37 = vpop.f32.mrf.mxu1 }
  0xe3   :  { %v1201_v36 = vmax.f32 %v521_v29, 0.0  ;;  %v1203_v40 = vmax.f32 %v564_v32, 0.0  ;;  %v1264_v45 = vpack.c.bf16 %v1200_v31, %v1168_v38  ;;  %v1266_v48 = vpack.c.bf16 %v1202_v35, %v1170_v42  ;;  %v6731_v38 = vld [vmem:[%s7462_s26 + $0x20] sm:$0xff] }
  0xe4   :  { %v602_v41 = vpop.f32.mrf.mxu0  ;;  %v645_v44 = vpop.f32.mrf.mxu1  ;;  %v601_v52 = vadd.f32 %v600_v33, %v6668_v13  ;;  %v644_v56 = vadd.f32 %v643_v37, %v6668_v13 }
  0xe5   :  { %v1265_v43 = vpack.c.bf16 %v1201_v36, %v1169_v34  ;;  %v1267_v46 = vpack.c.bf16 %v1203_v40, %v1171_v39  ;;  %v603_v49 = vadd.f32 %v602_v41, %v6668_v13  ;;  %v646_v53 = vadd.f32 %v645_v44, %v6668_v13  ;;  %v6736_v39 = vld [vmem:[%s7462_s26 + $0xa0] sm:$0xff] }
  0xe6   :  { %v604_v47 = vpop.f32.mrf.mxu0  ;;  %v647_v51 = vpop.f32.mrf.mxu1  ;;  %v1172_v9 = vmax.f32 %v601_v52, 0.0  ;;  %v1174_v16 = vmax.f32 %v644_v56, 0.0  ;;  %v5648_v44 = vcombine.low %v6701_v4, %v6706_v5 }
  0xe7   :  { %v605_v50 = vadd.f32 %v604_v47, %v6670_v18  ;;  %1470 = vmatprep.subr.bf16.mxu0 %v1265_v43  ;;  %v648_v54 = vadd.f32 %v647_v51, %v6670_v18  ;;  %1511 = vmatprep.subr.bf16.mxu1 %v1267_v46  ;;  %v1173_v63 = vmax.f32 %v603_v49, 0.0  ;;  %v1175_v12 = vmax.f32 %v646_v53, 0.0  ;;  %v6748_v46 = vld [vmem:[%s7462_s26 + $0xa8] sm:$0xff] }
  0xe8   :  { %v606_v55 = vpop.f32.mrf.mxu0  ;;  %1471 = vmatpush1.bf16.xpose.msra.mxu0 %v1264_v45  ;;  %v649_v58 = vpop.f32.mrf.mxu1  ;;  %1512 = vmatpush1.bf16.xpose.msra.mxu1 %v1266_v48  ;;  %v6743_v45 = vld [vmem:[%s7462_s26 + $0x28] sm:$0xff]  ;;  %v5651_v53 = vcombine.high %v6731_v38, %v6736_v39 }
  0xe9   :  { %v607_v57 = vadd.f32 %v606_v55, %v6670_v18  ;;  %v1204_v59 = vmax.f32 %v605_v50, 0.0  ;;  %v650_v60 = vadd.f32 %v649_v58, %v6670_v18  ;;  %v1206_v0 = vmax.f32 %v648_v54, 0.0 }
  0xea   :  { %v686_v61 = vpop.f32.mrf.mxu0  ;;  %v729_v2 = vpop.f32.mrf.mxu1  ;;  %v5653_v58 = vcombine.high %v6743_v45, %v6748_v46 }
  0xeb   :  { %v1205_v1 = vmax.f32 %v607_v57, 0.0  ;;  %v1207_v14 = vmax.f32 %v650_v60, 0.0  ;;  %v1268_v20 = vpack.c.bf16 %v1204_v59, %v1172_v9  ;;  %v1270_v26 = vpack.c.bf16 %v1206_v0, %v1174_v16  ;;  %v6770_v16 = vld [vmem:[%s7462_s26 + $0xb0] sm:$0xff] }
  0xec   :  { %v688_v15 = vpop.f32.mrf.mxu0  ;;  %v731_v19 = vpop.f32.mrf.mxu1  ;;  %v687_v33 = vadd.f32 %v686_v61, %v6668_v13  ;;  %v730_v6 = vadd.f32 %v729_v2, %v6668_v13 }
  0xed   :  { %v1269_v17 = vpack.c.bf16 %v1205_v1, %v1173_v63  ;;  %v1271_v21 = vpack.c.bf16 %v1207_v14, %v1175_v12  ;;  %v689_v27 = vadd.f32 %v688_v15, %v6668_v13  ;;  %v732_v30 = vadd.f32 %v731_v19, %v6668_v13  ;;  %v6765_v15 = vld [vmem:[%s7462_s26 + $0x30] sm:$0xff] }
  0xee   :  { %v690_v22 = vpop.f32.mrf.mxu0  ;;  %v733_v29 = vpop.f32.mrf.mxu1  ;;  %v1176_v47 = vmax.f32 %v687_v33, 0.0  ;;  %v1178_v50 = vmax.f32 %v730_v6, 0.0  ;;  %v5655_v33 = vcombine.high %v6765_v15, %v6770_v16 }
  0xef   :  { %v691_v28 = vadd.f32 %v690_v22, %v6670_v18  ;;  %1489 = vmatmul.mubr.bf16.vlgmr.msra.gmra.mxu0 %v5642_v10  ;;  %1552 = vmatprep.subr.bf16.mxu0 %v1269_v17  ;;  %v734_v31 = vadd.f32 %v733_v29, %v6670_v18  ;;  %v1177_v36 = vmax.f32 %v689_v27, 0.0  ;;  %v1179_v40 = vmax.f32 %v732_v30, 0.0 }
  0xf0   :  { %1530 = vmatmul.mubr.bf16.vlgmr.msra.gmra.mxu1 %v5644_v11  ;;  %1593 = vmatprep.subr.bf16.mxu1 %v1271_v21  ;;  %v692_v32 = vpop.f32.mrf.mxu0  ;;  %v735_v35 = vpop.f32.mrf.mxu1  ;;  %v5646_v11 = vcombine.low %v6691_v62, %v6696_v3  ;;  %v5650_v22 = vcombine.low %v6731_v38, %v6736_v39  ;;  %v5652_v29 = vcombine.low %v6743_v45, %v6748_v46 }
  0xf1   :  { %v693_v34 = vadd.f32 %v692_v32, %v6670_v18  ;;  %1553 = vmatpush1.bf16.xpose.msra.mxu0 %v1268_v20  ;;  %1594 = vmatpush1.bf16.xpose.msra.mxu1 %v1270_v26  ;;  %v736_v7 = vadd.f32 %v735_v35, %v6670_v18  ;;  %v1208_v37 = vmax.f32 %v691_v28, 0.0  ;;  %v1210_v41 = vmax.f32 %v734_v31, 0.0 }
  0xf2   :  { %v772_v10 = vpop.f32.mrf.mxu0  ;;  %1570 = vmatprep.mubr.bf16.mxu0 %v5647_v23  ;;  %1611 = vmatprep.mubr.bf16.mxu1 %v5649_v24  ;;  %v815_v25 = vpop.f32.mrf.mxu1  ;;  %v6777_v23 = vld [vmem:[%s7462_s26 + $0x38] sm:$0xff] }
  0xf3   :  { %v1209_v8 = vmax.f32 %v693_v34, 0.0  ;;  %v1211_v42 = vmax.f32 %v736_v7, 0.0  ;;  %v1272_v54 = vpack.c.bf16 %v1208_v37, %v1176_v47  ;;  %v1274_v59 = vpack.c.bf16 %v1210_v41, %v1178_v50  ;;  %v6782_v24 = vld [vmem:[%s7462_s26 + $0xb8] sm:$0xff]  ;;  %v6801_v47 = vld [vmem:[%s7462_s26 + $0x40] sm:$0xff] }
  0xf4   :  { %v774_v43 = vpop.f32.mrf.mxu0  ;;  %v817_v49 = vpop.f32.mrf.mxu1  ;;  %v773_v63 = vadd.f32 %v772_v10, %v6668_v13  ;;  %v816_v2 = vadd.f32 %v815_v25, %v6668_v13  ;;  %v5657_v10 = vcombine.high %v6777_v23, %v6782_v24 }
  0xf5   :  { %v1273_v48 = vpack.c.bf16 %v1209_v8, %v1177_v36  ;;  %v1275_v51 = vpack.c.bf16 %v1211_v42, %v1179_v40  ;;  %v775_v55 = vadd.f32 %v774_v43, %v6668_v13  ;;  %v818_v60 = vadd.f32 %v817_v49, %v6668_v13 }
  0xf6   :  { %v776_v52 = vpop.f32.mrf.mxu0  ;;  %v819_v57 = vpop.f32.mrf.mxu1  ;;  %v1180_v26 = vmax.f32 %v773_v63, 0.0  ;;  %v1182_v30 = vmax.f32 %v816_v2, 0.0 }
  0xf7   :  { %v777_v56 = vadd.f32 %v776_v52, %v6670_v18  ;;  %1634 = vmatprep.subr.bf16.mxu0 %v1273_v48  ;;  %v820_v61 = vadd.f32 %v819_v57, %v6670_v18  ;;  %1675 = vmatprep.subr.bf16.mxu1 %v1275_v51  ;;  %v1181_v5 = vmax.f32 %v775_v55, 0.0  ;;  %v1183_v17 = vmax.f32 %v818_v60, 0.0  ;;  %v6806_v48 = vld [vmem:[%s7462_s26 + $0xc0] sm:$0xff]  ;;  %v6818_v55 = vld [vmem:[%s7462_s26 + $0xc8] sm:$0xff] }
  0xf8   :  { %1571 = vmatmul.mubr.bf16.vlgmr.msra.gmra.mxu0 %v5646_v11  ;;  %1612 = vmatmul.mubr.bf16.vlgmr.msra.gmra.mxu1 %v5648_v44  ;;  %v778_v62 = vpop.f32.mrf.mxu0  ;;  %v821_v1 = vpop.f32.mrf.mxu1  ;;  %v5659_v63 = vcombine.high %v6801_v47, %v6806_v48 }
  0xf9   :  { %v779_v0 = vadd.f32 %v778_v62, %v6670_v18  ;;  %1635 = vmatpush1.bf16.xpose.msra.mxu0 %v1272_v54  ;;  %v822_v3 = vadd.f32 %v821_v1, %v6670_v18  ;;  %1676 = vmatpush1.bf16.xpose.msra.mxu1 %v1274_v59  ;;  %v1212_v9 = vmax.f32 %v777_v56, 0.0  ;;  %v1214_v19 = vmax.f32 %v820_v61, 0.0  ;;  %v6813_v54 = vld [vmem:[%s7462_s26 + $0x48] sm:$0xff] }
  0xfa   :  { %v858_v4 = vpop.f32.mrf.mxu0  ;;  %1652 = vmatprep.mubr.bf16.mxu0 %v5651_v53  ;;  %v901_v14 = vpop.f32.mrf.mxu1  ;;  %1693 = vmatprep.mubr.bf16.mxu1 %v5653_v58  ;;  %v5654_v53 = vcombine.low %v6765_v15, %v6770_v16  ;;  %v5656_v59 = vcombine.low %v6777_v23, %v6782_v24 }
  0xfb   :  { %v1213_v12 = vmax.f32 %v779_v0, 0.0  ;;  %v1215_v20 = vmax.f32 %v822_v3, 0.0  ;;  %v1276_v34 = vpack.c.bf16 %v1212_v9, %v1180_v26  ;;  %v1278_v36 = vpack.c.bf16 %v1214_v19, %v1182_v30 }
  0xfc   :  { %v860_v21 = vpop.f32.mrf.mxu0  ;;  %v903_v28 = vpop.f32.mrf.mxu1  ;;  %v859_v11 = vadd.f32 %v858_v4, %v6668_v13  ;;  %v902_v40 = vadd.f32 %v901_v14, %v6668_v13  ;;  %v5661_v4 = vcombine.high %v6813_v54, %v6818_v55 }
  0xfd   :  { %v1277_v27 = vpack.c.bf16 %v1213_v12, %v1181_v5  ;;  %v1279_v31 = vpack.c.bf16 %v1215_v20, %v1183_v17  ;;  %v861_v35 = vadd.f32 %v860_v21, %v6668_v13  ;;  %v904_v37 = vadd.f32 %v903_v28, %v6668_v13  ;;  %v6842_v28 = vld [vmem:[%s7462_s26 + $0xd0] sm:$0xff] }
  0xfe   :  { %v862_v32 = vpop.f32.mrf.mxu0  ;;  %v905_v7 = vpop.f32.mrf.mxu1  ;;  %v1184_v56 = vmax.f32 %v859_v11, 0.0  ;;  %v1186_v60 = vmax.f32 %v902_v40, 0.0 }
  0xff   :  { %v863_v6 = vadd.f32 %v862_v32, %v6670_v18  ;;  %1716 = vmatprep.subr.bf16.mxu0 %v1277_v27  ;;  %v906_v8 = vadd.f32 %v905_v7, %v6670_v18  ;;  %1757 = vmatprep.subr.bf16.mxu1 %v1279_v31  ;;  %v1185_v43 = vmax.f32 %v861_v35, 0.0  ;;  %v1187_v49 = vmax.f32 %v904_v37, 0.0  ;;  %v6837_v27 = vld [vmem:[%s7462_s26 + $0x50] sm:$0xff]  ;;  %v6854_v35 = vld [vmem:[%s7462_s26 + $0xd8] sm:$0xff] }
 0x100   :  { %1653 = vmatmul.mubr.bf16.vlgmr.msra.gmra.mxu0 %v5650_v22  ;;  %v864_v25 = vpop.f32.mrf.mxu0  ;;  %1694 = vmatmul.mubr.bf16.vlgmr.msra.gmra.mxu1 %v5652_v29  ;;  %v907_v39 = vpop.f32.mrf.mxu1  ;;  %v5663_v11 = vcombine.high %v6837_v27, %v6842_v28 }
 0x101   :  { %v865_v38 = vadd.f32 %v864_v25, %v6670_v18  ;;  %1717 = vmatpush1.bf16.xpose.msra.mxu0 %v1276_v34  ;;  %v908_v41 = vadd.f32 %v907_v39, %v6670_v18  ;;  %1758 = vmatpush1.bf16.xpose.msra.mxu1 %v1278_v36  ;;  %v1216_v44 = vmax.f32 %v863_v6, 0.0  ;;  %v1218_v50 = vmax.f32 %v906_v8, 0.0  ;;  %v6849_v34 = vld [vmem:[%s7462_s26 + $0x58] sm:$0xff] }
 0x102   :  { %v944_v42 = vpop.f32.mrf.mxu0  ;;  %1734 = vmatprep.mubr.bf16.mxu0 %v5655_v33  ;;  %v987_v46 = vpop.f32.mrf.mxu1  ;;  %1775 = vmatprep.mubr.bf16.mxu1 %v5657_v10  ;;  %v5658_v33 = vcombine.low %v6801_v47, %v6806_v48  ;;  %v5660_v36 = vcombine.low %v6813_v54, %v6818_v55 }
 0x103   :  { %v1217_v45 = vmax.f32 %v865_v38, 0.0  ;;  %v1219_v51 = vmax.f32 %v908_v41, 0.0  ;;  %v1280_v0 = vpack.c.bf16 %v1216_v44, %v1184_v56  ;;  %v1282_v5 = vpack.c.bf16 %v1218_v50, %v1186_v60 }
 0x104   :  { %v946_v52 = vpop.f32.mrf.mxu0  ;;  %v989_v58 = vpop.f32.mrf.mxu1  ;;  %v945_v15 = vadd.f32 %v944_v42, %v6668_v13  ;;  %v988_v19 = vadd.f32 %v987_v46, %v6668_v13  ;;  %v5665_v42 = vcombine.high %v6849_v34, %v6854_v35 }
 0x105   :  { %v1281_v57 = vpack.c.bf16 %v1217_v45, %v1185_v43  ;;  %v1283_v61 = vpack.c.bf16 %v1219_v51, %v1187_v49  ;;  %v947_v1 = vadd.f32 %v946_v52, %v6668_v13  ;;  %v990_v9 = vadd.f32 %v989_v58, %v6668_v13  ;;  %v1260_v58 = vld [vmem:[%s7462_s26 + $0xe0] sm:$0xff] }
 0x106   :  { %v948_v62 = vpop.f32.mrf.mxu0  ;;  %v991_v3 = vpop.f32.mrf.mxu1  ;;  %v1188_v6 = vmax.f32 %v945_v15, 0.0  ;;  %v1190_v37 = vmax.f32 %v988_v19, 0.0 }
 0x107   :  { %v949_v2 = vadd.f32 %v948_v62, %v6670_v18  ;;  %1798 = vmatprep.subr.bf16.mxu0 %v1281_v57  ;;  %v992_v12 = vadd.f32 %v991_v3, %v6670_v18  ;;  %1839 = vmatprep.subr.bf16.mxu1 %v1283_v61  ;;  %v1189_v22 = vmax.f32 %v947_v1, 0.0  ;;  %v1191_v29 = vmax.f32 %v990_v9, 0.0  ;;  %v1244_v57 = vld [vmem:[%s7462_s26 + $0x60] sm:$0xff]  ;;  %v1261_v1 = vld [vmem:[%s7462_s26 + $0xe8] sm:$0xff] }
 0x108   :  { %1735 = vmatmul.mubr.bf16.vlgmr.msra.gmra.mxu0 %v5654_v53  ;;  %v950_v14 = vpop.f32.mrf.mxu0  ;;  %1776 = vmatmul.mubr.bf16.vlgmr.msra.gmra.mxu1 %v5656_v59  ;;  %v993_v17 = vpop.f32.mrf.mxu1  ;;  %v5667_v15 = vcombine.high %v1244_v57, %v1260_v58 }
 0x109   :  { %v951_v16 = vadd.f32 %v950_v14, %v6670_v18  ;;  %1799 = vmatpush1.bf16.xpose.msra.mxu0 %v1280_v0  ;;  %v994_v20 = vadd.f32 %v993_v17, %v6670_v18  ;;  %1840 = vmatpush1.bf16.xpose.msra.mxu1 %v1282_v5  ;;  %v1220_v23 = vmax.f32 %v949_v2, 0.0  ;;  %v1222_v30 = vmax.f32 %v992_v12, 0.0  ;;  %v1245_v0 = vld [vmem:[%s7462_s26 + $0x68] sm:$0xff] }
 0x10a   :  { %v1030_v21 = vpop.f32.mrf.mxu0  ;;  %1816 = vmatprep.mubr.bf16.mxu0 %v5659_v63  ;;  %v1073_v26 = vpop.f32.mrf.mxu1  ;;  %1857 = vmatprep.mubr.bf16.mxu1 %v5661_v4  ;;  %v5662_v63 = vcombine.low %v6837_v27, %v6842_v28  ;;  %v5664_v5 = vcombine.low %v6849_v34, %v6854_v35  ;;  %v1246_v35 = vld [vmem:[%s7462_s26 + $0x70] sm:$0xff] }
 0x10b   :  { %v1221_v24 = vmax.f32 %v951_v16, 0.0  ;;  %v1223_v31 = vmax.f32 %v994_v20, 0.0  ;;  %v1284_v38 = vpack.c.bf16 %v1220_v23, %v1188_v6  ;;  %v1286_v43 = vpack.c.bf16 %v1222_v30, %v1190_v37  ;;  %v1262_v6 = vld [vmem:[%s7462_s26 + $0xf0] sm:$0xff]  ;;  %v1263_v37 = vld [vmem:[%s7462_s26 + $0xf8] sm:$0xff] }
 0x10c   :  { %v1032_v32 = vpop.f32.mrf.mxu0  ;;  %v1075_v10 = vpop.f32.mrf.mxu1  ;;  %v1031_v47 = vadd.f32 %v1030_v21, %v6668_v13  ;;  %v1074_v50 = vadd.f32 %v1073_v26, %v6668_v13  ;;  %v5669_v21 = vcombine.high %v1245_v0, %v1261_v1 }
 0x10d   :  { %v1285_v7 = vpack.c.bf16 %v1221_v24, %v1189_v22  ;;  %v1287_v8 = vpack.c.bf16 %v1223_v31, %v1191_v29  ;;  %v1033_v39 = vadd.f32 %v1032_v32, %v6668_v13  ;;  %v1076_v44 = vadd.f32 %v1075_v10, %v6668_v13 }
 0x10e   :  { %v1034_v25 = vpop.f32.mrf.mxu0  ;;  %v1077_v41 = vpop.f32.mrf.mxu1  ;;  %v1192_v2 = vmax.f32 %v1031_v47, 0.0  ;;  %v1194_v9 = vmax.f32 %v1074_v50, 0.0  ;;  %v6137_v47 = vld [vmem:[%s7463_s23] sm:$0xff]   ;;  %s6266_s23 = smov 96  }
 0x10f   :  { %v1035_v40 = vadd.f32 %v1034_v25, %v6670_v18  ;;  %1880 = vmatprep.subr.bf16.mxu0 %v1285_v7  ;;  %v1078_v45 = vadd.f32 %v1077_v41, %v6670_v18  ;;  %1921 = vmatprep.subr.bf16.mxu1 %v1287_v8  ;;  %v1193_v53 = vmax.f32 %v1033_v39, 0.0  ;;  %v1195_v59 = vmax.f32 %v1076_v44, 0.0 }
 0x110   :  { %1817 = vmatmul.mubr.bf16.vlgmr.msra.gmra.mxu0 %v5658_v33  ;;  %v1036_v46 = vpop.f32.mrf.mxu0  ;;  %1858 = vmatmul.mubr.bf16.vlgmr.msra.gmra.mxu1 %v5660_v36  ;;  %v1079_v49 = vpop.f32.mrf.mxu1  ;;  %v5670_v44 = vcombine.low %v1246_v35, %v1262_v6 }
 0x111   :  { %v1037_v48 = vadd.f32 %v1036_v46, %v6670_v18  ;;  %1881 = vmatpush1.bf16.xpose.msra.mxu0 %v1284_v38  ;;  %v1080_v51 = vadd.f32 %v1079_v49, %v6670_v18  ;;  %1922 = vmatpush1.bf16.xpose.msra.mxu1 %v1286_v43  ;;  %v1224_v54 = vmax.f32 %v1035_v40, 0.0  ;;  %v1226_v60 = vmax.f32 %v1078_v45, 0.0 }
 0x112   :  { %v1116_v52 = vpop.f32.mrf.mxu0  ;;  %1898 = vmatprep.mubr.bf16.mxu0 %v5663_v11  ;;  %v1159_v56 = vpop.f32.mrf.mxu1  ;;  %1939 = vmatprep.mubr.bf16.mxu1 %v5665_v42  ;;  %v5668_v11 = vcombine.low %v1245_v0, %v1261_v1  ;;  %v5671_v40 = vcombine.high %v1246_v35, %v1262_v6  ;;  %v6261_v46 = vmov 0.0  }
 0x113   :  { %v1225_v55 = vmax.f32 %v1037_v48, 0.0  ;;  %v1227_v61 = vmax.f32 %v1080_v51, 0.0  ;;  %v1288_v16 = vpack.c.bf16 %v1224_v54, %v1192_v2  ;;  %v1290_v22 = vpack.c.bf16 %v1226_v60, %v1194_v9 }
 0x114   :  { %v1118_v62 = vpop.f32.mrf.mxu0  ;;  %v1161_v4 = vpop.f32.mrf.mxu1  ;;  %v1117_v27 = vadd.f32 %v1116_v52, %v6668_v13  ;;  %v1160_v30 = vadd.f32 %v1159_v56, %v6668_v13 }
 0x115   :  { %v1289_v3 = vpack.c.bf16 %v1225_v55, %v1193_v53  ;;  %v1291_v12 = vpack.c.bf16 %v1227_v61, %v1195_v59  ;;  %v1119_v17 = vadd.f32 %v1118_v62, %v6668_v13  ;;  %v1162_v23 = vadd.f32 %v1161_v4, %v6668_v13 }
 0x116   :  { %v1120_v14 = vpop.f32.mrf.mxu0  ;;  %v1163_v20 = vpop.f32.mrf.mxu1  ;;  %v5666_v13 = vcombine.low %v1244_v57, %v1260_v58  ;;  %v1196_v8 = vmax.f32 %v1117_v27, 0.0  ;;  %v1198_v38 = vmax.f32 %v1160_v30, 0.0 }
 0x117   :  { %v1121_v19 = vadd.f32 %v1120_v14, %v6670_v18  ;;  %1962 = vmatprep.subr.bf16.mxu0 %v1289_v3  ;;  %v1164_v24 = vadd.f32 %v1163_v20, %v6670_v18  ;;  %2003 = vmatprep.subr.bf16.mxu1 %v1291_v12  ;;  %v1197_v32 = vmax.f32 %v1119_v17, 0.0  ;;  %v1199_v7 = vmax.f32 %v1162_v23, 0.0 }
 0x118   :  { %1899 = vmatmul.mubr.bf16.vlgmr.msra.gmra.mxu0 %v5662_v63  ;;  %v1122_v26 = vpop.f32.mrf.mxu0  ;;  %1940 = vmatmul.mubr.bf16.vlgmr.msra.gmra.mxu1 %v5664_v5  ;;  %v1165_v29 = vpop.f32.mrf.mxu1 }
 0x119   :  { %v1123_v28 = vadd.f32 %v1122_v26, %v6670_v18  ;;  %1963 = vmatpush1.bf16.xpose.msra.mxu0 %v1288_v16  ;;  %v1166_v31 = vadd.f32 %v1165_v29, %v6670_v18  ;;  %2004 = vmatpush1.bf16.xpose.msra.mxu1 %v1290_v22  ;;  %v1228_v33 = vmax.f32 %v1121_v19, 0.0  ;;  %v1230_v10 = vmax.f32 %v1164_v24, 0.0  ;;  %v1247_v18 = vld [vmem:[%s7462_s26 + $0x78] sm:$0xff] }
 0x11a   :  { %1980 = vmatprep.mubr.bf16.mxu0 %v5667_v15  ;;  %2021 = vmatprep.mubr.bf16.mxu1 %v5669_v21  ;;  %v5673_v42 = vcombine.high %v1247_v18, %v1263_v37  ;;  %v5672_v45 = vcombine.low %v1247_v18, %v1263_v37 }
 0x11b   :  { %v1229_v34 = vmax.f32 %v1123_v28, 0.0  ;;  %v1231_v36 = vmax.f32 %v1166_v31, 0.0  ;;  %v1292_v41 = vpack.c.bf16 %v1228_v33, %v1196_v8  ;;  %v1294_v43 = vpack.c.bf16 %v1230_v10, %v1198_v38 }
 0x11d   :  { %v1293_v25 = vpack.c.bf16 %v1229_v34, %v1197_v32  ;;  %v1295_v39 = vpack.c.bf16 %v1231_v36, %v1199_v7 }
 0x11f   :  { %2044 = vmatprep.subr.bf16.mxu0 %v1293_v25  ;;  %2085 = vmatprep.subr.bf16.mxu1 %v1295_v39 }
 0x120   :  { %1981 = vmatmul.mubr.bf16.vlgmr.msra.gmra.mxu0 %v5666_v13  ;;  %2022 = vmatmul.mubr.bf16.vlgmr.msra.gmra.mxu1 %v5668_v11 }
 0x121   :  { %2045 = vmatpush1.bf16.xpose.msra.mxu0 %v1292_v41  ;;  %2086 = vmatpush1.bf16.xpose.msra.mxu1 %v1294_v43 }
 0x122   :  { %2062 = vmatprep.mubr.bf16.mxu0 %v5671_v40  ;;  %2103 = vmatprep.mubr.bf16.mxu1 %v5673_v42 }
 0x123   :  { %5864 = vmatprep.subr.bf16.mxu0 %v6261_v46  ;;  %5870 = vmatprep.subr.bf16.mxu1 %v6261_v46 }
 0x128   :  { %2063 = vmatmul.mubr.bf16.vlgmr.msra.gmra.mxu0 %v5670_v44  ;;  %2104 = vmatmul.mubr.bf16.vlgmr.msra.gmra.mxu1 %v5672_v45 }
 0x129   :  { %5865 = vmatpush3.bf16.msra.mxu0 %v6137_v47  ;;  %5866 = vmatprep.mubr.msk.bf16.mxu0 %vm6262_vm1, %v6261_v46 }
 0x12a   :  { %5874 = vmatprep.mubr.msk.bf16.mxu1 %vm6262_vm1, %v6261_v46  ;;  %5878 = vmatprep.subr.mxu0 %v6261_v46 }
 0x1af   :  { %v1490_v48 = vpop.f32.mrf.mxu0 }
 0x1b0   :  { %v1531_v49 = vpop.f32.mrf.mxu1 }
 0x1b1   :  { %v1492_v50 = vpop.f32.mrf.mxu0  ;;  %v1532_v5 = vadd.f32 %v1531_v49, %v1490_v48 }
 0x1b2   :  { %v1533_v51 = vpop.f32.mrf.mxu1 }
 0x1b3   :  { %v1493_v52 = vpop.f32.mrf.mxu0 }
 0x1b4   :  { %v1534_v53 = vpop.f32.mrf.mxu1 }
 0x1b5   :  { %v1495_v54 = vpop.f32.mrf.mxu0  ;;  %v1535_v14 = vadd.f32 %v1534_v53, %v1493_v52 }
 0x1b6   :  { %v1536_v55 = vpop.f32.mrf.mxu1 }
 0x1b8   :  { %v1572_v56 = vpop.f32.mrf.mxu0  ;;  %v1613_v57 = vpop.f32.mrf.mxu1 }
 0x1b9   :  { %v1573_v15 = vadd.f32 %v1572_v56, %v1532_v5 }
 0x1ba   :  { %v1574_v58 = vpop.f32.mrf.mxu0  ;;  %v1615_v59 = vpop.f32.mrf.mxu1 }
 0x1bb   :  { %v1614_v22 = vadd.f32 %v1613_v57, %v1573_v15 }
 0x1bc   :  { %v1575_v60 = vpop.f32.mrf.mxu0  ;;  %v1616_v61 = vpop.f32.mrf.mxu1 }
 0x1bd   :  { %v1576_v19 = vadd.f32 %v1575_v60, %v1535_v14 }
 0x1be   :  { %v1577_v62 = vpop.f32.mrf.mxu0  ;;  %v1618_v63 = vpop.f32.mrf.mxu1 }
 0x1bf   :  { %v1617_v26 = vadd.f32 %v1616_v61, %v1576_v19 }
 0x1c0   :  { %v1654_v0 = vpop.f32.mrf.mxu0  ;;  %v1695_v1 = vpop.f32.mrf.mxu1 }
 0x1c1   :  { %v1655_v27 = vadd.f32 %v1654_v0, %v1614_v22 }
 0x1c2   :  { %v1656_v2 = vpop.f32.mrf.mxu0  ;;  %v1697_v3 = vpop.f32.mrf.mxu1 }
 0x1c3   :  { %v1696_v33 = vadd.f32 %v1695_v1, %v1655_v27 }
 0x1c4   :  { %v1657_v4 = vpop.f32.mrf.mxu0  ;;  %v1698_v9 = vpop.f32.mrf.mxu1 }
 0x1c5   :  { %v1658_v30 = vadd.f32 %v1657_v4, %v1617_v26 }
 0x1c6   :  { %v1659_v12 = vpop.f32.mrf.mxu0  ;;  %v1700_v16 = vpop.f32.mrf.mxu1 }
 0x1c7   :  { %v1699_v6 = vadd.f32 %v1698_v9, %v1658_v30 }
 0x1c8   :  { %v1736_v17 = vpop.f32.mrf.mxu0  ;;  %v1777_v20 = vpop.f32.mrf.mxu1 }
 0x1c9   :  { %v1737_v7 = vadd.f32 %v1736_v17, %v1696_v33 }
 0x1ca   :  { %v1738_v21 = vpop.f32.mrf.mxu0  ;;  %v1779_v23 = vpop.f32.mrf.mxu1 }
 0x1cb   :  { %v1778_v8 = vadd.f32 %v1777_v20, %v1737_v7  ;;  %v5674_v23 = vld [vmem:[%s7464_s24] ss:$0 sm:$0xff] }
 0x1cc   :  { %v1739_v24 = vpop.f32.mrf.mxu0  ;;  %v1780_v28 = vpop.f32.mrf.mxu1 }
 0x1cd   :  { %v1740_v13 = vadd.f32 %v1739_v24, %v1699_v6 }
 0x1ce   :  { %v1741_v29 = vpop.f32.mrf.mxu0  ;;  %v1782_v31 = vpop.f32.mrf.mxu1 }
 0x1cf   :  { %v1781_v38 = vadd.f32 %v1780_v28, %v1740_v13 }
 0x1d0   :  { %v1818_v32 = vpop.f32.mrf.mxu0  ;;  %v1859_v34 = vpop.f32.mrf.mxu1 }
 0x1d1   :  { %v1819_v39 = vadd.f32 %v1818_v32, %v1778_v8  ;;  %v6138_v8 = vld [vmem:[%s7434_s8 + $0x8] sm:$0xff]  }
 0x1d2   :  { %v1820_v35 = vpop.f32.mrf.mxu0  ;;  %v1861_v10 = vpop.f32.mrf.mxu1  ;;  %5871 = vmatpush3.bf16.msra.mxu1 %v6138_v8 }
 0x1d3   :  { %v1860_v45 = vadd.f32 %v1859_v34, %v1819_v39  ;;  %5872 = vmatprep.subr.bf16.mxu1 %v6261_v46 }
 0x1d4   :  { %v1821_v36 = vpop.f32.mrf.mxu0  ;;  %v1862_v18 = vpop.f32.mrf.mxu1 }
 0x1d5   :  { %v1822_v42 = vadd.f32 %v1821_v36, %v1781_v38 }
 0x1d6   :  { %v1823_v37 = vpop.f32.mrf.mxu0  ;;  %v1864_v25 = vpop.f32.mrf.mxu1 }
 0x1d7   :  { %v1863_v49 = vadd.f32 %v1862_v18, %v1822_v42  ;;  %v6139_v25 = vld [vmem:[%s7434_s8] sm:$0xff]  }
 0x1d8   :  { %v1900_v11 = vpop.f32.mrf.mxu0  ;;  %v1941_v40 = vpop.f32.mrf.mxu1  ;;  %5873 = vmatpush3.bf16.msra.mxu1 %v6139_v25 }
 0x1d9   :  { %v1901_v50 = vadd.f32 %v1900_v11, %v1860_v45  ;;  %5883 = vmatprep.subr.mxu1 %v6261_v46  ;;  %v5677_v45 = vld [vmem:[%s7465_s28] ss:$0 sm:$0xff] }
 0x1da   :  { %v1902_v41 = vpop.f32.mrf.mxu0  ;;  %v1943_v43 = vpop.f32.mrf.mxu1 }
 0x1db   :  { %v1942_v56 = vadd.f32 %v1941_v40, %v1901_v50  ;;  %v5678_v50 = vld [vmem:[%s7433_s7] ss:$0 sm:$0xff]  ;;  %s6264_s7 = smov 112  }
 0x1dc   :  { %v1903_v44 = vpop.f32.mrf.mxu0  ;;  %v1944_v47 = vpop.f32.mrf.mxu1 }
 0x1dd   :  { %v1904_v53 = vadd.f32 %v1903_v44, %v1863_v49 }
 0x1de   :  { %v1905_v48 = vpop.f32.mrf.mxu0  ;;  %v1946_v51 = vpop.f32.mrf.mxu1 }
 0x1df   :  { %v1945_v59 = vadd.f32 %v1944_v47, %v1904_v53 }
 0x1e0   :  { %v1982_v52 = vpop.f32.mrf.mxu0  ;;  %v2023_v54 = vpop.f32.mrf.mxu1 }
 0x1e1   :  { %v1983_v60 = vadd.f32 %v1982_v52, %v1942_v56 }
 0x1e2   :  { %v1984_v55 = vpop.f32.mrf.mxu0  ;;  %v2025_v57 = vpop.f32.mrf.mxu1 }
 0x1e3   :  { %v2024_v2 = vadd.f32 %v2023_v54, %v1983_v60  ;;  %v5679_v55 = vld [vmem:[%s7435_s9] ss:$0 sm:$0xff]  ;;  %s6265_s9 = smov 104  }
 0x1e4   :  { %v1985_v58 = vpop.f32.mrf.mxu0  ;;  %v2026_v61 = vpop.f32.mrf.mxu1 }
 0x1e5   :  { %v1986_v63 = vadd.f32 %v1985_v58, %v1945_v59 }
 0x1e6   :  { %v1987_v62 = vpop.f32.mrf.mxu0  ;;  %v2028_v0 = vpop.f32.mrf.mxu1 }
 0x1e7   :  { %v2027_v5 = vadd.f32 %v2026_v61, %v1986_v63 }
 0x1e8   :  { %v2064_v1 = vpop.f32.mrf.mxu0  ;;  %v2105_v3 = vpop.f32.mrf.mxu1 }
 0x1e9   :  { %v2065_v9 = vadd.f32 %v2064_v1, %v2024_v2 }
 0x1ea   :  { %v2066_v4 = vpop.f32.mrf.mxu0  ;;  %v2107_v12 = vpop.f32.mrf.mxu1 }
 0x1eb   :  { %v2106_v19 = vadd.f32 %v2105_v3, %v2065_v9 }
 0x1ec   :  { %v2067_v14 = vpop.f32.mrf.mxu0  ;;  %v2108_v16 = vpop.f32.mrf.mxu1 }
 0x1ed   :  { %v2068_v15 = vadd.f32 %v2067_v14, %v2027_v5 }
 0x1ee   :  { %v2069_v17 = vpop.f32.mrf.mxu0  ;;  %v2110_v21 = vpop.f32.mrf.mxu1 }
 0x1ef   :  { %v2109_v20 = vadd.f32 %v2108_v16, %v2068_v15 }
 0x1f1   :  { %v2112_v22 = vpack.c.bf16 %v2109_v20, %v2106_v19 }
 0x1f3   :  { %5867 = vmatmul.mubr.msk.bf16.vlgmr.msra.gmra.mxu0 %vm2128_vm2, %v2112_v22 }
 0x1f4   :  { %5880 = vmatprep.mubr.msk.f32.mxu0 %vm6262_vm1, %v6261_v46 }
 0x2b3   :  { %v2166_v24 = vpop.f32.mrf.mxu0 }
 0x2b4   :  { %v2167_v26 = vadd.f32 %v5674_v23, %v2166_v24 }
 0x2b5   :  { %v5868_v27 = vpop.f32.mrf.mxu0 }
 0x2b6   :  { %v2175_v28 = vsel %vm476_vm0, %v2167_v26, 0.0 }
 0x2b7   :  { %2176 = vadd.xlane.f32.xlu1 %v2175_v28  ;;  %v2169_v29 = vpop.f32.mrf.mxu0 }
 0x2b8   :  { %v2170_v30 = vadd.f32 %v5674_v23, %v2169_v29 }
 0x2b9   :  { %v5869_v31 = vpop.f32.mrf.mxu0 }
 0x2ba   :  { %v2178_v32 = vsel %vm476_vm0, %v2170_v30, 0.0 }
 0x2bb   :  { %2179 = vadd.xlane.f32.xlu1 %v2178_v32 }
 0x340   :  { %v2177_v33 = vpop.xlane.xlu1 %2176 }
 0x341   :  { %v2182_v34 = vmul.f32 0.03125, %v2177_v33 }
 0x343   :  { %v2184_v35 = vsub.f32 %v2167_v26, %v2182_v34 }
 0x344   :  { %v2180_v6 = vpop.xlane.xlu1 %2179 }
 0x345   :  { %v2183_v7 = vmul.f32 0.03125, %v2180_v6  ;;  %v2186_v10 = vmul.f32 %v2184_v35, %v2184_v35 }
 0x347   :  { %v2185_v36 = vsub.f32 %v2170_v30, %v2183_v7  ;;  %v2188_v13 = vsel %vm476_vm0, %v2186_v10, 0.0 }
 0x348   :  { %2189 = vadd.xlane.f32.xlu0 %v2188_v13 }
 0x349   :  { %v2187_v18 = vmul.f32 %v2185_v36, %v2185_v36 }
 0x34b   :  { %v2191_v37 = vsel %vm476_vm0, %v2187_v18, 0.0 }
 0x34c   :  { %2192 = vadd.xlane.f32.xlu1 %v2191_v37 }
 0x3d1   :  { %v2190_v11 = vpop.xlane.xlu0 %2189 }
 0x3d2   :  { %v2194_v38 = vmul.f32 0.03125, %v2190_v11 }
 0x3d4   :  { %v2196_v39 = vadd.f32 1e-05, %v2194_v38 }
 0x3d5   :  { %v2193_v40 = vpop.xlane.xlu1 %2192 }
 0x3d6   :  { %6162 = vrsqrt.f32 %v2196_v39  ;;  %v2195_v41 = vmul.f32 0.03125, %v2193_v40 }
 0x3d8   :  { %v2197_v42 = vadd.f32 1e-05, %v2195_v41 }
 0x3da   :  { %6164 = vrsqrt.f32 %v2197_v42 }
 0x3e3   :  { %v6163_v43 = vpop.eup %6162 }
 0x3e4   :  { %v2200_v44 = vmul.f32 %v6163_v43, %v2184_v35 }
 0x3e6   :  { %v2208_v49 = vmul.f32 %v5677_v45, %v2200_v44 }
 0x3e7   :  { %v6165_v47 = vpop.eup %6164 }
 0x3e8   :  { %v2201_v48 = vmul.f32 %v6165_v47, %v2185_v36  ;;  %v2216_v52 = vadd.f32 %v5678_v50, %v2208_v49 }
 0x3ea   :  { %v2209_v51 = vmul.f32 %v5677_v45, %v2201_v48 }
 0x3ec   :  { %v2217_v53 = vadd.f32 %v5678_v50, %v2209_v51 }
 0x3ee   :  { %v2230_v54 = vpack.c.bf16 %v2217_v53, %v2216_v52 }
 0x3f0   :  { %5875 = vmatmul.mubr.msk.bf16.vlgmr.msra.gmra.mxu1 %vm476_vm0, %v2230_v54 }
 0x3f1   :  { %5885 = vmatprep.mubr.msk.f32.mxu1 %vm6262_vm1, %v6261_v46 }
 0x4b0   :  { %v2286_v56 = vpop.f32.mrf.mxu1 }
 0x4b1   :  { %v6946_v57 = vadd.f32 %v5679_v55, %v2286_v56 }
 0x4b2   :  { %v5876_v58 = vpop.f32.mrf.mxu1 }
 0x4b3   :  { %2294 = vrot.lane.b32.xlu1 %v6946_v57, %s6263_s0 }
 0x4b4   :  { %v2289_v59 = vpop.f32.mrf.mxu1 }
 0x4b5   :  { %v6950_v60 = vadd.f32 %v5679_v55, %v2289_v59 }
 0x4b6   :  { %v5877_v61 = vpop.f32.mrf.mxu1 }
 0x4b7   :  { %2296 = vrot.lane.b32.xlu1 %v6946_v57, %s6264_s7  ;;  %2303 = vrot.lane.b32.xlu0 %v6950_v60, %s6264_s7 }
 0x4bb   :  { %2298 = vrot.lane.b32.xlu1 %v6946_v57, %s6265_s9  ;;  %2612 = vrot.lane.b32.xlu0 %v6950_v60, %s6266_s23 }
 0x4bf   :  { %2301 = vrot.lane.b32.xlu1 %v6950_v60, %s6263_s0 }
 0x4c3   :  { %2305 = vrot.lane.b32.xlu1 %v6950_v60, %s6265_s9 }
 0x4c7   :  { %2307 = vrot.lane.b32.xlu1 %v6946_v57, %s6266_s23 }
 0x525   :  { %v6966_v62 = vpop.permute.xlu1 %2294 }
 0x526   :  { %2384 = vrot.lane.b32.xlu1 %v6966_v62, %s6266_s23 }
 0x529   :  { %v6970_v63 = vpop.permute.xlu1 %2296  ;;  %v6972_v0 = vpop.permute.xlu0 %2303 }
 0x52a   :  { %2764 = vrot.lane.b32.xlu0 %v6972_v0, %s6266_s23  ;;  %2460 = vrot.lane.b32.xlu1 %v6970_v63, %s6266_s23 }
 0x52d   :  { %v6978_v1 = vpop.permute.xlu1 %2298  ;;  %v2613_v12 = vpop.permute.xlu0 %2612 }
 0x52e   :  { %2536 = vrot.lane.b32.xlu1 %v6978_v1, %s6266_s23 }
 0x531   :  { %v6982_v2 = vpop.permute.xlu1 %2301 }
 0x532   :  { %2688 = vrot.lane.b32.xlu1 %v6982_v2, %s6266_s23 }
 0x535   :  { %v6986_v3 = vpop.permute.xlu1 %2305 }
 0x536   :  { %2840 = vrot.lane.b32.xlu1 %v6986_v3, %s6266_s23 }
 0x539   :  { %v2308_v4 = vpop.permute.xlu1 %2307 }
 0x53a   :  { %5879 = vmatpush3.xpose.msk.msra.mxu0 %vm2309_vm3, %v2308_v4 }
 0x53b   :  { %5888 = vmatprep.subr.mxu0 %v6261_v46 }
 0x53d   :  { %5881 = vmatmul.mubr.msk.f32.vlgmr.msra.gmra.mxu0 %vm2309_vm3, %v6946_v57 }
 0x53e   :  { %5890 = vmatprep.mubr.msk.f32.mxu0 %vm6262_vm1, %v6261_v46 }
 0x598   :  { %v2385_v5 = vpop.permute.xlu1 %2384 }
 0x599   :  { %5884 = vmatpush3.xpose.msk.msra.mxu1 %vm2309_vm3, %v2385_v5 }
 0x59a   :  { %5893 = vmatprep.subr.mxu1 %v6261_v46 }
 0x59c   :  { %5886 = vmatmul.mubr.msk.f32.vlgmr.msra.gmra.mxu1 %vm2309_vm3, %v6966_v62  ;;  %v2461_v9 = vpop.permute.xlu1 %2460  ;;  %v2765_v15 = vpop.permute.xlu0 %2764 }
 0x59d   :  { %5889 = vmatpush3.xpose.msk.msra.mxu0 %vm2309_vm3, %v2461_v9  ;;  %5895 = vmatprep.mubr.msk.f32.mxu1 %vm6262_vm1, %v6261_v46 }
 0x59e   :  { %5898 = vmatprep.subr.mxu0 %v6261_v46 }
 0x5a0   :  { %5891 = vmatmul.mubr.msk.f32.vlgmr.msra.gmra.mxu0 %vm2309_vm3, %v6970_v63  ;;  %v2537_v14 = vpop.permute.xlu1 %2536 }
 0x5a1   :  { %5894 = vmatpush3.xpose.msk.msra.mxu1 %vm2309_vm3, %v2537_v14  ;;  %5899 = vmatpush3.xpose.msk.msra.mxu0 %vm2309_vm3, %v2613_v12 }
 0x5a2   :  { %5900 = vmatprep.mubr.msk.f32.mxu0 %vm6262_vm1, %v6261_v46  ;;  %5903 = vmatprep.subr.mxu1 %v6261_v46 }
 0x5a3   :  { %5908 = vmatprep.subr.mxu0 %v6261_v46 }
 0x5a4   :  { %5896 = vmatmul.mubr.msk.f32.vlgmr.msra.gmra.mxu1 %vm2309_vm3, %v6978_v1  ;;  %5901 = vmatmul.mubr.msk.f32.vlgmr.msra.gmra.mxu0 %vm2309_vm3, %v6950_v60  ;;  %v2689_v16 = vpop.permute.xlu1 %2688 }
 0x5a5   :  { %5904 = vmatpush3.xpose.msk.msra.mxu1 %vm2309_vm3, %v2689_v16  ;;  %5909 = vmatpush3.xpose.msk.msra.mxu0 %vm2309_vm3, %v2765_v15 }
 0x5a6   :  { %5905 = vmatprep.mubr.msk.f32.mxu1 %vm6262_vm1, %v6261_v46  ;;  %5910 = vmatprep.mubr.msk.f32.mxu0 %vm6262_vm1, %v6261_v46 }
 0x5a7   :  { %5913 = vmatprep.subr.mxu1 %v6261_v46  ;;  %5918 = vmatprep.subr.mxu0 %v6261_v46 }
 0x5a8   :  { %5906 = vmatmul.mubr.msk.f32.vlgmr.msra.gmra.mxu1 %vm2309_vm3, %v6982_v2  ;;  %5911 = vmatmul.mubr.msk.f32.vlgmr.msra.gmra.mxu0 %vm2309_vm3, %v6972_v0  ;;  %v2841_v17 = vpop.permute.xlu1 %2840 }
 0x5a9   :  { %5914 = vmatpush3.xpose.msk.msra.mxu1 %vm2309_vm3, %v2841_v17  ;;  %5915 = vmatprep.mubr.msk.f32.mxu1 %vm6262_vm1, %v6261_v46 }
 0x5aa   :  { %5923 = vmatprep.subr.mxu1 %v6261_v46  ;;  %5920 = vmatprep.mubr.msk.f32.mxu0 %vm6262_vm1, %v6261_v46 }
 0x5ac   :  { %5916 = vmatmul.mubr.msk.f32.vlgmr.msra.gmra.mxu1 %vm2309_vm3, %v6986_v3 }
 0x5ad   :  { %5925 = vmatprep.mubr.msk.f32.mxu1 %vm6262_vm1, %v6261_v46 }
 0x5fd   :  { %v2380_v19 = vpop.f32.mrf.mxu0 }
 0x5fe   :  { %v2916_v20 = vmul.f32 0.35355338, %v2380_v19 }
 0x5ff   :  { %v5882_v21 = vpop.f32.mrf.mxu0 }
 0x600   :  { %v2924_v22 = vsel %vm2309_vm3, %v2916_v20, -inf }
 0x601   :  { %2925 = vmax.xlane.f32.xlu0 %v2924_v22 }
 0x65c   :  { %v2456_v23 = vpop.f32.mrf.mxu1 }
 0x65d   :  { %v2917_v24 = vmul.f32 0.35355338, %v2456_v23 }
 0x65e   :  { %v5887_v26 = vpop.f32.mrf.mxu1 }
 0x65f   :  { %v2927_v27 = vsel %vm2309_vm3, %v2917_v24, -inf }
 0x660   :  { %2928 = vmax.xlane.f32.xlu1 %v2927_v27  ;;  %v2532_v28 = vpop.f32.mrf.mxu0 }
 0x661   :  { %v2918_v29 = vmul.f32 0.35355338, %v2532_v28 }
 0x662   :  { %v5892_v30 = vpop.f32.mrf.mxu0 }
 0x663   :  { %v2930_v31 = vsel %vm2309_vm3, %v2918_v29, -inf }
 0x664   :  { %v2608_v32 = vpop.f32.mrf.mxu1  ;;  %2931 = vmax.xlane.f32.xlu0 %v2930_v31  ;;  %v2684_v33 = vpop.f32.mrf.mxu0 }
 0x665   :  { %v2919_v34 = vmul.f32 0.35355338, %v2608_v32  ;;  %v2920_v35 = vmul.f32 0.35355338, %v2684_v33 }
 0x666   :  { %v5897_v6 = vpop.f32.mrf.mxu1  ;;  %v5902_v7 = vpop.f32.mrf.mxu0 }
 0x667   :  { %v2933_v10 = vsel %vm2309_vm3, %v2919_v34, -inf  ;;  %v2936_v36 = vsel %vm2309_vm3, %v2920_v35, -inf }
 0x668   :  { %v2760_v13 = vpop.f32.mrf.mxu1  ;;  %2934 = vmax.xlane.f32.xlu0 %v2933_v10  ;;  %2937 = vmax.xlane.f32.xlu1 %v2936_v36  ;;  %v2836_v18 = vpop.f32.mrf.mxu0 }
 0x669   :  { %v2921_v37 = vmul.f32 0.35355338, %v2760_v13  ;;  %v2922_v8 = vmul.f32 0.35355338, %v2836_v18 }
 0x66a   :  { %v5907_v25 = vpop.f32.mrf.mxu1  ;;  %v5912_v11 = vpop.f32.mrf.mxu0 }
 0x66b   :  { %v2939_v38 = vsel %vm2309_vm3, %v2921_v37, -inf  ;;  %v2942_v39 = vsel %vm2309_vm3, %v2922_v8, -inf }
 0x66c   :  { %v2912_v40 = vpop.f32.mrf.mxu1  ;;  %2940 = vmax.xlane.f32.xlu0 %v2939_v38  ;;  %2943 = vmax.xlane.f32.xlu1 %v2942_v39 }
 0x66d   :  { %v2923_v41 = vmul.f32 0.35355338, %v2912_v40 }
 0x66e   :  { %v5917_v42 = vpop.f32.mrf.mxu1 }
 0x66f   :  { %v2945_v43 = vsel %vm2309_vm3, %v2923_v41, -inf }
 0x670   :  { %2946 = vmax.xlane.f32.xlu0 %v2945_v43 }
 0x67d   :  { %3012 = vrot.lane.b32.xlu1 %v6946_v57, %s6267_s1 }
 0x681   :  { %3164 = vrot.lane.b32.xlu1 %v6970_v63, %s6267_s1 }
 0x685   :  { %3240 = vrot.lane.b32.xlu1 %v6978_v1, %s6267_s1 }
 0x686   :  { %3088 = vrot.lane.b32.xlu0 %v6966_v62, %s6267_s1 }
 0x689   :  { %3392 = vrot.lane.b32.xlu1 %v6982_v2, %s6267_s1 }
 0x68a   :  { %3316 = vrot.lane.b32.xlu0 %v6950_v60, %s6267_s1  ;;  %v2926_v44 = vpop.xlane.xlu0 %2925 }
 0x68b   :  { %v2948_v45 = vsub.f32 %v2916_v20, %v2926_v44 }
 0x68d   :  { %v2956_v47 = vmul.f32 1.442695, %v2948_v45 }
 0x68f   :  { %6166 = vpow2.f32 %v2956_v47 }
 0x69c   :  { %v7058_v48 = vpop.eup %6166 }
 0x69d   :  { %v2972_v49 = vsel %vm2309_vm3, %v7058_v48, 0.0 }
 0x6ad   :  { %2973 = vadd.xlane.f32.xlu1 %v2972_v49 }
 0x6e9   :  { %v2929_v50 = vpop.xlane.xlu1 %2928 }
 0x6ea   :  { %v2949_v51 = vsub.f32 %v2917_v24, %v2929_v50 }
 0x6ec   :  { %v2958_v52 = vmul.f32 1.442695, %v2949_v51 }
 0x6ed   :  { %v2932_v53 = vpop.xlane.xlu0 %2931 }
 0x6ee   :  { %6168 = vpow2.f32 %v2958_v52  ;;  %v2950_v54 = vsub.f32 %v2918_v29, %v2932_v53 }
 0x6f0   :  { %v2960_v55 = vmul.f32 1.442695, %v2950_v54 }
 0x6f1   :  { %v2935_v56 = vpop.xlane.xlu0 %2934  ;;  %v2938_v57 = vpop.xlane.xlu1 %2937 }
 0x6f2   :  { %6170 = vpow2.f32 %v2960_v55  ;;  %v2951_v58 = vsub.f32 %v2919_v34, %v2935_v56  ;;  %v2952_v59 = vsub.f32 %v2920_v35, %v2938_v57 }
 0x6f4   :  { %v2962_v60 = vmul.f32 1.442695, %v2951_v58  ;;  %v2964_v61 = vmul.f32 1.442695, %v2952_v59  ;;  %v6140_v59 = vld [vmem:[%s7436_s10 + $0x8] sm:$0xff]  }
 0x6f5   :  { %v2941_v62 = vpop.xlane.xlu0 %2940  ;;  %v2944_v63 = vpop.xlane.xlu1 %2943 }
 0x6f6   :  { %6172 = vpow2.f32 %v2962_v60  ;;  %v2953_v1 = vsub.f32 %v2921_v37, %v2941_v62  ;;  %v2954_v2 = vsub.f32 %v2922_v8, %v2944_v63  ;;  %v6141_v62 = vld [vmem:[%s7436_s10] sm:$0xff]   ;;  %s6270_s10 = smov 24  }
 0x6f7   :  { %6174 = vpow2.f32 %v2964_v61 }
 0x6f8   :  { %v2966_v4 = vmul.f32 1.442695, %v2953_v1  ;;  %v2968_v5 = vmul.f32 1.442695, %v2954_v2 }
 0x6f9   :  { %v2947_v9 = vpop.xlane.xlu0 %2946  ;;  %v3013_v12 = vpop.permute.xlu1 %3012 }
 0x6fa   :  { %6176 = vpow2.f32 %v2966_v4  ;;  %v2955_v14 = vsub.f32 %v2923_v41, %v2947_v9  ;;  %5919 = vmatpush3.msra.mxu0 %v3013_v12 }
 0x6fb   :  { %v6169_v15 = vpop.eup %6168  ;;  %6178 = vpow2.f32 %v2968_v5  ;;  %5928 = vmatprep.subr.mxu0 %v6261_v46 }
 0x6fc   :  { %v2970_v16 = vmul.f32 1.442695, %v2955_v14  ;;  %v2975_v17 = vsel %vm2309_vm3, %v6169_v15, 0.0 }
 0x6fd   :  { %2976 = vadd.xlane.f32.xlu0 %v2975_v17  ;;  %v3089_v19 = vpop.permute.xlu0 %3088  ;;  %v3165_v33 = vpop.permute.xlu1 %3164 }
 0x6fe   :  { %6180 = vpow2.f32 %v2970_v16  ;;  %5924 = vmatpush3.msra.mxu1 %v3089_v19 }
 0x6ff   :  { %v6171_v20 = vpop.eup %6170  ;;  %5933 = vmatprep.subr.mxu1 %v6261_v46 }
 0x700   :  { %v2978_v21 = vsel %vm2309_vm3, %v6171_v20, 0.0 }
 0x701   :  { %2979 = vadd.xlane.f32.xlu1 %v2978_v21  ;;  %v3241_v34 = vpop.permute.xlu1 %3240 }
 0x703   :  { %v6173_v22 = vpop.eup %6172 }
 0x704   :  { %v6175_v23 = vpop.eup %6174  ;;  %v2981_v24 = vsel %vm2309_vm3, %v6173_v22, 0.0 }
 0x705   :  { %2982 = vadd.xlane.f32.xlu0 %v2981_v24  ;;  %v2984_v26 = vsel %vm2309_vm3, %v6175_v23, 0.0  ;;  %v3393_v35 = vpop.permute.xlu1 %3392 }
 0x706   :  { %2985 = vadd.xlane.f32.xlu1 %v2984_v26 }
 0x707   :  { %v6177_v27 = vpop.eup %6176 }
 0x708   :  { %v7068_v28 = vpop.eup %6178  ;;  %v2987_v29 = vsel %vm2309_vm3, %v6177_v27, 0.0 }
 0x709   :  { %2988 = vadd.xlane.f32.xlu0 %v2987_v29  ;;  %v2990_v30 = vsel %vm2309_vm3, %v7068_v28, 0.0 }
 0x70a   :  { %2991 = vadd.xlane.f32.xlu1 %v2990_v30 }
 0x70b   :  { %v7073_v31 = vpop.eup %6180 }
 0x70c   :  { %v2993_v32 = vsel %vm2309_vm3, %v7073_v31, 0.0 }
 0x70d   :  { %2994 = vadd.xlane.f32.xlu0 %v2993_v32 }
 0x71b   :  { %3544 = vrot.lane.b32.xlu1 %v6986_v3, %s6267_s1  ;;  %v3317_v3 = vpop.permute.xlu0 %3316 }
 0x723   :  { %3468 = vrot.lane.b32.xlu0 %v6972_v0, %s6267_s1 }
 0x736   :  { %v2974_v6 = vpop.xlane.xlu1 %2973 }
 0x737   :  { %6182 = vrcp.f32 %v2974_v6 }
 0x744   :  { %v6183_v7 = vpop.eup %6182 }
 0x745   :  { %v3004_v10 = vmul.f32 %v6183_v7, %v7058_v48  ;;  %v5707_v7 = vld [vmem:[%s7437_s11] ss:$0 sm:$0xff] }
 0x747   :  { %5921 = vmatmul.mubr.msk.f32.vlgmr.msra.gmra.mxu0 %vm2309_vm3, %v3004_v10 }
 0x748   :  { %5929 = vmatpush3.msra.mxu0 %v3165_v33  ;;  %5930 = vmatprep.mubr.msk.f32.mxu0 %vm6262_vm1, %v6261_v46 }
 0x749   :  { %5938 = vmatprep.subr.mxu0 %v6261_v46 }
 0x786   :  { %v2977_v36 = vpop.xlane.xlu0 %2976 }
 0x787   :  { %6184 = vrcp.f32 %v2977_v36 }
 0x78a   :  { %v2980_v0 = vpop.xlane.xlu1 %2979 }
 0x78b   :  { %6186 = vrcp.f32 %v2980_v0 }
 0x78e   :  { %v2983_v13 = vpop.xlane.xlu0 %2982 }
 0x78f   :  { %6188 = vrcp.f32 %v2983_v13  ;;  %v2986_v18 = vpop.xlane.xlu1 %2985 }
 0x790   :  { %6190 = vrcp.f32 %v2986_v18 }
 0x792   :  { %v2989_v37 = vpop.xlane.xlu0 %2988 }
 0x793   :  { %6192 = vrcp.f32 %v2989_v37  ;;  %v2992_v8 = vpop.xlane.xlu1 %2991 }
 0x794   :  { %v6185_v25 = vpop.eup %6184  ;;  %6194 = vrcp.f32 %v2992_v8 }
 0x795   :  { %v3005_v11 = vmul.f32 %v6185_v25, %v6169_v15 }
 0x796   :  { %v2995_v38 = vpop.xlane.xlu0 %2994 }
 0x797   :  { %6196 = vrcp.f32 %v2995_v38  ;;  %5926 = vmatmul.mubr.msk.f32.vlgmr.msra.gmra.mxu1 %vm2309_vm3, %v3005_v11  ;;  %v3545_v51 = vpop.permute.xlu1 %3544 }
 0x798   :  { %v6187_v39 = vpop.eup %6186  ;;  %5934 = vmatpush3.msra.mxu1 %v3241_v34  ;;  %5935 = vmatprep.mubr.msk.f32.mxu1 %vm6262_vm1, %v6261_v46 }
 0x799   :  { %v3006_v40 = vmul.f32 %v6187_v39, %v6171_v20  ;;  %5943 = vmatprep.subr.mxu1 %v6261_v46 }
 0x79a   :  { %v3469_v47 = vpop.permute.xlu0 %3468 }
 0x79b   :  { %5931 = vmatmul.mubr.msk.f32.vlgmr.msra.gmra.mxu0 %vm2309_vm3, %v3006_v40 }
 0x79c   :  { %v6189_v41 = vpop.eup %6188  ;;  %5939 = vmatpush3.msra.mxu0 %v3317_v3  ;;  %5940 = vmatprep.mubr.msk.f32.mxu0 %vm6262_vm1, %v6261_v46 }
 0x79d   :  { %v6191_v42 = vpop.eup %6190  ;;  %5948 = vmatprep.subr.mxu0 %v6261_v46  ;;  %v3007_v43 = vmul.f32 %v6189_v41, %v6173_v22 }
 0x79e   :  { %v3008_v44 = vmul.f32 %v6191_v42, %v6175_v23 }
 0x79f   :  { %5936 = vmatmul.mubr.msk.f32.vlgmr.msra.gmra.mxu1 %vm2309_vm3, %v3007_v43 }
 0x7a0   :  { %v6193_v45 = vpop.eup %6192  ;;  %5941 = vmatmul.mubr.msk.f32.vlgmr.msra.gmra.mxu0 %vm2309_vm3, %v3008_v44  ;;  %5944 = vmatpush3.msra.mxu1 %v3393_v35 }
 0x7a1   :  { %v6195_v48 = vpop.eup %6194  ;;  %5949 = vmatpush3.msra.mxu0 %v3469_v47  ;;  %5945 = vmatprep.mubr.msk.f32.mxu1 %vm6262_vm1, %v6261_v46  ;;  %v3009_v49 = vmul.f32 %v6193_v45, %v6177_v27  ;;  %v6142_v47 = vld [vmem:[%s7440_s14 + $0x8] sm:$0xff]  }
 0x7a2   :  { %5950 = vmatprep.mubr.msk.f32.mxu0 %vm6262_vm1, %v6261_v46  ;;  %5953 = vmatprep.subr.mxu1 %v6261_v46  ;;  %v3010_v50 = vmul.f32 %v6195_v48, %v7068_v28  ;;  %v6143_v48 = vld [vmem:[%s7440_s14] sm:$0xff]  }
 0x7a3   :  { %5946 = vmatmul.mubr.msk.f32.vlgmr.msra.gmra.mxu1 %vm2309_vm3, %v3009_v49  ;;  %5958 = vmatprep.subr.bf16.mxu0 %v6261_v46 }
 0x7a4   :  { %v6197_v52 = vpop.eup %6196  ;;  %5951 = vmatmul.mubr.msk.f32.vlgmr.msra.gmra.mxu0 %vm2309_vm3, %v3010_v50  ;;  %5954 = vmatpush3.msra.mxu1 %v3545_v51 }
 0x7a5   :  { %5955 = vmatprep.mubr.msk.f32.mxu1 %vm6262_vm1, %v6261_v46  ;;  %v3011_v53 = vmul.f32 %v6197_v52, %v7073_v31  ;;  %5962 = vmatprep.mubr.msk.bf16.mxu0 %vm6262_vm1, %v6261_v46 }
 0x7a6   :  { %5979 = vmatprep.subr.mxu1 %v6261_v46  ;;  %5959 = vmatpush3.bf16.msra.mxu0 %v6140_v59 }
 0x7a7   :  { %5956 = vmatmul.mubr.msk.f32.vlgmr.msra.gmra.mxu1 %vm2309_vm3, %v3011_v53  ;;  %5960 = vmatprep.subr.bf16.mxu0 %v6261_v46 }
 0x7a8   :  { %5981 = vmatprep.mubr.msk.f32.mxu1 %vm6262_vm1, %v6261_v46 }
 0x7aa   :  { %5961 = vmatpush3.bf16.msra.mxu0 %v6141_v62 }
 0x7ab   :  { %5966 = vmatprep.subr.bf16.mxu0 %v6261_v46 }
 0x807   :  { %v3084_v54 = vpop.f32.mrf.mxu0 }
 0x809   :  { %v5922_v55 = vpop.f32.mrf.mxu0 }
 0x857   :  { %v3160_v56 = vpop.f32.mrf.mxu1 }
 0x859   :  { %v5927_v57 = vpop.f32.mrf.mxu1 }
 0x85a   :  { %v5711_v57 = vld [vmem:[%s7438_s12] ss:$0 sm:$0xff] }
 0x85b   :  { %v3236_v58 = vpop.f32.mrf.mxu0 }
 0x85d   :  { %v5932_v60 = vpop.f32.mrf.mxu0 }
 0x85f   :  { %v3312_v61 = vpop.f32.mrf.mxu1 }
 0x860   :  { %v3388_v63 = vpop.f32.mrf.mxu0 }
 0x861   :  { %v5937_v1 = vpop.f32.mrf.mxu1 }
 0x862   :  { %v5942_v2 = vpop.f32.mrf.mxu0 }
 0x863   :  { %v3464_v4 = vpop.f32.mrf.mxu1 }
 0x864   :  { %v6076_v5 = vpack.i.bf16 %v3464_v4, %v3160_v56  ;;  %v3540_v9 = vpop.f32.mrf.mxu0  ;;  %v5713_v4 = vld [vmem:[%s7441_s15] ss:$0 sm:$0xff] }
 0x865   :  { %v6081_v12 = vpack.i.bf16 %v3540_v9, %v3236_v58  ;;  %v5947_v14 = vpop.f32.mrf.mxu1 }
 0x866   :  { %v5952_v15 = vpop.f32.mrf.mxu0  ;;  %6077 = vrot.lane.b32.xlu0 %v6076_v5, %s6268_s25 }
 0x867   :  { %6082 = vrot.lane.b32.xlu1 %v6081_v12, %s6269_s2  ;;  %v3616_v16 = vpop.f32.mrf.mxu1 }
 0x868   :  { %v6086_v17 = vpack.i.bf16 %v3616_v16, %v3312_v61  ;;  %v5712_v61 = vld [vmem:[%s7439_s13] ss:$0 sm:$0xff] }
 0x869   :  { %v5957_v19 = vpop.f32.mrf.mxu1 }
 0x86a   :  { %6087 = vrot.lane.b32.xlu0 %v6086_v17, %s6270_s10 }
 0x8d8   :  { %v6078_v20 = vpop.permute.xlu0 %6077 }
 0x8d9   :  { %v6080_v21 = vunpack.i.h.bf16 %v6078_v20  ;;  %v6079_v22 = vunpack.i.l.bf16 %v6078_v20  ;;  %v6083_v23 = vpop.permute.xlu1 %6082 }
 0x8da   :  { %v6085_v24 = vunpack.i.h.bf16 %v6083_v23  ;;  %v6084_v26 = vunpack.i.l.bf16 %v6083_v23 }
 0x8db   :  { %v3632_v27 = vsel %vm2309_vm3, %v3084_v54, %v6079_v22  ;;  %v3648_v28 = vsel %vm2309_vm3, %v3388_v63, %v6080_v21 }
 0x8dc   :  { %v6088_v29 = vpop.permute.xlu0 %6087  ;;  %v3649_v32 = vsel %vm2128_vm2, %v3648_v28, %v6085_v24  ;;  %v3633_v33 = vsel %vm2128_vm2, %v3632_v27, %v6084_v26 }
 0x8dd   :  { %v6090_v30 = vunpack.i.h.bf16 %v6088_v29  ;;  %v6089_v31 = vunpack.i.l.bf16 %v6088_v29 }
 0x8df   :  { %v3635_v34 = vsel %vm3634_vm4, %v3633_v33, %v6089_v31  ;;  %v3650_v35 = vsel %vm3634_vm4, %v3649_v32, %v6090_v30 }
 0x8e0   :  { %v3651_v6 = vpack.c.bf16 %v3650_v35, %v3635_v34 }
 0x8e2   :  { %5963 = vmatmul.mubr.msk.bf16.vlgmr.msra.gmra.mxu0 %vm476_vm0, %v3651_v6 }
 0x8e3   :  { %5970 = vmatprep.mubr.msk.bf16.mxu0 %vm6262_vm1, %v6261_v46  ;;  %5967 = vmatpush3.bf16.msra.mxu0 %v6142_v47 }
 0x8e4   :  { %5968 = vmatprep.subr.bf16.mxu0 %v6261_v46 }
 0x8e7   :  { %5969 = vmatpush3.bf16.msra.mxu0 %v6143_v48 }
 0x8e8   :  { %5974 = vmatprep.subr.mxu0 %v6261_v46 }
 0x9a2   :  { %v3707_v10 = vpop.f32.mrf.mxu0 }
 0x9a3   :  { %v3708_v3 = vadd.f32 %v5707_v7, %v3707_v10 }
 0x9a4   :  { %v5964_v36 = vpop.f32.mrf.mxu0 }
 0x9a5   :  { %v3714_v0 = vsel %vm476_vm0, %v3708_v3, 0.0 }
 0x9a6   :  { %3715 = vadd.xlane.f32.xlu1 %v3714_v0  ;;  %v3710_v13 = vpop.f32.mrf.mxu0 }
 0x9a7   :  { %v3711_v18 = vadd.f32 %v5707_v7, %v3710_v13 }
 0x9a8   :  { %v5965_v37 = vpop.f32.mrf.mxu0 }
 0x9a9   :  { %v3717_v8 = vsel %vm476_vm0, %v3711_v18, 0.0 }
 0x9aa   :  { %3718 = vadd.xlane.f32.xlu0 %v3717_v8 }
 0xa2f   :  { %v3716_v25 = vpop.xlane.xlu1 %3715 }
 0xa30   :  { %v3720_v11 = vmul.f32 0.03125, %v3716_v25 }
 0xa32   :  { %v3722_v38 = vsub.f32 %v3708_v3, %v3720_v11 }
 0xa33   :  { %v3719_v39 = vpop.xlane.xlu0 %3718 }
 0xa34   :  { %v3721_v40 = vmul.f32 0.03125, %v3719_v39  ;;  %v3724_v41 = vmul.f32 %v3722_v38, %v3722_v38 }
 0xa36   :  { %v3723_v42 = vsub.f32 %v3711_v18, %v3721_v40  ;;  %v3726_v43 = vsel %vm476_vm0, %v3724_v41, 0.0 }
 0xa37   :  { %3727 = vadd.xlane.f32.xlu0 %v3726_v43 }
 0xa38   :  { %v3725_v44 = vmul.f32 %v3723_v42, %v3723_v42 }
 0xa3a   :  { %v3729_v45 = vsel %vm476_vm0, %v3725_v44, 0.0 }
 0xa3b   :  { %3730 = vadd.xlane.f32.xlu1 %v3729_v45 }
 0xac0   :  { %v3728_v49 = vpop.xlane.xlu0 %3727 }
 0xac1   :  { %v3732_v50 = vmul.f32 0.03125, %v3728_v49 }
 0xac3   :  { %v3734_v51 = vadd.f32 1e-05, %v3732_v50 }
 0xac4   :  { %v3731_v52 = vpop.xlane.xlu1 %3730 }
 0xac5   :  { %6198 = vrsqrt.f32 %v3734_v51  ;;  %v3733_v53 = vmul.f32 0.03125, %v3731_v52 }
 0xac7   :  { %v3735_v54 = vadd.f32 1e-05, %v3733_v53 }
 0xac9   :  { %6200 = vrsqrt.f32 %v3735_v54 }
 0xad2   :  { %v6199_v55 = vpop.eup %6198 }
 0xad3   :  { %v3738_v56 = vmul.f32 %v6199_v55, %v3722_v38 }
 0xad5   :  { %v3746_v60 = vmul.f32 %v5711_v57, %v3738_v56 }
 0xad6   :  { %v6201_v58 = vpop.eup %6200 }
 0xad7   :  { %v3739_v59 = vmul.f32 %v6201_v58, %v3723_v42  ;;  %v3754_v63 = vadd.f32 %v5712_v61, %v3746_v60 }
 0xad9   :  { %v3747_v62 = vmul.f32 %v5711_v57, %v3739_v59 }
 0xadb   :  { %v3755_v1 = vadd.f32 %v5712_v61, %v3747_v62 }
 0xadd   :  { %v3768_v2 = vpack.c.bf16 %v3755_v1, %v3754_v63 }
 0xadf   :  { %5971 = vmatmul.mubr.msk.bf16.vlgmr.msra.gmra.mxu0 %vm476_vm0, %v3768_v2 }
 0xae0   :  { %5976 = vmatprep.mubr.msk.f32.mxu0 %vm6262_vm1, %v6261_v46 }
 0xb9f   :  { %v3824_v5 = vpop.f32.mrf.mxu0 }
 0xba0   :  { %v7161_v9 = vadd.f32 %v5713_v4, %v3824_v5 }
 0xba1   :  { %v5972_v12 = vpop.f32.mrf.mxu0 }
 0xba2   :  { %3834 = vrot.lane.b32.xlu1 %v7161_v9, %s6264_s7  ;;  %3832 = vrot.lane.b32.xlu0 %v7161_v9, %s6263_s0 }
 0xba3   :  { %v3827_v14 = vpop.f32.mrf.mxu0 }
 0xba4   :  { %v7167_v15 = vadd.f32 %v5713_v4, %v3827_v14 }
 0xba5   :  { %v5973_v16 = vpop.f32.mrf.mxu0 }
 0xba6   :  { %3836 = vrot.lane.b32.xlu1 %v7161_v9, %s6265_s9  ;;  %3839 = vrot.lane.b32.xlu0 %v7167_v15, %s6263_s0 }
 0xbaa   :  { %3841 = vrot.lane.b32.xlu1 %v7167_v15, %s6264_s7  ;;  %3843 = vrot.lane.b32.xlu0 %v7167_v15, %s6265_s9 }
 0xbae   :  { %3845 = vrot.lane.b32.xlu1 %v7161_v9, %s6266_s23 }
 0xc14   :  { %v7179_v17 = vpop.permute.xlu1 %3834  ;;  %v7181_v19 = vpop.permute.xlu0 %3832 }
 0xc15   :  { %3997 = vrot.lane.b32.xlu1 %v7179_v17, %s6266_s23  ;;  %3921 = vrot.lane.b32.xlu0 %v7181_v19, %s6266_s23 }
 0xc18   :  { %v7187_v20 = vpop.permute.xlu1 %3836  ;;  %v7193_v21 = vpop.permute.xlu0 %3839 }
 0xc19   :  { %4149 = vrot.lane.b32.xlu1 %v7167_v15, %s6266_s23  ;;  %4073 = vrot.lane.b32.xlu0 %v7187_v20, %s6266_s23 }
 0xc1c   :  { %v7195_v22 = vpop.permute.xlu1 %3841  ;;  %v7201_v23 = vpop.permute.xlu0 %3843 }
 0xc1d   :  { %4301 = vrot.lane.b32.xlu1 %v7195_v22, %s6266_s23  ;;  %4225 = vrot.lane.b32.xlu0 %v7193_v21, %s6266_s23 }
 0xc20   :  { %v3846_v24 = vpop.permute.xlu1 %3845 }
 0xc21   :  { %5975 = vmatpush3.xpose.msk.msra.mxu0 %vm2309_vm3, %v3846_v24  ;;  %4377 = vrot.lane.b32.xlu0 %v7201_v23, %s6266_s23 }
 0xc22   :  { %5984 = vmatprep.subr.mxu0 %v6261_v46 }
 0xc24   :  { %5977 = vmatmul.mubr.msk.f32.vlgmr.msra.gmra.mxu0 %vm2309_vm3, %v7161_v9 }
 0xc25   :  { %5986 = vmatprep.mubr.msk.f32.mxu0 %vm6262_vm1, %v6261_v46 }
 0xc87   :  { %v3998_v26 = vpop.permute.xlu1 %3997  ;;  %v3922_v27 = vpop.permute.xlu0 %3921 }
 0xc88   :  { %5980 = vmatpush3.xpose.msk.msra.mxu1 %vm2309_vm3, %v3922_v27  ;;  %5985 = vmatpush3.xpose.msk.msra.mxu0 %vm2309_vm3, %v3998_v26 }
 0xc89   :  { %5994 = vmatprep.subr.mxu0 %v6261_v46  ;;  %5989 = vmatprep.subr.mxu1 %v6261_v46 }
 0xc8b   :  { %5987 = vmatmul.mubr.msk.f32.vlgmr.msra.gmra.mxu0 %vm2309_vm3, %v7179_v17  ;;  %v4150_v28 = vpop.permute.xlu1 %4149  ;;  %5982 = vmatmul.mubr.msk.f32.vlgmr.msra.gmra.mxu1 %vm2309_vm3, %v7181_v19  ;;  %v4074_v29 = vpop.permute.xlu0 %4073 }
 0xc8c   :  { %5990 = vmatpush3.xpose.msk.msra.mxu1 %vm2309_vm3, %v4074_v29  ;;  %5995 = vmatpush3.xpose.msk.msra.mxu0 %vm2309_vm3, %v4150_v28 }
 0xc8d   :  { %5991 = vmatprep.mubr.msk.f32.mxu1 %vm6262_vm1, %v6261_v46  ;;  %5996 = vmatprep.mubr.msk.f32.mxu0 %vm6262_vm1, %v6261_v46 }
 0xc8e   :  { %6004 = vmatprep.subr.mxu0 %v6261_v46  ;;  %5999 = vmatprep.subr.mxu1 %v6261_v46 }
 0xc8f   :  { %5997 = vmatmul.mubr.msk.f32.vlgmr.msra.gmra.mxu0 %vm2309_vm3, %v7167_v15  ;;  %v4302_v30 = vpop.permute.xlu1 %4301  ;;  %5992 = vmatmul.mubr.msk.f32.vlgmr.msra.gmra.mxu1 %vm2309_vm3, %v7187_v20  ;;  %v4226_v31 = vpop.permute.xlu0 %4225 }
 0xc90   :  { %6000 = vmatpush3.xpose.msk.msra.mxu1 %vm2309_vm3, %v4226_v31  ;;  %6005 = vmatpush3.xpose.msk.msra.mxu0 %vm2309_vm3, %v4302_v30 }
 0xc91   :  { %6001 = vmatprep.mubr.msk.f32.mxu1 %vm6262_vm1, %v6261_v46  ;;  %6006 = vmatprep.mubr.msk.f32.mxu0 %vm6262_vm1, %v6261_v46 }
 0xc92   :  { %6009 = vmatprep.subr.mxu1 %v6261_v46  ;;  %6014 = vmatprep.subr.mxu0 %v6261_v46 }
 0xc93   :  { %6002 = vmatmul.mubr.msk.f32.vlgmr.msra.gmra.mxu1 %vm2309_vm3, %v7193_v21  ;;  %6007 = vmatmul.mubr.msk.f32.vlgmr.msra.gmra.mxu0 %vm2309_vm3, %v7195_v22  ;;  %v4378_v32 = vpop.permute.xlu0 %4377 }
 0xc94   :  { %6010 = vmatpush3.xpose.msk.msra.mxu1 %vm2309_vm3, %v4378_v32  ;;  %6011 = vmatprep.mubr.msk.f32.mxu1 %vm6262_vm1, %v6261_v46 }
 0xc95   :  { %6019 = vmatprep.subr.mxu1 %v6261_v46  ;;  %6016 = vmatprep.mubr.msk.f32.mxu0 %vm6262_vm1, %v6261_v46 }
 0xc97   :  { %6012 = vmatmul.mubr.msk.f32.vlgmr.msra.gmra.mxu1 %vm2309_vm3, %v7201_v23 }
 0xc98   :  { %6021 = vmatprep.mubr.msk.f32.mxu1 %vm6262_vm1, %v6261_v46 }
 0xce4   :  { %v3917_v33 = vpop.f32.mrf.mxu0 }
 0xce5   :  { %v4453_v34 = vmul.f32 0.35355338, %v3917_v33 }
 0xce6   :  { %v5978_v35 = vpop.f32.mrf.mxu0 }
 0xce7   :  { %v4461_v6 = vsel %vm2309_vm3, %v4453_v34, -inf }
 0xce8   :  { %4462 = vmax.xlane.f32.xlu1 %v4461_v6 }
 0xd4b   :  { %v3993_v7 = vpop.f32.mrf.mxu1  ;;  %v4069_v10 = vpop.f32.mrf.mxu0 }
 0xd4c   :  { %v4454_v3 = vmul.f32 0.35355338, %v3993_v7  ;;  %v4455_v13 = vmul.f32 0.35355338, %v4069_v10 }
 0xd4d   :  { %v5983_v36 = vpop.f32.mrf.mxu1  ;;  %v5988_v0 = vpop.f32.mrf.mxu0 }
 0xd4e   :  { %v4464_v18 = vsel %vm2309_vm3, %v4454_v3, -inf  ;;  %v4467_v41 = vsel %vm2309_vm3, %v4455_v13, -inf }
 0xd4f   :  { %4465 = vmax.xlane.f32.xlu0 %v4464_v18  ;;  %v4145_v37 = vpop.f32.mrf.mxu1  ;;  %v4221_v8 = vpop.f32.mrf.mxu0 }
 0xd50   :  { %v4456_v25 = vmul.f32 0.35355338, %v4145_v37  ;;  %v4457_v39 = vmul.f32 0.35355338, %v4221_v8 }
 0xd51   :  { %v5993_v11 = vpop.f32.mrf.mxu1  ;;  %v5998_v38 = vpop.f32.mrf.mxu0 }
 0xd52   :  { %v4470_v40 = vsel %vm2309_vm3, %v4456_v25, -inf  ;;  %v4473_v50 = vsel %vm2309_vm3, %v4457_v39, -inf }
 0xd53   :  { %v4297_v42 = vpop.f32.mrf.mxu1  ;;  %4471 = vmax.xlane.f32.xlu1 %v4470_v40  ;;  %4468 = vmax.xlane.f32.xlu0 %v4467_v41  ;;  %v4373_v43 = vpop.f32.mrf.mxu0 }
 0xd54   :  { %v4458_v44 = vmul.f32 0.35355338, %v4297_v42  ;;  %v4459_v48 = vmul.f32 0.35355338, %v4373_v43 }
 0xd55   :  { %v6003_v45 = vpop.f32.mrf.mxu1  ;;  %v6008_v47 = vpop.f32.mrf.mxu0 }
 0xd56   :  { %v4476_v49 = vsel %vm2309_vm3, %v4458_v44, -inf  ;;  %v4479_v55 = vsel %vm2309_vm3, %v4459_v48, -inf }
 0xd57   :  { %v4449_v51 = vpop.f32.mrf.mxu1  ;;  %4477 = vmax.xlane.f32.xlu1 %v4476_v49  ;;  %4474 = vmax.xlane.f32.xlu0 %v4473_v50 }
 0xd58   :  { %v4460_v52 = vmul.f32 0.35355338, %v4449_v51 }
 0xd59   :  { %v6013_v53 = vpop.f32.mrf.mxu1 }
 0xd5a   :  { %v4482_v54 = vsel %vm2309_vm3, %v4460_v52, -inf }
 0xd5b   :  { %4483 = vmax.xlane.f32.xlu1 %v4482_v54  ;;  %4480 = vmax.xlane.f32.xlu0 %v4479_v55 }
 0xd6c   :  { %4625 = vrot.lane.b32.xlu1 %v7181_v19, %s6267_s1 }
 0xd70   :  { %4701 = vrot.lane.b32.xlu1 %v7179_v17, %s6267_s1 }
 0xd71   :  { %4549 = vrot.lane.b32.xlu0 %v7161_v9, %s6267_s1  ;;  %v4463_v56 = vpop.xlane.xlu1 %4462 }
 0xd72   :  { %v4485_v57 = vsub.f32 %v4453_v34, %v4463_v56 }
 0xd74   :  { %4853 = vrot.lane.b32.xlu1 %v7167_v15, %s6267_s1  ;;  %v4493_v58 = vmul.f32 1.442695, %v4485_v57 }
 0xd75   :  { %4777 = vrot.lane.b32.xlu0 %v7187_v20, %s6267_s1 }
 0xd76   :  { %6202 = vpow2.f32 %v4493_v58 }
 0xd79   :  { %4929 = vrot.lane.b32.xlu0 %v7193_v21, %s6267_s1 }
 0xd83   :  { %v7273_v59 = vpop.eup %6202 }
 0xd84   :  { %v4509_v60 = vsel %vm2309_vm3, %v7273_v59, 0.0 }
 0xd98   :  { %4510 = vadd.xlane.f32.xlu0 %v4509_v60 }
 0xdd8   :  { %v4466_v61 = vpop.xlane.xlu0 %4465 }
 0xdd9   :  { %v4486_v62 = vsub.f32 %v4454_v3, %v4466_v61 }
 0xddb   :  { %v4495_v63 = vmul.f32 1.442695, %v4486_v62 }
 0xddc   :  { %v4472_v1 = vpop.xlane.xlu1 %4471  ;;  %v4469_v2 = vpop.xlane.xlu0 %4468 }
 0xddd   :  { %6204 = vpow2.f32 %v4495_v63  ;;  %v4488_v4 = vsub.f32 %v4456_v25, %v4472_v1  ;;  %v4487_v5 = vsub.f32 %v4455_v13, %v4469_v2 }
 0xddf   :  { %v4499_v9 = vmul.f32 1.442695, %v4488_v4  ;;  %v4497_v12 = vmul.f32 1.442695, %v4487_v5 }
 0xde0   :  { %v4478_v14 = vpop.xlane.xlu1 %4477  ;;  %v4475_v15 = vpop.xlane.xlu0 %4474 }
 0xde1   :  { %6206 = vpow2.f32 %v4499_v9  ;;  %v4490_v16 = vsub.f32 %v4458_v44, %v4478_v14  ;;  %v4489_v17 = vsub.f32 %v4457_v39, %v4475_v15  ;;  %v6144_v9 = vld [vmem:[%s7442_s16 + $0x8] sm:$0xff]  }
 0xde2   :  { %6208 = vpow2.f32 %v4497_v12 }
 0xde3   :  { %v4503_v19 = vmul.f32 1.442695, %v4490_v16  ;;  %v4501_v20 = vmul.f32 1.442695, %v4489_v17  ;;  %v6145_v16 = vld [vmem:[%s7442_s16] sm:$0xff]  }
 0xde4   :  { %v4484_v21 = vpop.xlane.xlu1 %4483  ;;  %v4481_v24 = vpop.xlane.xlu0 %4480 }
 0xde5   :  { %6210 = vpow2.f32 %v4503_v19  ;;  %v4492_v26 = vsub.f32 %v4460_v52, %v4484_v21  ;;  %v4491_v27 = vsub.f32 %v4459_v48, %v4481_v24 }
 0xde6   :  { %6212 = vpow2.f32 %v4501_v20 }
 0xde7   :  { %v4507_v28 = vmul.f32 1.442695, %v4492_v26  ;;  %v4505_v29 = vmul.f32 1.442695, %v4491_v27 }
 0xde8   :  { %v4626_v30 = vpop.permute.xlu1 %4625  ;;  %v4550_v31 = vpop.permute.xlu0 %4549 }
 0xde9   :  { %6214 = vpow2.f32 %v4507_v28  ;;  %6015 = vmatpush3.msra.mxu0 %v4550_v31  ;;  %6020 = vmatpush3.msra.mxu1 %v4626_v30 }
 0xdea   :  { %v6205_v32 = vpop.eup %6204  ;;  %6216 = vpow2.f32 %v4505_v29  ;;  %6024 = vmatprep.subr.mxu0 %v6261_v46  ;;  %6029 = vmatprep.subr.mxu1 %v6261_v46 }
 0xdeb   :  { %v4512_v33 = vsel %vm2309_vm3, %v6205_v32, 0.0 }
 0xdec   :  { %4513 = vadd.xlane.f32.xlu1 %v4512_v33  ;;  %v4778_v25 = vpop.permute.xlu0 %4777  ;;  %v4702_v41 = vpop.permute.xlu1 %4701 }
 0xdee   :  { %v6207_v34 = vpop.eup %6206 }
 0xdef   :  { %v6209_v35 = vpop.eup %6208  ;;  %v4518_v6 = vsel %vm2309_vm3, %v6207_v34, 0.0 }
 0xdf0   :  { %4519 = vadd.xlane.f32.xlu1 %v4518_v6  ;;  %v4515_v7 = vsel %vm2309_vm3, %v6209_v35, 0.0  ;;  %v4930_v11 = vpop.permute.xlu0 %4929 }
 0xdf1   :  { %4516 = vadd.xlane.f32.xlu0 %v4515_v7 }
 0xdf2   :  { %v6211_v10 = vpop.eup %6210 }
 0xdf3   :  { %v6213_v3 = vpop.eup %6212  ;;  %v4524_v36 = vsel %vm2309_vm3, %v6211_v10, 0.0 }
 0xdf4   :  { %4525 = vadd.xlane.f32.xlu1 %v4524_v36  ;;  %v4521_v0 = vsel %vm2309_vm3, %v6213_v3, 0.0 }
 0xdf5   :  { %4522 = vadd.xlane.f32.xlu0 %v4521_v0 }
 0xdf6   :  { %v7284_v13 = vpop.eup %6214 }
 0xdf7   :  { %v7286_v18 = vpop.eup %6216  ;;  %v4530_v37 = vsel %vm2309_vm3, %v7284_v13, 0.0 }
 0xdf8   :  { %4531 = vadd.xlane.f32.xlu1 %v4530_v37  ;;  %v4527_v8 = vsel %vm2309_vm3, %v7286_v18, 0.0 }
 0xdf9   :  { %4528 = vadd.xlane.f32.xlu0 %v4527_v8 }
 0xe09   :  { %5005 = vrot.lane.b32.xlu1 %v7195_v22, %s6267_s1  ;;  %v4854_v22 = vpop.permute.xlu1 %4853 }
 0xe0f   :  { %5081 = vrot.lane.b32.xlu0 %v7201_v23, %s6267_s1 }
 0xe21   :  { %v4511_v38 = vpop.xlane.xlu0 %4510 }
 0xe22   :  { %6218 = vrcp.f32 %v4511_v38 }
 0xe2f   :  { %v6219_v39 = vpop.eup %6218 }
 0xe30   :  { %v4541_v40 = vmul.f32 %v6219_v39, %v7273_v59  ;;  %v5741_v39 = vld [vmem:[%s7443_s17] ss:$0 sm:$0xff] }
 0xe32   :  { %6017 = vmatmul.mubr.msk.f32.vlgmr.msra.gmra.mxu0 %vm2309_vm3, %v4541_v40 }
 0xe33   :  { %6025 = vmatpush3.msra.mxu0 %v4702_v41  ;;  %6026 = vmatprep.mubr.msk.f32.mxu0 %vm6262_vm1, %v6261_v46 }
 0xe34   :  { %6034 = vmatprep.subr.mxu0 %v6261_v46 }
 0xe75   :  { %v4514_v42 = vpop.xlane.xlu1 %4513 }
 0xe76   :  { %6220 = vrcp.f32 %v4514_v42 }
 0xe79   :  { %v4520_v23 = vpop.xlane.xlu1 %4519 }
 0xe7a   :  { %6222 = vrcp.f32 %v4520_v23  ;;  %v4517_v43 = vpop.xlane.xlu0 %4516 }
 0xe7b   :  { %6224 = vrcp.f32 %v4517_v43 }
 0xe7d   :  { %v4526_v44 = vpop.xlane.xlu1 %4525 }
 0xe7e   :  { %6226 = vrcp.f32 %v4526_v44  ;;  %v4523_v45 = vpop.xlane.xlu0 %4522 }
 0xe7f   :  { %6228 = vrcp.f32 %v4523_v45 }
 0xe81   :  { %v4532_v47 = vpop.xlane.xlu1 %4531 }
 0xe82   :  { %6230 = vrcp.f32 %v4532_v47  ;;  %v4529_v48 = vpop.xlane.xlu0 %4528 }
 0xe83   :  { %v6221_v49 = vpop.eup %6220  ;;  %6232 = vrcp.f32 %v4529_v48 }
 0xe84   :  { %v4542_v50 = vmul.f32 %v6221_v49, %v6205_v32 }
 0xe85   :  { %v5006_v61 = vpop.permute.xlu1 %5005 }
 0xe86   :  { %6022 = vmatmul.mubr.msk.f32.vlgmr.msra.gmra.mxu1 %vm2309_vm3, %v4542_v50  ;;  %v5082_v59 = vpop.permute.xlu0 %5081 }
 0xe87   :  { %v6223_v51 = vpop.eup %6222  ;;  %6030 = vmatpush3.msra.mxu1 %v4778_v25  ;;  %6031 = vmatprep.mubr.msk.f32.mxu1 %vm6262_vm1, %v6261_v46 }
 0xe88   :  { %v6225_v52 = vpop.eup %6224  ;;  %6039 = vmatprep.subr.mxu1 %v6261_v46  ;;  %v4544_v53 = vmul.f32 %v6223_v51, %v6207_v34 }
 0xe89   :  { %v4543_v54 = vmul.f32 %v6225_v52, %v6209_v35 }
 0xe8a   :  { %6032 = vmatmul.mubr.msk.f32.vlgmr.msra.gmra.mxu1 %vm2309_vm3, %v4544_v53 }
 0xe8b   :  { %v6227_v55 = vpop.eup %6226  ;;  %6027 = vmatmul.mubr.msk.f32.vlgmr.msra.gmra.mxu0 %vm2309_vm3, %v4543_v54  ;;  %6040 = vmatpush3.msra.mxu1 %v4930_v11 }
 0xe8c   :  { %v6229_v56 = vpop.eup %6228  ;;  %6035 = vmatpush3.msra.mxu0 %v4854_v22  ;;  %6036 = vmatprep.mubr.msk.f32.mxu0 %vm6262_vm1, %v6261_v46  ;;  %v4546_v57 = vmul.f32 %v6227_v55, %v6211_v10 }
 0xe8d   :  { %6041 = vmatprep.mubr.msk.f32.mxu1 %vm6262_vm1, %v6261_v46  ;;  %6044 = vmatprep.subr.mxu0 %v6261_v46  ;;  %v4545_v58 = vmul.f32 %v6229_v56, %v6213_v3 }
 0xe8e   :  { %6049 = vmatprep.subr.mxu1 %v6261_v46  ;;  %6042 = vmatmul.mubr.msk.f32.vlgmr.msra.gmra.mxu1 %vm2309_vm3, %v4546_v57  ;;  %v6146_v57 = vld [vmem:[%s7446_s20 + $0x78] sm:$0xff]  }
 0xe8f   :  { %v6231_v60 = vpop.eup %6230  ;;  %6037 = vmatmul.mubr.msk.f32.vlgmr.msra.gmra.mxu0 %vm2309_vm3, %v4545_v58  ;;  %6050 = vmatpush3.msra.mxu1 %v5082_v59  ;;  %v6147_v58 = vld [vmem:[%s7446_s20 + $0x38] sm:$0xff]   ;;  %v6148_v59 = vld [vmem:[%s7446_s20 + $0x70] sm:$0xff]  }
 0xe90   :  { %v6233_v62 = vpop.eup %6232  ;;  %6045 = vmatpush3.msra.mxu0 %v5006_v61  ;;  %6046 = vmatprep.mubr.msk.f32.mxu0 %vm6262_vm1, %v6261_v46  ;;  %v4548_v63 = vmul.f32 %v6231_v60, %v7284_v13  ;;  %v6149_v60 = vld [vmem:[%s7446_s20 + $0x30] sm:$0xff]   ;;  %v6150_v61 = vld [vmem:[%s7446_s20 + $0x68] sm:$0xff]  }
 0xe91   :  { %6051 = vmatprep.mubr.msk.f32.mxu1 %vm6262_vm1, %v6261_v46  ;;  %v4547_v1 = vmul.f32 %v6233_v62, %v7286_v18  ;;  %6054 = vmatprep.subr.bf16.mxu0 %v6261_v46 }
 0xe92   :  { %6052 = vmatmul.mubr.msk.f32.vlgmr.msra.gmra.mxu1 %vm2309_vm3, %v4548_v63  ;;  %5842 = vmatprep.subr.bf16.mxu1 %v6146_v57 }
 0xe93   :  { %6047 = vmatmul.mubr.msk.f32.vlgmr.msra.gmra.mxu0 %vm2309_vm3, %v4547_v1  ;;  %5843 = vmatpush3.bf16.msra.mxu1 %v6147_v58 }
 0xe94   :  { %6058 = vmatprep.mubr.msk.bf16.mxu0 %vm6262_vm1, %v6261_v46  ;;  %6055 = vmatpush3.bf16.msra.mxu0 %v6144_v9  ;;  %v6151_v9 = vld [vmem:[%s7446_s20 + $0x28] sm:$0xff]  }
 0xe95   :  { %6056 = vmatprep.subr.bf16.mxu0 %v6261_v46  ;;  %5844 = vmatprep.subr.bf16.mxu1 %v6148_v59 }
 0xe97   :  { %5845 = vmatpush3.bf16.msra.mxu1 %v6149_v60 }
 0xe98   :  { %6057 = vmatpush3.bf16.msra.mxu0 %v6145_v16  ;;  %5846 = vmatprep.subr.bf16.mxu1 %v6150_v61 }
 0xe9b   :  { %5847 = vmatpush3.bf16.msra.mxu1 %v6151_v9 }
 0xef2   :  { %v4621_v2 = vpop.f32.mrf.mxu0 }
 0xef4   :  { %v6018_v4 = vpop.f32.mrf.mxu0 }
 0xf46   :  { %v4697_v5 = vpop.f32.mrf.mxu1 }
 0xf48   :  { %v6023_v12 = vpop.f32.mrf.mxu1 }
 0xf49   :  { %v6152_v12 = vld [vmem:[%s7446_s20 + $0x60] sm:$0xff]  }
 0xf4a   :  { %v4849_v14 = vpop.f32.mrf.mxu1  ;;  %5848 = vmatprep.subr.bf16.mxu1 %v6152_v12 }
 0xf4b   :  { %v4773_v15 = vpop.f32.mrf.mxu0 }
 0xf4c   :  { %v6033_v17 = vpop.f32.mrf.mxu1 }
 0xf4d   :  { %v6028_v19 = vpop.f32.mrf.mxu0  ;;  %v6153_v17 = vld [vmem:[%s7446_s20 + $0x20] sm:$0xff]  }
 0xf4e   :  { %v5001_v20 = vpop.f32.mrf.mxu1  ;;  %v5746_v19 = vld [vmem:[%s7445_s19] ss:$0 sm:$0xff]  ;;  %5849 = vmatpush3.bf16.msra.mxu1 %v6153_v17 }
 0xf4f   :  { %v4925_v21 = vpop.f32.mrf.mxu0  ;;  %v6091_v24 = vpack.i.bf16 %v5001_v20, %v4697_v5 }
 0xf50   :  { %v6043_v26 = vpop.f32.mrf.mxu1 }
 0xf51   :  { %v6038_v27 = vpop.f32.mrf.mxu0  ;;  %6092 = vrot.lane.b32.xlu1 %v6091_v24, %s6268_s25  ;;  %v6154_v24 = vld [vmem:[%s7446_s20 + $0x58] sm:$0xff]  }
 0xf52   :  { %v5153_v28 = vpop.f32.mrf.mxu1  ;;  %5850 = vmatprep.subr.bf16.mxu1 %v6154_v24 }
 0xf53   :  { %v5077_v29 = vpop.f32.mrf.mxu0  ;;  %v6101_v30 = vpack.i.bf16 %v5153_v28, %v4849_v14  ;;  %v6155_v28 = vld [vmem:[%s7446_s20 + $0x18] sm:$0xff]  }
 0xf54   :  { %v6096_v46 = vpack.i.bf16 %v5077_v29, %v4773_v15  ;;  %v6053_v31 = vpop.f32.mrf.mxu1  ;;  %v5745_v15 = vld [vmem:[%s7444_s18] ss:$0 sm:$0xff]  ;;  %5851 = vmatpush3.bf16.msra.mxu1 %v6155_v28 }
 0xf55   :  { %v6048_v32 = vpop.f32.mrf.mxu0  ;;  %6102 = vrot.lane.b32.xlu1 %v6101_v30, %s6270_s10  ;;  %v6156_v31 = vld [vmem:[%s7446_s20 + $0x50] sm:$0xff]  }
 0xf56   :  { %6097 = vrot.lane.b32.xlu0 %v6096_v46, %s6269_s2  ;;  %5852 = vmatprep.subr.bf16.mxu1 %v6156_v31 }
 0xfc3   :  { %v6093_v33 = vpop.permute.xlu1 %6092 }
 0xfc4   :  { %v6095_v34 = vunpack.i.h.bf16 %v6093_v33  ;;  %v6094_v35 = vunpack.i.l.bf16 %v6093_v33 }
 0xfc6   :  { %v5169_v13 = vsel %vm2309_vm3, %v4621_v2, %v6094_v35  ;;  %v5184_v18 = vsel %vm2309_vm3, %v4925_v21, %v6095_v34  ;;  %v6157_v34 = vld [vmem:[%s7446_s20 + $0x10] sm:$0xff]  }
 0xfc7   :  { %v6103_v6 = vpop.permute.xlu1 %6102  ;;  %5853 = vmatpush3.bf16.msra.mxu1 %v6157_v34 }
 0xfc8   :  { %v6105_v7 = vunpack.i.h.bf16 %v6103_v6  ;;  %v6104_v10 = vunpack.i.l.bf16 %v6103_v6  ;;  %v6098_v3 = vpop.permute.xlu0 %6097 }
 0xfc9   :  { %v6100_v36 = vunpack.i.h.bf16 %v6098_v3  ;;  %v6099_v0 = vunpack.i.l.bf16 %v6098_v3  ;;  %v6158_v3 = vld [vmem:[%s7446_s20 + $0x48] sm:$0xff]  }
 0xfca   :  { %5854 = vmatprep.subr.bf16.mxu1 %v6158_v3 }
 0xfcb   :  { %v5185_v37 = vsel %vm2128_vm2, %v5184_v18, %v6100_v36  ;;  %v5170_v8 = vsel %vm2128_vm2, %v5169_v13, %v6099_v0 }
 0xfcc   :  { %v5186_v25 = vsel %vm3634_vm4, %v5185_v37, %v6105_v7  ;;  %v5171_v11 = vsel %vm3634_vm4, %v5170_v8, %v6104_v10  ;;  %v6159_v37 = vld [vmem:[%s7446_s20 + $0x8] sm:$0xff]   ;;  %v6160_v8 = vld [vmem:[%s7446_s20 + $0x40] sm:$0xff]  }
 0xfcd   :  { %v5187_v38 = vpack.c.bf16 %v5186_v25, %v5171_v11  ;;  %5855 = vmatpush3.bf16.msra.mxu1 %v6159_v37  ;;  %v6161_v25 = vld [vmem:[%s7446_s20] sm:$0xff]  }
 0xfce   :  { %5856 = vmatprep.subr.bf16.mxu1 %v6160_v8 }
 0xfcf   :  { %6059 = vmatmul.mubr.msk.bf16.vlgmr.msra.gmra.mxu0 %vm476_vm0, %v5187_v38 }
 0xfd1   :  { %5857 = vmatpush3.bf16.msra.mxu1 %v6161_v25 }
0x108f   :  { %v5243_v40 = vpop.f32.mrf.mxu0 }
0x1090   :  { %v5244_v41 = vadd.f32 %v5741_v39, %v5243_v40 }
0x1091   :  { %v6060_v22 = vpop.f32.mrf.mxu0 }
0x1092   :  { %v5250_v42 = vsel %vm476_vm0, %v5244_v41, 0.0 }
0x1093   :  { %5251 = vadd.xlane.f32.xlu1 %v5250_v42  ;;  %v5246_v23 = vpop.f32.mrf.mxu0 }
0x1094   :  { %v5247_v43 = vadd.f32 %v5741_v39, %v5246_v23 }
0x1095   :  { %v6061_v44 = vpop.f32.mrf.mxu0 }
0x1096   :  { %v5253_v45 = vsel %vm476_vm0, %v5247_v43, 0.0 }
0x1097   :  { %5254 = vadd.xlane.f32.xlu0 %v5253_v45 }
0x111c   :  { %v5252_v47 = vpop.xlane.xlu1 %5251 }
0x111d   :  { %v5256_v48 = vmul.f32 0.03125, %v5252_v47 }
0x111f   :  { %v5258_v51 = vsub.f32 %v5244_v41, %v5256_v48 }
0x1120   :  { %v5255_v49 = vpop.xlane.xlu0 %5254 }
0x1121   :  { %v5257_v50 = vmul.f32 0.03125, %v5255_v49  ;;  %v5260_v55 = vmul.f32 %v5258_v51, %v5258_v51 }
0x1123   :  { %v5259_v52 = vsub.f32 %v5247_v43, %v5257_v50  ;;  %v5262_v56 = vsel %vm476_vm0, %v5260_v55, 0.0 }
0x1125   :  { %v5261_v53 = vmul.f32 %v5259_v52, %v5259_v52 }
0x1127   :  { %v5265_v54 = vsel %vm476_vm0, %v5261_v53, 0.0 }
0x1128   :  { %5266 = vadd.xlane.f32.xlu0 %v5265_v54 }
0x112c   :  { %5263 = vadd.xlane.f32.xlu0 %v5262_v56 }
0x11b1   :  { %v5267_v62 = vpop.xlane.xlu0 %5266 }
0x11b2   :  { %v5269_v63 = vmul.f32 0.03125, %v5267_v62 }
0x11b4   :  { %v5271_v1 = vadd.f32 1e-05, %v5269_v63 }
0x11b5   :  { %v5264_v2 = vpop.xlane.xlu0 %5263 }
0x11b6   :  { %6234 = vrsqrt.f32 %v5271_v1  ;;  %v5268_v4 = vmul.f32 0.03125, %v5264_v2 }
0x11b8   :  { %v5270_v5 = vadd.f32 1e-05, %v5268_v4 }
0x11ba   :  { %6236 = vrsqrt.f32 %v5270_v5 }
0x11c3   :  { %v6235_v14 = vpop.eup %6234 }
0x11c4   :  { %v5275_v16 = vmul.f32 %v6235_v14, %v5259_v52 }
0x11c6   :  { %v5283_v20 = vmul.f32 %v5745_v15, %v5275_v16 }
0x11c7   :  { %v6237_v21 = vpop.eup %6236 }
0x11c8   :  { %v5291_v26 = vadd.f32 %v5746_v19, %v5283_v20  ;;  %v5274_v27 = vmul.f32 %v6237_v21, %v5258_v51 }
0x11ca   :  { %v5282_v29 = vmul.f32 %v5745_v15, %v5274_v27  ;;  %v5332_v30 = vrot.slane %v5291_v26, 2  ;;  %v5346_v46 = vrot.slane %v5291_v26, 6  ;;  %v5328_v13 = vrot.slane %v5291_v26, 1 }
0x11cb   :  { %v5342_v18 = vrot.slane %v5291_v26, 5  ;;  %v5336_v38 = vrot.slane %v5291_v26, 3  ;;  %v5350_v39 = vrot.slane %v5291_v26, 7  ;;  %v5340_v45 = vrot.slane %v5291_v26, 4 }
0x11cc   :  { %v5290_v32 = vadd.f32 %v5746_v19, %v5282_v29  ;;  %v6116_v33 = vpack.i.bf16 %v5332_v30, %v5346_v46  ;;  %v5747_v46 = vld [vmem:[%s7447_s21] ss:$0 sm:$0xff] }
0x11cd   :  { %v6111_v11 = vpack.i.bf16 %v5328_v13, %v5342_v18  ;;  %v6121_v40 = vpack.i.bf16 %v5336_v38, %v5350_v39 }
0x11ce   :  { %6117 = vrot.lane.b32.xlu0 %v6116_v33, %s6267_s1  ;;  %v5297_v35 = vrot.slane %v5290_v32, 2  ;;  %v5311_v6 = vrot.slane %v5290_v32, 6  ;;  %v5293_v7 = vrot.slane %v5290_v32, 1  ;;  %v5307_v10 = vrot.slane %v5290_v32, 5 }
0x11cf   :  { %v5301_v41 = vrot.slane %v5290_v32, 3  ;;  %v5315_v22 = vrot.slane %v5290_v32, 7  ;;  %v5305_v57 = vrot.slane %v5290_v32, 4 }
0x11d0   :  { %v6126_v36 = vpack.i.bf16 %v5297_v35, %v5311_v6  ;;  %v6106_v0 = vpack.i.bf16 %v5293_v7, %v5307_v10 }
0x11d1   :  { %v6131_v42 = vpack.i.bf16 %v5301_v41, %v5315_v22 }
0x11d2   :  { %6127 = vrot.lane.b32.xlu0 %v6126_v36, %s6267_s1  ;;  %6107 = vrot.lane.b32.xlu1 %v6106_v0, %s6271_s27  ;;  %s6272_s1 = smov [#allocation2]  }
0x11d3   :  { %s5553_s30 = sshll.u32 %s6272_s1, 4  ;;  %s5554_s30 = int_to_ptr.vmem [resolvable:$true] %s5553_s30 }
0x11d4   :  { %s6238_s4 = scalar_lea.vmem %s5554_s30, 32  ;;  %p6243_p1 = scmp.lt.s32.totalorder %s5554_s30, %s5554_s30 }
0x11d5   :  { %p6239_p0 = scmp.ne.s32.totalorder %s5554_s30, %s6238_s4  ;;  %p6244_p2 = scmp.lt.s32.totalorder %s6238_s4, %s6238_s4 }
0x11d6   :  { %6112 = vrot.lane.b32.xlu1 %v6111_v11, %s6271_s27 }
0x11d7   :  { %p6245_p3 = por %p6244_p2, %p6243_p1 }
0x11d9   :  { %p6246_p4 = pnand %p6245_p3, %p6239_p0 }
0x11da   :  { %6122 = vrot.lane.b32.xlu1 %v6121_v40, %s6266_s23 }
0x11de   :  { %6132 = vrot.lane.b32.xlu1 %v6131_v42, %s6266_s23 }
0x1240   :  { %v6118_v43 = vpop.permute.xlu0 %6117 }
0x1241   :  { %v6120_v54 = vunpack.i.h.bf16 %v6118_v43  ;;  %v6119_v55 = vunpack.i.l.bf16 %v6118_v43 }
0x1244   :  { %v6108_v23 = vpop.permute.xlu1 %6107  ;;  %v6128_v51 = vpop.permute.xlu0 %6127 }
0x1245   :  { %v6110_v49 = vunpack.i.h.bf16 %v6108_v23  ;;  %v6109_v50 = vunpack.i.l.bf16 %v6108_v23  ;;  %v6130_v60 = vunpack.i.h.bf16 %v6128_v51  ;;  %v6129_v61 = vunpack.i.l.bf16 %v6128_v51 }
0x1247   :  { %v5319_v1 = vsel %vm476_vm0, %v5290_v32, %v6110_v49  ;;  %v5324_v2 = vsel %vm476_vm0, %v5305_v57, %v6109_v50 }
0x1248   :  { %v6113_v44 = vpop.permute.xlu1 %6112  ;;  %v5321_v15 = vsel %vm5320_vm6, %v5319_v1, %v6130_v60  ;;  %v5325_v16 = vsel %vm5320_vm6, %v5324_v2, %v6129_v61 }
0x1249   :  { %v6115_v47 = vunpack.i.h.bf16 %v6113_v44  ;;  %v6114_v48 = vunpack.i.l.bf16 %v6113_v44 }
0x124b   :  { %v5354_v52 = vsel %vm476_vm0, %v5291_v26, %v6115_v47  ;;  %v5357_v53 = vsel %vm476_vm0, %v5340_v45, %v6114_v48 }
0x124c   :  { %v6123_v56 = vpop.permute.xlu1 %6122  ;;  %v5355_v62 = vsel %vm5320_vm6, %v5354_v52, %v6120_v54  ;;  %v5358_v63 = vsel %vm5320_vm6, %v5357_v53, %v6119_v55 }
0x124d   :  { %v6125_v58 = vunpack.i.h.bf16 %v6123_v56  ;;  %v6124_v59 = vunpack.i.l.bf16 %v6123_v56 }
0x124f   :  { %v5356_v4 = vsel %vm5322_vm5, %v5355_v62, %v6125_v58  ;;  %v5359_v5 = vsel %vm5322_vm5, %v5358_v63, %v6124_v59 }
0x1250   :  { %v6133_v9 = vpop.permute.xlu1 %6132  ;;  %v5362_v17 = vrot.slane %v5356_v4, 7  ;;  %v5363_v19 = vrot.slane %v5359_v5, 7 }
0x1251   :  { %v6135_v12 = vunpack.i.h.bf16 %v6133_v9  ;;  %v6134_v14 = vunpack.i.l.bf16 %v6133_v9 }
0x1253   :  { %v5323_v20 = vsel %vm5322_vm5, %v5321_v15, %v6135_v12  ;;  %v5326_v21 = vsel %vm5322_vm5, %v5325_v16, %v6134_v14 }
0x1254   :  { %v5368_v24 = vsel %vm5366_vm7, %v5326_v21, %v5363_v19  ;;  %v5367_v26 = vsel %vm5366_vm7, %v5323_v20, %v5362_v17 }
0x1255   :  { %v5370_v27 = vpack.c.bf16 %v5368_v24, %v5368_v24  ;;  %v5369_v28 = vpack.c.bf16 %v5367_v26, %v5367_v26 }
0x1257   :  { %5538 = vmatprep.mubr.bf16.mxu1 %v5370_v27 }
0x1258   :  { %5539 = vmatmul.mubr.bf16.vlgmr.msra.gmra.mxu1 %v5369_v28 }
0x1318   :  { %v5858_v29 = vpop.f32.mrf.mxu1 }
0x131a   :  { %v5859_v30 = vpop.f32.mrf.mxu1 }
0x131b   :  { %v5860_v31 = vadd.f32 %v5859_v30, %v5858_v29 }
0x131c   :  { %v5861_v32 = vpop.f32.mrf.mxu1 }
0x131d   :  { %v5541_v33 = vadd.f32 %v5860_v31, %v5747_v46 }
0x131e   :  { %v5862_v34 = vpop.f32.mrf.mxu1 }
0x131f   :  { %5546 = vst [vmem:[#allocation2] sm:$0x3] %v5541_v33 }
0x1320   :  { %6249 = shalt.err (!%p6246_p4)
}
0x1321   :  { %5556 = dma.vmem_to_hbm [thread:$0]  %s5554_s30, 32, %s7448_s22, [#allocation3]  }
0x1322   :  { %6258 = dma.done.wait [#allocation3], 32  }
0x1323   :  { %6259 = vsyncadd [#allocation3], 4294967264 }
0x1324   :  { %5560 = vsyncpa [#allocation3], 1 }

</bundles_post_ra>
